<compile_context>
chip_gen: v6e
topology: v6e:2x2x1
jax: 0.10.0
libtpu: 0.0.40
codegen_flags: <defaults>
</compile_context>

<pallas_src>
import math
import functools

import jax
import jax.numpy as jnp
from jax.experimental import pallas as pl
from jax.experimental.pallas import tpu as pltpu

LN_EPS = float(10 ** 6)   # module literally uses eps = 10**6
LN_GAMMA = 1.0            # nn.Parameter(torch.ones(1))
LN_BETA = 0.0             # nn.Parameter(torch.zeros(1))


def _layer_norm(v, d):
    """(x - mean) / (std + eps), std with Bessel correction (torch.std default).

    The divide is done as a per-row EUP reciprocal + multiply.
    """
    mean = jnp.mean(v, axis=-1, keepdims=True)
    var = jnp.sum((v - mean) ** 2, axis=-1, keepdims=True) * (1.0 / (d - 1))
    std = jnp.sqrt(var)
    inv = pl.reciprocal(std + LN_EPS, approx=True)
    return LN_GAMMA * (v - mean) * inv + LN_BETA


def transformer_block_kernel(heads, q_tile, xall_ref, mask_ref,
                             wq_ref, bq_ref, wk_ref, bk_ref, wv_ref, bv_ref,
                             wo_ref, bo_ref, w1_ref, b1_ref, w2_ref, b2_ref,
                             o_ref, k_scr, v_scr, h_scr):
    qi = pl.program_id(1)
    _, S, D = xall_ref.shape
    Tq = q_tile
    d_k = D // heads
    bf16 = jnp.bfloat16

    # ---- K / V / LN(x) for the whole sequence: computed once per batch element
    #      (first query tile) and kept resident in VMEM scratch across q tiles.
    @pl.when(qi == 0)
    def _():
        h_all = _layer_norm(xall_ref[0], D).astype(bf16)               # (S, D)
        h_scr[...] = h_all
        k = jnp.dot(h_all, wk_ref[...], preferred_element_type=jnp.float32) + bk_ref[...]
        v = jnp.dot(h_all, wv_ref[...], preferred_element_type=jnp.float32) + bv_ref[...]
        # store per-head (H, S, d_k) so the attention matmuls batch over heads
        k_scr[...] = jnp.transpose(k.reshape(S, heads, d_k), (1, 0, 2)).astype(bf16)
        v_scr[...] = jnp.transpose(v.reshape(S, heads, d_k), (1, 0, 2)).astype(bf16)

    # ---- sublayer 1: pre-norm + multi-head self-attention + residual --------
    row0 = pl.multiple_of(qi * Tq, Tq)
    x_q = xall_ref[0, pl.ds(row0, Tq), :]                              # (Tq, D) f32
    h = h_scr[pl.ds(row0, Tq), :]                                      # (Tq, D) bf16
    # 1/sqrt(d_k) is pre-folded into wq / bq by the wrapper.
    q = jnp.dot(h, wq_ref[...], preferred_element_type=jnp.float32) + bq_ref[...]
    qh = jnp.transpose(q.reshape(Tq, heads, d_k), (1, 0, 2)).astype(bf16)  # (H,Tq,dk)
    kh = k_scr[...]                                                    # (H, S, dk)
    vh = v_scr[...]                                                    # (H, S, dk)

    scores = jnp.einsum('hqd,hkd->hqk', qh, kh,
                        preferred_element_type=jnp.float32)            # (H, Tq, S)
    keep = mask_ref[0, 0] != 0                                         # (Tq, S)
    scores = jnp.where(keep[None, :, :], scores, -1e9)                 # masked_fill
    scores = scores - jnp.max(scores, axis=-1, keepdims=True)
    p = jnp.exp(scores)
    p = p * pl.reciprocal(jnp.sum(p, axis=-1, keepdims=True), approx=True)
    # TODO(synk): attention / residual / MLP dropout omitted (eval-mode identity).

    ctx = jnp.einsum('hqk,hkd->hqd', p.astype(bf16), vh,
                     preferred_element_type=jnp.float32)               # (H, Tq, dk)
    ctx = jnp.transpose(ctx, (1, 0, 2)).reshape(Tq, D)                 # heads merged
    attn = jnp.dot(ctx.astype(bf16), wo_ref[...],
                   preferred_element_type=jnp.float32) + bo_ref[...]
    y1 = x_q + attn                                                    # skip_1

    # ---- post-attention LayerNormalization ----------------------------------
    y2 = _layer_norm(y1, D)

    # ---- sublayer 2: MLP (Linear -> exact GELU -> Linear) + residual --------
    h1 = jnp.dot(y2.astype(bf16), w1_ref[...],
                 preferred_element_type=jnp.float32) + b1_ref[...]
    g = 0.5 * h1 * (1.0 + jax.lax.erf(h1 * (1.0 / math.sqrt(2.0))))    # exact GELU
    h2 = jnp.dot(g.astype(bf16), w2_ref[...],
                 preferred_element_type=jnp.float32) + b2_ref[...]
    o_ref[0] = (y2 + h2).astype(o_ref.dtype)                           # skip_2


def transformer_block(x, mask, params, heads, q_tile=None):
    B, S, D = x.shape
    Dm = params["w1"].shape[1]
    assert D % heads == 0, "d_model must be divisible by heads"
    d_k = D // heads

    if q_tile is None:
        q_tile = S if S <= 256 else 256
    assert S % q_tile == 0, "q_tile must divide seq_len"
    # int8 mask block sublane dim + bf16 scratch slicing: multiple of 32 (or == S)
    assert q_tile == S or q_tile % 32 == 0, "q_tile must be a multiple of 32 (or == S)"
    nq = S // q_tile

    bf16 = jnp.bfloat16
    scale = 1.0 / math.sqrt(d_k)
    # fold 1/sqrt(d_k) into the q projection; ship weights bf16 (MXU-native)
    wq = (params["wq"] * scale).astype(bf16)
    bq = (params["bq"] * scale).astype(jnp.float32)
    wk = params["wk"].astype(bf16); bk = params["bk"]
    wv = params["wv"].astype(bf16); bv = params["bv"]
    wo = params["wo"].astype(bf16); bo = params["bo"]
    w1 = params["w1"].astype(bf16); b1 = params["b1"]
    w2 = params["w2"].astype(bf16); b2 = params["b2"]
    # 0/1 mask shipped as int8 (4x less HBM->VMEM traffic than f32)
    mask_i8 = (mask != 0).astype(jnp.int8)

    def const2d(shape):
        # Weight/bias block index never changes -> single-buffer (no 2x VMEM).
        return pl.BlockSpec(shape, lambda b, q: (0, 0), pipeline_mode=pl.Buffered(1))

    in_specs = [
        # full-seq x: block index is q-invariant -> DMA'd once per batch element;
        # the query tile (residual + pre-normed rows) is sliced from VMEM.
        pl.BlockSpec((1, S, D), lambda b, q: (b, 0, 0)),
        pl.BlockSpec((1, 1, q_tile, S), lambda b, q: (b, 0, q, 0)),  # mask rows
        const2d((D, D)), const2d((1, D)),       # w_q, b_q
        const2d((D, D)), const2d((1, D)),       # w_k, b_k
        const2d((D, D)), const2d((1, D)),       # w_v, b_v
        const2d((D, D)), const2d((1, D)),       # w_o, b_o
        const2d((D, Dm)), const2d((1, Dm)),     # w1, b1
        const2d((Dm, D)), const2d((1, D)),      # w2, b2
    ]

    kernel = functools.partial(transformer_block_kernel, heads, q_tile)
    return pl.pallas_call(
        kernel,
        out_shape=jax.ShapeDtypeStruct((B, S, D), x.dtype),
        grid=(B, nq),
        in_specs=in_specs,
        out_specs=pl.BlockSpec((1, q_tile, D), lambda b, q: (b, q, 0)),
        scratch_shapes=[
            pltpu.VMEM((heads, S, d_k), jnp.bfloat16),   # K, per-head layout
            pltpu.VMEM((heads, S, d_k), jnp.bfloat16),   # V, per-head layout
            pltpu.VMEM((S, D), jnp.bfloat16),            # LN(x) for the full sequence
        ],
        compiler_params=pltpu.CompilerParams(
            # q-tile axis is "arbitrary" so the per-batch K/V/LN scratch carry is valid.
            dimension_semantics=("parallel", "arbitrary"),
            vmem_limit_bytes=64 * 1024 * 1024,
        ),
    )(x, mask_i8,
      wq, bq, wk, bk, wv, bv, wo, bo, w1, b1, w2, b2)


def reference(x, mask, p, heads):
    """Pure-JAX f32 reference mirroring the PyTorch forward (eval mode)."""
    def ln(v):
        mean = v.mean(-1, keepdims=True)
        var = ((v - mean) ** 2).sum(-1, keepdims=True) / (v.shape[-1] - 1)
        return LN_GAMMA * (v - mean) / (jnp.sqrt(var) + LN_EPS) + LN_BETA

    B, S, D = x.shape
    dk = D // heads
    h = ln(x)
    q = h @ p["wq"] + p["bq"]
    k = h @ p["wk"] + p["bk"]
    v = h @ p["wv"] + p["bv"]
    qh = q.reshape(B, S, heads, dk).transpose(0, 2, 1, 3)
    kh = k.reshape(B, S, heads, dk).transpose(0, 2, 1, 3)
    vh = v.reshape(B, S, heads, dk).transpose(0, 2, 1, 3)
    scores = qh @ jnp.swapaxes(kh, -1, -2) / math.sqrt(dk)
    scores = jnp.where(mask == 0, -1e9, scores)
    p_attn = jax.nn.softmax(scores, axis=-1)
    ctx = (p_attn @ vh).transpose(0, 2, 1, 3).reshape(B, S, D)
    y1 = x + (ctx @ p["wo"] + p["bo"])
    y2 = ln(y1)
    h1 = y2 @ p["w1"] + p["b1"]
    g = 0.5 * h1 * (1.0 + jax.lax.erf(h1 / math.sqrt(2.0)))
    return y2 + (g @ p["w2"] + p["b2"])


if __name__ == "__main__":
    B, S, D, H, DM = 2, 64, 32, 4, 64
    TQ = 32   # two query tiles per batch element -> exercises the seq tiling path

    key = jax.random.PRNGKey(0)
    keys = jax.random.split(key, 16)

    def w(k, shape, scale=0.02):
        return (scale * jax.random.normal(k, shape)).astype(jnp.float32)

    params = {
        "wq": w(keys[0], (D, D)),   "bq": w(keys[1], (1, D)),
        "wk": w(keys[2], (D, D)),   "bk": w(keys[3], (1, D)),
        "wv": w(keys[4], (D, D)),   "bv": w(keys[5], (1, D)),
        "wo": w(keys[6], (D, D)),   "bo": w(keys[7], (1, D)),
        "w1": w(keys[8], (D, DM)),  "b1": w(keys[9], (1, DM)),
        "w2": w(keys[10], (DM, D)), "b2": w(keys[11], (1, D)),
    }

    x = jax.random.normal(keys[12], (B, S, D), dtype=jnp.float32)
    # causal mask, shape (B, 1, S, S): 1 = keep, 0 = masked (-1e9)
    causal = jnp.tril(jnp.ones((S, S), dtype=jnp.float32))
    mask = jnp.broadcast_to(causal, (B, 1, S, S))

    out = transformer_block(x, mask, params, H, q_tile=TQ)
    out = jax.block_until_ready(out)

    ref = reference(x, mask, params, H)
    assert out.shape == (B, S, D)
    # bf16 MXU operands + approx EUP reciprocals vs. the f32 reference -> loosened tol.
    assert jnp.allclose(out, ref, rtol=2e-2, atol=2e-3), "mismatch vs reference"

    print("KERNEL_OK")
</pallas_src>

<mosaic_0001>
module attributes {stable_mosaic.version = 11 : i64} {
  func.func @transformer_block_kernel(%arg0: i32, %arg1: i32, %arg2: memref<1x64x32xf32, #tpu.memory_space<vmem>>, %arg3: memref<1x1x32x64xi8, #tpu.memory_space<vmem>>, %arg4: memref<32x32xbf16, #tpu.memory_space<vmem>>, %arg5: memref<1x32xf32, #tpu.memory_space<vmem>>, %arg6: memref<32x32xbf16, #tpu.memory_space<vmem>>, %arg7: memref<1x32xf32, #tpu.memory_space<vmem>>, %arg8: memref<32x32xbf16, #tpu.memory_space<vmem>>, %arg9: memref<1x32xf32, #tpu.memory_space<vmem>>, %arg10: memref<32x32xbf16, #tpu.memory_space<vmem>>, %arg11: memref<1x32xf32, #tpu.memory_space<vmem>>, %arg12: memref<32x64xbf16, #tpu.memory_space<vmem>>, %arg13: memref<1x64xf32, #tpu.memory_space<vmem>>, %arg14: memref<64x32xbf16, #tpu.memory_space<vmem>>, %arg15: memref<1x32xf32, #tpu.memory_space<vmem>>, %arg16: memref<1x32x32xf32, #tpu.memory_space<vmem>>, %arg17: memref<4x64x8xbf16, #tpu.memory_space<vmem>>, %arg18: memref<4x64x8xbf16, #tpu.memory_space<vmem>>, %arg19: memref<64x32xbf16, #tpu.memory_space<vmem>>) attributes {dimension_semantics = [#tpu.dimension_semantics<parallel>, #tpu.dimension_semantics<arbitrary>], iteration_bounds = array<i64: 2, 2>, scalar_prefetch = 0 : i64, scratch_operands = 3 : i64, tpu.core_type = #tpu.core_type<tc>, window_params = [{transform_indices = @transform_0, window_bounds = array<i64: 1, 64, 32>}, {transform_indices = @transform_1, window_bounds = array<i64: 1, 1, 32, 64>}, {pipeline_mode = #tpu.pipeline_mode<synchronous>, transform_indices = @transform_2, window_bounds = array<i64: 32, 32>}, {pipeline_mode = #tpu.pipeline_mode<synchronous>, transform_indices = @transform_3, window_bounds = array<i64: 1, 32>}, {pipeline_mode = #tpu.pipeline_mode<synchronous>, transform_indices = @transform_4, window_bounds = array<i64: 32, 32>}, {pipeline_mode = #tpu.pipeline_mode<synchronous>, transform_indices = @transform_5, window_bounds = array<i64: 1, 32>}, {pipeline_mode = #tpu.pipeline_mode<synchronous>, transform_indices = @transform_6, window_bounds = array<i64: 32, 32>}, {pipeline_mode = #tpu.pipeline_mode<synchronous>, transform_indices = @transform_7, window_bounds = array<i64: 1, 32>}, {pipeline_mode = #tpu.pipeline_mode<synchronous>, transform_indices = @transform_8, window_bounds = array<i64: 32, 32>}, {pipeline_mode = #tpu.pipeline_mode<synchronous>, transform_indices = @transform_9, window_bounds = array<i64: 1, 32>}, {pipeline_mode = #tpu.pipeline_mode<synchronous>, transform_indices = @transform_10, window_bounds = array<i64: 32, 64>}, {pipeline_mode = #tpu.pipeline_mode<synchronous>, transform_indices = @transform_11, window_bounds = array<i64: 1, 64>}, {pipeline_mode = #tpu.pipeline_mode<synchronous>, transform_indices = @transform_12, window_bounds = array<i64: 64, 32>}, {pipeline_mode = #tpu.pipeline_mode<synchronous>, transform_indices = @transform_13, window_bounds = array<i64: 1, 32>}, {transform_indices = @transform_14, window_bounds = array<i64: 1, 32, 32>}]} {
    %c0_i32 = arith.constant 0 : i32
    %0 = arith.cmpi eq, %arg1, %c0_i32 : i32
    %1 = arith.extui %0 : i1 to i32
    %c0_i32_0 = arith.constant 0 : i32
    %2 = arith.cmpi ne, %1, %c0_i32_0 : i32
    scf.if %2 {
      %c0_50 = arith.constant 0 : index
      %c0_51 = arith.constant 0 : index
      %c0_52 = arith.constant 0 : index
      %98 = vector.load %arg2[%c0_50, %c0_51, %c0_52] : memref<1x64x32xf32, #tpu.memory_space<vmem>>, vector<1x64x32xf32>
      %99 = vector.shape_cast %98 : vector<1x64x32xf32> to vector<64x32xf32>
      %cst_53 = arith.constant dense<0.000000e+00> : vector<64xf32>
      %100 = vector.multi_reduction <add>, %99, %cst_53 [1] : vector<64x32xf32> to vector<64xf32>
      %101 = vector.shape_cast %100 : vector<64xf32> to vector<64x1xf32>
      %cst_54 = arith.constant 3.200000e+01 : f32
      %102 = vector.broadcast %cst_54 : f32 to vector<64x1xf32>
      %103 = arith.divf %101, %102 : vector<64x1xf32>
      %104 = vector.broadcast %103 : vector<64x1xf32> to vector<64x32xf32>
      %105 = arith.subf %99, %104 : vector<64x32xf32>
      %106 = arith.mulf %105, %105 : vector<64x32xf32>
      %cst_55 = arith.constant dense<0.000000e+00> : vector<64xf32>
      %107 = vector.multi_reduction <add>, %106, %cst_55 [1] : vector<64x32xf32> to vector<64xf32>
      %108 = vector.shape_cast %107 : vector<64xf32> to vector<64x1xf32>
      %cst_56 = arith.constant 0.0322580636 : f32
      %109 = vector.broadcast %cst_56 : f32 to vector<64x1xf32>
      %110 = arith.mulf %108, %109 : vector<64x1xf32>
      %111 = math.sqrt %110 : vector<64x1xf32>
      %cst_57 = arith.constant 1.000000e+06 : f32
      %112 = vector.broadcast %cst_57 : f32 to vector<64x1xf32>
      %113 = arith.addf %111, %112 : vector<64x1xf32>
      %114 = tpu.reciprocal %113 {approx = true} : vector<64x1xf32> -> vector<64x1xf32>
      %115 = vector.broadcast %103 : vector<64x1xf32> to vector<64x32xf32>
      %116 = arith.subf %99, %115 : vector<64x32xf32>
      %cst_58 = arith.constant 1.000000e+00 : f32
      %117 = vector.broadcast %cst_58 : f32 to vector<64x32xf32>
      %118 = arith.mulf %117, %116 : vector<64x32xf32>
      %119 = vector.broadcast %114 : vector<64x1xf32> to vector<64x32xf32>
      %120 = arith.mulf %118, %119 : vector<64x32xf32>
      %cst_59 = arith.constant 0.000000e+00 : f32
      %121 = vector.broadcast %cst_59 : f32 to vector<64x32xf32>
      %122 = arith.addf %120, %121 : vector<64x32xf32>
      %123 = arith.truncf %122 : vector<64x32xf32> to vector<64x32xbf16>
      %c0_60 = arith.constant 0 : index
      %c0_61 = arith.constant 0 : index
      %124 = vector.load %arg19[%c0_60, %c0_61] : memref<64x32xbf16, #tpu.memory_space<vmem>>, vector<64x32xbf16>
      tpu.vector_store %arg19[%c0_60, %c0_61], %123 {strides = array<i32>} : memref<64x32xbf16, #tpu.memory_space<vmem>>, vector<64x32xbf16>,
      %c0_62 = arith.constant 0 : index
      %c0_63 = arith.constant 0 : index
      %125 = vector.load %arg6[%c0_62, %c0_63] : memref<32x32xbf16, #tpu.memory_space<vmem>>, vector<32x32xbf16>
      %cst_64 = arith.constant dense<0.000000e+00> : vector<64x32xf32>
      %126 = tpu.matmul %123, %125, %cst_64 {dimension_numbers = #tpu.dot_dimension_numbers<[1], [0], [0], [1], [0, 0, 1, 1], [], []>} : vector<64x32xbf16>, vector<32x32xbf16>, vector<64x32xf32> -> vector<64x32xf32>
      %c0_65 = arith.constant 0 : index
      %c0_66 = arith.constant 0 : index
      %127 = vector.load %arg7[%c0_65, %c0_66] : memref<1x32xf32, #tpu.memory_space<vmem>>, vector<1x32xf32>
      %128 = vector.broadcast %127 : vector<1x32xf32> to vector<64x32xf32>
      %129 = arith.addf %126, %128 : vector<64x32xf32>
      %c0_67 = arith.constant 0 : index
      %c0_68 = arith.constant 0 : index
      %130 = vector.load %arg8[%c0_67, %c0_68] : memref<32x32xbf16, #tpu.memory_space<vmem>>, vector<32x32xbf16>
      %cst_69 = arith.constant dense<0.000000e+00> : vector<64x32xf32>
      %131 = tpu.matmul %123, %130, %cst_69 {dimension_numbers = #tpu.dot_dimension_numbers<[1], [0], [0], [1], [0, 0, 1, 1], [], []>} : vector<64x32xbf16>, vector<32x32xbf16>, vector<64x32xf32> -> vector<64x32xf32>
      %c0_70 = arith.constant 0 : index
      %c0_71 = arith.constant 0 : index
      %132 = vector.load %arg9[%c0_70, %c0_71] : memref<1x32xf32, #tpu.memory_space<vmem>>, vector<1x32xf32>
      %133 = vector.broadcast %132 : vector<1x32xf32> to vector<64x32xf32>
      %134 = arith.addf %131, %133 : vector<64x32xf32>
      %135 = vector.shape_cast %129 : vector<64x32xf32> to vector<64x4x8xf32>
      %136 = tpu.transpose %135, [1, 0, 2] : vector<64x4x8xf32> -> vector<4x64x8xf32>
      %137 = arith.truncf %136 : vector<4x64x8xf32> to vector<4x64x8xbf16>
      %c0_72 = arith.constant 0 : index
      %c0_73 = arith.constant 0 : index
      %c0_74 = arith.constant 0 : index
      %138 = vector.load %arg17[%c0_72, %c0_73, %c0_74] : memref<4x64x8xbf16, #tpu.memory_space<vmem>>, vector<4x64x8xbf16>
      tpu.vector_store %arg17[%c0_72, %c0_73, %c0_74], %137 {strides = array<i32>} : memref<4x64x8xbf16, #tpu.memory_space<vmem>>, vector<4x64x8xbf16>,
      %139 = vector.shape_cast %134 : vector<64x32xf32> to vector<64x4x8xf32>
      %140 = tpu.transpose %139, [1, 0, 2] : vector<64x4x8xf32> -> vector<4x64x8xf32>
      %141 = arith.truncf %140 : vector<4x64x8xf32> to vector<4x64x8xbf16>
      %c0_75 = arith.constant 0 : index
      %c0_76 = arith.constant 0 : index
      %c0_77 = arith.constant 0 : index
      %142 = vector.load %arg18[%c0_75, %c0_76, %c0_77] : memref<4x64x8xbf16, #tpu.memory_space<vmem>>, vector<4x64x8xbf16>
      tpu.vector_store %arg18[%c0_75, %c0_76, %c0_77], %141 {strides = array<i32>} : memref<4x64x8xbf16, #tpu.memory_space<vmem>>, vector<4x64x8xbf16>,
    } else {
    }
    %c32_i32 = arith.constant 32 : i32
    %3 = arith.muli %arg1, %c32_i32 : i32
    %4 = tpu.assume_multiple %3, 32 : i32
    %c0 = arith.constant 0 : index
    %5 = arith.index_cast %4 : i32 to index
    %c0_1 = arith.constant 0 : index
    %6 = vector.load %arg2[%c0, %5, %c0_1] : memref<1x64x32xf32, #tpu.memory_space<vmem>>, vector<1x32x32xf32>
    %7 = vector.shape_cast %6 : vector<1x32x32xf32> to vector<32x32xf32>
    %8 = arith.index_cast %4 : i32 to index
    %c0_2 = arith.constant 0 : index
    %9 = vector.load %arg19[%8, %c0_2] : memref<64x32xbf16, #tpu.memory_space<vmem>>, vector<32x32xbf16>
    %c0_3 = arith.constant 0 : index
    %c0_4 = arith.constant 0 : index
    %10 = vector.load %arg4[%c0_3, %c0_4] : memref<32x32xbf16, #tpu.memory_space<vmem>>, vector<32x32xbf16>
    %cst = arith.constant dense<0.000000e+00> : vector<32x32xf32>
    %11 = tpu.matmul %9, %10, %cst {dimension_numbers = #tpu.dot_dimension_numbers<[1], [0], [0], [1], [0, 0, 1, 1], [], []>} : vector<32x32xbf16>, vector<32x32xbf16>, vector<32x32xf32> -> vector<32x32xf32>
    %c0_5 = arith.constant 0 : index
    %c0_6 = arith.constant 0 : index
    %12 = vector.load %arg5[%c0_5, %c0_6] : memref<1x32xf32, #tpu.memory_space<vmem>>, vector<1x32xf32>
    %13 = vector.broadcast %12 : vector<1x32xf32> to vector<32x32xf32>
    %14 = arith.addf %11, %13 : vector<32x32xf32>
    %15 = vector.shape_cast %14 : vector<32x32xf32> to vector<32x4x8xf32>
    %16 = tpu.transpose %15, [1, 0, 2] : vector<32x4x8xf32> -> vector<4x32x8xf32>
    %17 = arith.truncf %16 : vector<4x32x8xf32> to vector<4x32x8xbf16>
    %c0_7 = arith.constant 0 : index
    %c0_8 = arith.constant 0 : index
    %c0_9 = arith.constant 0 : index
    %18 = vector.load %arg17[%c0_7, %c0_8, %c0_9] : memref<4x64x8xbf16, #tpu.memory_space<vmem>>, vector<4x64x8xbf16>
    %c0_10 = arith.constant 0 : index
    %c0_11 = arith.constant 0 : index
    %c0_12 = arith.constant 0 : index
    %19 = vector.load %arg18[%c0_10, %c0_11, %c0_12] : memref<4x64x8xbf16, #tpu.memory_space<vmem>>, vector<4x64x8xbf16>
    "tpu.trace_start"() <{level = 10 : i32, message = "hqd,hkd->hqk"}> : () -> ()
    %cst_13 = arith.constant dense<0.000000e+00> : vector<4x32x64xf32>
    %20 = tpu.matmul %17, %18, %cst_13 {dimension_numbers = #tpu.dot_dimension_numbers<[2], [2], [1], [1], [0, 0, 0, 1, 1, 1], [0], [0]>} : vector<4x32x8xbf16>, vector<4x64x8xbf16>, vector<4x32x64xf32> -> vector<4x32x64xf32>
    "tpu.trace_stop"() : () -> ()
    %c0_14 = arith.constant 0 : index
    %c0_15 = arith.constant 0 : index
    %c0_16 = arith.constant 0 : index
    %c0_17 = arith.constant 0 : index
    %21 = vector.load %arg3[%c0_14, %c0_15, %c0_16, %c0_17] : memref<1x1x32x64xi8, #tpu.memory_space<vmem>>, vector<1x1x32x64xi8>
    %22 = vector.shape_cast %21 : vector<1x1x32x64xi8> to vector<32x64xi8>
    %c0_i8 = arith.constant 0 : i8
    %23 = vector.broadcast %c0_i8 : i8 to vector<32x64xi8>
    %24 = arith.cmpi ne, %22, %23 : vector<32x64xi8>
    %25 = vector.shape_cast %24 : vector<32x64xi1> to vector<1x32x64xi1>
    %cst_18 = arith.constant -1.000000e+09 : f32
    %26 = vector.shape_cast %25 : vector<1x32x64xi1> to vector<1x32x64xi1>
    %27 = vector.broadcast %26 : vector<1x32x64xi1> to vector<4x32x64xi1>
    %28 = vector.broadcast %cst_18 : f32 to vector<4x32x64xf32>
    %29 = arith.select %27, %20, %28 : vector<4x32x64xi1>, vector<4x32x64xf32>
    %cst_19 = arith.constant dense<0xFF800000> : vector<4x32xf32>
    %30 = vector.multi_reduction <maximumf>, %29, %cst_19 [2] : vector<4x32x64xf32> to vector<4x32xf32>
    %31 = vector.shape_cast %30 : vector<4x32xf32> to vector<4x32x1xf32>
    %32 = vector.broadcast %31 : vector<4x32x1xf32> to vector<4x32x64xf32>
    %33 = arith.subf %29, %32 : vector<4x32x64xf32>
    %34 = math.exp %33 : vector<4x32x64xf32>
    %cst_20 = arith.constant dense<0.000000e+00> : vector<4x32xf32>
    %35 = vector.multi_reduction <add>, %34, %cst_20 [2] : vector<4x32x64xf32> to vector<4x32xf32>
    %36 = vector.shape_cast %35 : vector<4x32xf32> to vector<4x32x1xf32>
    %37 = tpu.reciprocal %36 {approx = true} : vector<4x32x1xf32> -> vector<4x32x1xf32>
    %38 = vector.broadcast %37 : vector<4x32x1xf32> to vector<4x32x64xf32>
    %39 = arith.mulf %34, %38 : vector<4x32x64xf32>
    %40 = arith.truncf %39 : vector<4x32x64xf32> to vector<4x32x64xbf16>
    "tpu.trace_start"() <{level = 10 : i32, message = "hqk,hkd->hqd"}> : () -> ()
    %cst_21 = arith.constant dense<0.000000e+00> : vector<4x32x8xf32>
    %41 = tpu.matmul %40, %19, %cst_21 {dimension_numbers = #tpu.dot_dimension_numbers<[2], [1], [1], [2], [0, 0, 0, 1, 1, 2], [0], [0]>} : vector<4x32x64xbf16>, vector<4x64x8xbf16>, vector<4x32x8xf32> -> vector<4x32x8xf32>
    "tpu.trace_stop"() : () -> ()
    %42 = tpu.transpose %41, [1, 0, 2] : vector<4x32x8xf32> -> vector<32x4x8xf32>
    %43 = vector.shape_cast %42 : vector<32x4x8xf32> to vector<32x32xf32>
    %44 = arith.truncf %43 : vector<32x32xf32> to vector<32x32xbf16>
    %c0_22 = arith.constant 0 : index
    %c0_23 = arith.constant 0 : index
    %45 = vector.load %arg10[%c0_22, %c0_23] : memref<32x32xbf16, #tpu.memory_space<vmem>>, vector<32x32xbf16>
    %cst_24 = arith.constant dense<0.000000e+00> : vector<32x32xf32>
    %46 = tpu.matmul %44, %45, %cst_24 {dimension_numbers = #tpu.dot_dimension_numbers<[1], [0], [0], [1], [0, 0, 1, 1], [], []>} : vector<32x32xbf16>, vector<32x32xbf16>, vector<32x32xf32> -> vector<32x32xf32>
    %c0_25 = arith.constant 0 : index
    %c0_26 = arith.constant 0 : index
    %47 = vector.load %arg11[%c0_25, %c0_26] : memref<1x32xf32, #tpu.memory_space<vmem>>, vector<1x32xf32>
    %48 = vector.broadcast %47 : vector<1x32xf32> to vector<32x32xf32>
    %49 = arith.addf %46, %48 : vector<32x32xf32>
    %50 = arith.addf %7, %49 : vector<32x32xf32>
    %cst_27 = arith.constant dense<0.000000e+00> : vector<32xf32>
    %51 = vector.multi_reduction <add>, %50, %cst_27 [1] : vector<32x32xf32> to vector<32xf32>
    %52 = vector.shape_cast %51 : vector<32xf32> to vector<32x1xf32>
    %cst_28 = arith.constant 3.200000e+01 : f32
    %53 = vector.broadcast %cst_28 : f32 to vector<32x1xf32>
    %54 = arith.divf %52, %53 : vector<32x1xf32>
    %55 = vector.broadcast %54 : vector<32x1xf32> to vector<32x32xf32>
    %56 = arith.subf %50, %55 : vector<32x32xf32>
    %57 = arith.mulf %56, %56 : vector<32x32xf32>
    %cst_29 = arith.constant dense<0.000000e+00> : vector<32xf32>
    %58 = vector.multi_reduction <add>, %57, %cst_29 [1] : vector<32x32xf32> to vector<32xf32>
    %59 = vector.shape_cast %58 : vector<32xf32> to vector<32x1xf32>
    %cst_30 = arith.constant 0.0322580636 : f32
    %60 = vector.broadcast %cst_30 : f32 to vector<32x1xf32>
    %61 = arith.mulf %59, %60 : vector<32x1xf32>
    %62 = math.sqrt %61 : vector<32x1xf32>
    %cst_31 = arith.constant 1.000000e+06 : f32
    %63 = vector.broadcast %cst_31 : f32 to vector<32x1xf32>
    %64 = arith.addf %62, %63 : vector<32x1xf32>
    %65 = tpu.reciprocal %64 {approx = true} : vector<32x1xf32> -> vector<32x1xf32>
    %66 = vector.broadcast %54 : vector<32x1xf32> to vector<32x32xf32>
    %67 = arith.subf %50, %66 : vector<32x32xf32>
    %cst_32 = arith.constant 1.000000e+00 : f32
    %68 = vector.broadcast %cst_32 : f32 to vector<32x32xf32>
    %69 = arith.mulf %68, %67 : vector<32x32xf32>
    %70 = vector.broadcast %65 : vector<32x1xf32> to vector<32x32xf32>
    %71 = arith.mulf %69, %70 : vector<32x32xf32>
    %cst_33 = arith.constant 0.000000e+00 : f32
    %72 = vector.broadcast %cst_33 : f32 to vector<32x32xf32>
    %73 = arith.addf %71, %72 : vector<32x32xf32>
    %74 = arith.truncf %73 : vector<32x32xf32> to vector<32x32xbf16>
    %c0_34 = arith.constant 0 : index
    %c0_35 = arith.constant 0 : index
    %75 = vector.load %arg12[%c0_34, %c0_35] : memref<32x64xbf16, #tpu.memory_space<vmem>>, vector<32x64xbf16>
    %cst_36 = arith.constant dense<0.000000e+00> : vector<32x64xf32>
    %76 = tpu.matmul %74, %75, %cst_36 {dimension_numbers = #tpu.dot_dimension_numbers<[1], [0], [0], [1], [0, 0, 1, 1], [], []>} : vector<32x32xbf16>, vector<32x64xbf16>, vector<32x64xf32> -> vector<32x64xf32>
    %c0_37 = arith.constant 0 : index
    %c0_38 = arith.constant 0 : index
    %77 = vector.load %arg13[%c0_37, %c0_38] : memref<1x64xf32, #tpu.memory_space<vmem>>, vector<1x64xf32>
    %78 = vector.broadcast %77 : vector<1x64xf32> to vector<32x64xf32>
    %79 = arith.addf %76, %78 : vector<32x64xf32>
    %cst_39 = arith.constant 5.000000e-01 : f32
    %80 = vector.broadcast %cst_39 : f32 to vector<32x64xf32>
    %81 = arith.mulf %80, %79 : vector<32x64xf32>
    %cst_40 = arith.constant 0.707106769 : f32
    %82 = vector.broadcast %cst_40 : f32 to vector<32x64xf32>
    %83 = arith.mulf %79, %82 : vector<32x64xf32>
    %84 = math.erf %83 : vector<32x64xf32>
    %cst_41 = arith.constant 1.000000e+00 : f32
    %85 = vector.broadcast %cst_41 : f32 to vector<32x64xf32>
    %86 = arith.addf %85, %84 : vector<32x64xf32>
    %87 = arith.mulf %81, %86 : vector<32x64xf32>
    %88 = arith.truncf %87 : vector<32x64xf32> to vector<32x64xbf16>
    %c0_42 = arith.constant 0 : index
    %c0_43 = arith.constant 0 : index
    %89 = vector.load %arg14[%c0_42, %c0_43] : memref<64x32xbf16, #tpu.memory_space<vmem>>, vector<64x32xbf16>
    %cst_44 = arith.constant dense<0.000000e+00> : vector<32x32xf32>
    %90 = tpu.matmul %88, %89, %cst_44 {dimension_numbers = #tpu.dot_dimension_numbers<[1], [0], [0], [1], [0, 0, 1, 1], [], []>} : vector<32x64xbf16>, vector<64x32xbf16>, vector<32x32xf32> -> vector<32x32xf32>
    %c0_45 = arith.constant 0 : index
    %c0_46 = arith.constant 0 : index
    %91 = vector.load %arg15[%c0_45, %c0_46] : memref<1x32xf32, #tpu.memory_space<vmem>>, vector<1x32xf32>
    %92 = vector.broadcast %91 : vector<1x32xf32> to vector<32x32xf32>
    %93 = arith.addf %90, %92 : vector<32x32xf32>
    %94 = arith.addf %73, %93 : vector<32x32xf32>
    %c0_47 = arith.constant 0 : index
    %c0_48 = arith.constant 0 : index
    %c0_49 = arith.constant 0 : index
    %95 = vector.load %arg16[%c0_47, %c0_48, %c0_49] : memref<1x32x32xf32, #tpu.memory_space<vmem>>, vector<1x32x32xf32>
    %96 = vector.shape_cast %95 : vector<1x32x32xf32> to vector<32x32xf32>
    %97 = vector.shape_cast %94 : vector<32x32xf32> to vector<1x32x32xf32>
    tpu.vector_store %arg16[%c0_47, %c0_48, %c0_49], %97 {strides = array<i32>} : memref<1x32x32xf32, #tpu.memory_space<vmem>>, vector<1x32x32xf32>,
    return
  }
  func.func @transform_0(%arg0: i32, %arg1: i32) -> (i32, i32, i32) {
    %c0_i32 = arith.constant 0 : i32
    %c0_i32_0 = arith.constant 0 : i32
    %c0_i32_1 = arith.constant 0 : i32
    return %arg0, %c0_i32, %c0_i32_0 : i32, i32, i32
  }
  func.func @transform_1(%arg0: i32, %arg1: i32) -> (i32, i32, i32, i32) {
    %c0_i32 = arith.constant 0 : i32
    %c0_i32_0 = arith.constant 0 : i32
    %c0_i32_1 = arith.constant 0 : i32
    return %arg0, %c0_i32, %arg1, %c0_i32_0 : i32, i32, i32, i32
  }
  func.func @transform_2(%arg0: i32, %arg1: i32) -> (i32, i32) {
    %c0_i32 = arith.constant 0 : i32
    %c0_i32_0 = arith.constant 0 : i32
    %c0_i32_1 = arith.constant 0 : i32
    return %c0_i32, %c0_i32_0 : i32, i32
  }
  func.func @transform_3(%arg0: i32, %arg1: i32) -> (i32, i32) {
    %c0_i32 = arith.constant 0 : i32
    %c0_i32_0 = arith.constant 0 : i32
    %c0_i32_1 = arith.constant 0 : i32
    return %c0_i32, %c0_i32_0 : i32, i32
  }
  func.func @transform_4(%arg0: i32, %arg1: i32) -> (i32, i32) {
    %c0_i32 = arith.constant 0 : i32
    %c0_i32_0 = arith.constant 0 : i32
    %c0_i32_1 = arith.constant 0 : i32
    return %c0_i32, %c0_i32_0 : i32, i32
  }
  func.func @transform_5(%arg0: i32, %arg1: i32) -> (i32, i32) {
    %c0_i32 = arith.constant 0 : i32
    %c0_i32_0 = arith.constant 0 : i32
    %c0_i32_1 = arith.constant 0 : i32
    return %c0_i32, %c0_i32_0 : i32, i32
  }
  func.func @transform_6(%arg0: i32, %arg1: i32) -> (i32, i32) {
    %c0_i32 = arith.constant 0 : i32
    %c0_i32_0 = arith.constant 0 : i32
    %c0_i32_1 = arith.constant 0 : i32
    return %c0_i32, %c0_i32_0 : i32, i32
  }
  func.func @transform_7(%arg0: i32, %arg1: i32) -> (i32, i32) {
    %c0_i32 = arith.constant 0 : i32
    %c0_i32_0 = arith.constant 0 : i32
    %c0_i32_1 = arith.constant 0 : i32
    return %c0_i32, %c0_i32_0 : i32, i32
  }
  func.func @transform_8(%arg0: i32, %arg1: i32) -> (i32, i32) {
    %c0_i32 = arith.constant 0 : i32
    %c0_i32_0 = arith.constant 0 : i32
    %c0_i32_1 = arith.constant 0 : i32
    return %c0_i32, %c0_i32_0 : i32, i32
  }
  func.func @transform_9(%arg0: i32, %arg1: i32) -> (i32, i32) {
    %c0_i32 = arith.constant 0 : i32
    %c0_i32_0 = arith.constant 0 : i32
    %c0_i32_1 = arith.constant 0 : i32
    return %c0_i32, %c0_i32_0 : i32, i32
  }
  func.func @transform_10(%arg0: i32, %arg1: i32) -> (i32, i32) {
    %c0_i32 = arith.constant 0 : i32
    %c0_i32_0 = arith.constant 0 : i32
    %c0_i32_1 = arith.constant 0 : i32
    return %c0_i32, %c0_i32_0 : i32, i32
  }
  func.func @transform_11(%arg0: i32, %arg1: i32) -> (i32, i32) {
    %c0_i32 = arith.constant 0 : i32
    %c0_i32_0 = arith.constant 0 : i32
    %c0_i32_1 = arith.constant 0 : i32
    return %c0_i32, %c0_i32_0 : i32, i32
  }
  func.func @transform_12(%arg0: i32, %arg1: i32) -> (i32, i32) {
    %c0_i32 = arith.constant 0 : i32
    %c0_i32_0 = arith.constant 0 : i32
    %c0_i32_1 = arith.constant 0 : i32
    return %c0_i32, %c0_i32_0 : i32, i32
  }
  func.func @transform_13(%arg0: i32, %arg1: i32) -> (i32, i32) {
    %c0_i32 = arith.constant 0 : i32
    %c0_i32_0 = arith.constant 0 : i32
    %c0_i32_1 = arith.constant 0 : i32
    return %c0_i32, %c0_i32_0 : i32, i32
  }
  func.func @transform_14(%arg0: i32, %arg1: i32) -> (i32, i32, i32) {
    %c0_i32 = arith.constant 0 : i32
    %c0_i32_0 = arith.constant 0 : i32
    return %arg0, %arg1, %c0_i32 : i32, i32, i32
  }
}

</mosaic_0001>

<bundles_post_ra>
// kernel: tpu_custom_call.1
= control target key start
LH: loop header
LB: loop body
LE: loop exit
PB: predicated region body
PF: predicated region fallthrough
CT: control target
= control target key end

     0   :  { %s7269_s29 = smov 0   ;;  %s7271_s30 = smov 0   ;;  %s8780_s0 = inlined_call_operand.vmem [shape: f32[2,64,32], index: 0, kind: input, shape index: {}]   ;;  %s8781_s1 = inlined_call_operand.vmem [shape: s8[2,1,64,64], index: 1, kind: input, shape index: {}]   ;;  %s8782_s2 = inlined_call_operand.vmem [shape: bf16[32,32], index: 2, kind: input, shape index: {}]   ;;  %s8783_s3 = inlined_call_operand.vmem [shape: f32[1,32], index: 3, kind: input, shape index: {}]   ;;  %s8784_s4 = inlined_call_operand.vmem [shape: bf16[32,32], index: 4, kind: input, shape index: {}]   ;;  %s8785_s5 = inlined_call_operand.vmem [shape: f32[1,32], index: 5, kind: input, shape index: {}]   ;;  %s8786_s6 = inlined_call_operand.vmem [shape: bf16[32,32], index: 6, kind: input, shape index: {}]   ;;  %s8787_s7 = inlined_call_operand.vmem [shape: f32[1,32], index: 7, kind: input, shape index: {}]   ;;  %s8788_s8 = inlined_call_operand.vmem [shape: bf16[32,32], index: 8, kind: input, shape index: {}]   ;;  %s8789_s9 = inlined_call_operand.vmem [shape: f32[1,32], index: 9, kind: input, shape index: {}]   ;;  %s8790_s10 = inlined_call_operand.vmem [shape: bf16[32,64], index: 10, kind: input, shape index: {}]   ;;  %s8791_s11 = inlined_call_operand.vmem [shape: f32[1,64], index: 11, kind: input, shape index: {}]   ;;  %s8792_s12 = inlined_call_operand.vmem [shape: bf16[64,32], index: 12, kind: input, shape index: {}]   ;;  %s8793_s13 = inlined_call_operand.vmem [shape: f32[1,32], index: 13, kind: input, shape index: {}]   ;;  %s8794_s14 = inlined_call_operand.vmem [shape: f32[2,64,32], index: 14, kind: output, shape index: {}]  }
   0x1   :  { %8800 = sst [smem:[#allocation10_spill]] %s8790_s10  ;;  %s7273_s15 = smov 0  }
   0x2   :  { %8801 = sst [smem:[#allocation11_spill]] %s8791_s11  ;;  %s7275_s16 = smov 0  }
   0x3   :  { %8802 = sst [smem:[#allocation12_spill]] %s8792_s12  ;;  %s7277_s17 = smov 0  }
   0x4   :  { %8803 = sst [smem:[#allocation13_spill]] %s8793_s13 }
   0x5 LB: > { %8804 = sst [smem:[#allocation5_spill]] %s7170_s15  ;;  %s33_s18 = sadd.s32 1, %s7170_s15  ;;  %s7178_s17 = sphi %s7277_s17, %s24_s17   ;;  %s7174_s16 = sphi %s7275_s16, %s8825_s16   ;;  %s7170_s15 = sphi %s7273_s15, %s8824_s15   ;;  %s7166_s30 = sphi %s7271_s30, %s8823_s30   ;;  %s7162_s29 = sphi %s7269_s29, %s8822_s29  }
   0x6   : > { %8805 = sst [smem:[#allocation6_spill]] %s7174_s16  ;;  %s36_s19 = sadd.s32 1, %s7174_s16 }
   0x7   : > { %8806 = sst [smem:[#allocation7_spill]] %s7178_s17  ;;  %p34_p0 = scmp.ge.s32.totalorder %s33_s18, 2 }
   0x8   : > { %p6346_p1 = scmp.ge.s32.totalorder %s7178_s17, 1  ;;  %p441_p2 = scmp.lt.s32.totalorder %s7178_s17, 5 }
   0x9   : > { %s8827_s18 = smov (%p34_p0, %s33_s18), 0  ;;  %s8829_s19 = smov (!%p34_p0, %s36_s19), %s7174_s16 }
   0xa   : > { %8807 = sst [smem:[#allocation8_spill]] %s8827_s18  ;;  %p442_p3 = pnand %p6346_p1, %p441_p2 }
   0xb   : > { %p38_p4 = scmp.ge.s32.totalorder %s8829_s19, 2  ;;  %p499_p5 = scmp.lt.s32.totalorder (!%p442_p3), %s7166_s30, 1 }
   0xc   : > { %445 = sbr.rel (%p442_p3) target bundleno = 3096 (0xc18), region = 76  ;;  %p506_p6 = scmp.lt.s32.totalorder (!%p442_p3), %s7162_s29, 1 }
   0xd   : > { %s8831_s19 = smov (%p38_p4, %s8829_s19), 0  ;;  %s6351_s20 = sshll.u32 (!%p442_p3), %s7162_s29, 2 }
   0xe   : > { %8808 = sst [smem:[#allocation9_spill]] %s8831_s19  ;;  %p515_p7 = scmp.lt.s32.totalorder (!%p442_p3), %s6351_s20, 7 }
   0xf   : > { %p6354_p8 = scmp.ne.s32.totalorder (!%p442_p3), %s7162_s29, 0 }
  0x11   : > { %s8833_s30 = smov (!%p499_p5, %s7166_s30), 1  ;;  %s8835_s20 = smov (!%p515_p7, %s6351_s20), 7 }
  0x12   : > { %s507_s21 = scalar_select %p506_p6, %s7162_s29, 1 }
  0x13   : > { %s6565_s22 = sshll.u32 %s8833_s30, 6  ;;  %s6349_s23 = sshll.u32 %s8833_s30, 1 }
  0x14   : > { %s7307_s26 = scalar_lea.vmem %s8780_s0, %s6565_s22  ;;  %s509_s27 = sadd.s32 %s6349_s23, %s507_s21 }
  0x15   : > { %s6350_s28 = sshll.u32 %s509_s27, 3  ;;  %s6352_s15 = sshll.u32 %s8833_s30, 3 }
  0x16   : > { %s7312_s16 = scalar_lea.vmem %s8781_s1, %s6350_s28  ;;  %s518_s17 = sadd.s32 %s6352_s15, %s8835_s20 }
  0x17   : > { %s6353_s13 = sshll.u32 %s518_s17, 3  ;;  %528 = sbr.rel (%p6354_p8) target bundleno = 853 (0x355), region = 80 }
  0x18   : > { %s7317_s10 = scalar_lea.vmem %s8794_s14, %s6353_s13  ;;  %s7180_s22 = smov (!%p6354_p8), 112  }
  0x19   : > { %s7181_s23 = smov (!%p6354_p8), 120   ;;  %s7182_s27 = smov (!%p6354_p8), 104  }
  0x1c   : > { %v529_v0 = vld [vmem:[%s7307_s26] sm:$0xff]  ;;  %vm537_vm0 = vcmask 261120   ;;  %v531_v1 = vld [vmem:[%s7307_s26 + $0x10] sm:$0xff]  ;;  %v530_v2 = vld [vmem:[%s7307_s26 + $0x8] sm:$0xff] }
  0x1d   : > { %v538_v3 = vsel %vm537_vm0, %v529_v0, 0.0  ;;  %v544_v4 = vsel %vm537_vm0, %v531_v1, 0.0  ;;  %v532_v5 = vld [vmem:[%s7307_s26 + $0x18] sm:$0xff]  ;;  %v541_v6 = vsel %vm537_vm0, %v530_v2, 0.0  ;;  %v533_v7 = vld [vmem:[%s7307_s26 + $0x20] sm:$0xff]  ;;  %v534_v9 = vld [vmem:[%s7307_s26 + $0x28] sm:$0xff] }
  0x1e   : > { %539 = vadd.xlane.f32.xlu0 %v538_v3  ;;  %545 = vadd.xlane.f32.xlu1 %v544_v4  ;;  %v547_v8 = vsel %vm537_vm0, %v532_v5, 0.0  ;;  %v550_v10 = vsel %vm537_vm0, %v533_v7, 0.0  ;;  %v553_v11 = vsel %vm537_vm0, %v534_v9, 0.0  ;;  %v535_v12 = vld [vmem:[%s7307_s26 + $0x30] sm:$0xff]  ;;  %v536_v13 = vld [vmem:[%s7307_s26 + $0x38] sm:$0xff]  ;;  %v6942_v56 = vld [vmem:[%s8784_s4 + $0x8] sm:$0xff]  }
  0x1f   : > { %v556_v14 = vsel %vm537_vm0, %v535_v12, 0.0  ;;  %v559_v15 = vsel %vm537_vm0, %v536_v13, 0.0  ;;  %v6943_v57 = vld [vmem:[%s8786_s6 + $0x8] sm:$0xff]   ;;  %v6944_v58 = vld [vmem:[%s8784_s4] sm:$0xff]   ;;  %6716 = vmatprep.subr.bf16.mxu0 %v6942_v56 }
  0x20   : > { %6728 = vmatprep.subr.bf16.mxu1 %v6943_v57  ;;  %6717 = vmatpush3.bf16.msra.mxu0 %v6942_v56  ;;  %v6945_v59 = vld [vmem:[%s8786_s6] sm:$0xff]  }
  0x21   : > { %6729 = vmatpush3.bf16.msra.mxu1 %v6943_v57  ;;  %6718 = vmatprep.subr.bf16.mxu0 %v6944_v58 }
  0x22   : > { %542 = vadd.xlane.f32.xlu0 %v541_v6  ;;  %548 = vadd.xlane.f32.xlu1 %v547_v8 }
  0x23   : > { %6730 = vmatprep.subr.bf16.mxu1 %v6945_v59 }
  0x24   : > { %6719 = vmatpush3.bf16.msra.mxu0 %v6944_v58 }
  0x25   : > { %6731 = vmatpush3.bf16.msra.mxu1 %v6945_v59 }
  0x26   : > { %551 = vadd.xlane.f32.xlu0 %v550_v10  ;;  %554 = vadd.xlane.f32.xlu1 %v553_v11 }
  0x2a   : > { %557 = vadd.xlane.f32.xlu0 %v556_v14  ;;  %560 = vadd.xlane.f32.xlu1 %v559_v15 }
  0xa7   : > { %v540_v16 = vpop.xlane.xlu0 %539  ;;  %v546_v17 = vpop.xlane.xlu1 %545 }
  0xa8   : > { %v563_v18 = vmul.f32 0.03125, %v540_v16  ;;  %v565_v19 = vmul.f32 0.03125, %v546_v17 }
  0xaa   : > { %v7336_v20 = vsub.f32 %v529_v0, %v563_v18  ;;  %v7338_v21 = vsub.f32 %v531_v1, %v565_v19 }
  0xab   : > { %v543_v22 = vpop.xlane.xlu0 %542  ;;  %v549_v23 = vpop.xlane.xlu1 %548 }
  0xac   : > { %v564_v24 = vmul.f32 0.03125, %v543_v22  ;;  %v566_v25 = vmul.f32 0.03125, %v549_v23  ;;  %v579_v26 = vmul.f32 %v7336_v20, %v7336_v20  ;;  %v581_v27 = vmul.f32 %v7338_v21, %v7338_v21 }
  0xae   : > { %v7344_v28 = vsub.f32 %v530_v2, %v564_v24  ;;  %v7346_v29 = vsub.f32 %v532_v5, %v566_v25  ;;  %v587_v30 = vsel %vm537_vm0, %v579_v26, 0.0  ;;  %v593_v33 = vsel %vm537_vm0, %v581_v27, 0.0 }
  0xaf   : > { %588 = vadd.xlane.f32.xlu0 %v587_v30  ;;  %v552_v31 = vpop.xlane.xlu0 %551  ;;  %v555_v32 = vpop.xlane.xlu1 %554 }
  0xb0   : > { %v567_v34 = vmul.f32 0.03125, %v552_v31  ;;  %v568_v35 = vmul.f32 0.03125, %v555_v32  ;;  %v580_v36 = vmul.f32 %v7344_v28, %v7344_v28  ;;  %v582_v37 = vmul.f32 %v7346_v29, %v7346_v29 }
  0xb2   : > { %v7354_v38 = vsub.f32 %v533_v7, %v567_v34  ;;  %v7356_v39 = vsub.f32 %v534_v9, %v568_v35  ;;  %v590_v40 = vsel %vm537_vm0, %v580_v36, 0.0  ;;  %v596_v43 = vsel %vm537_vm0, %v582_v37, 0.0 }
  0xb3   : > { %594 = vadd.xlane.f32.xlu0 %v593_v33  ;;  %591 = vadd.xlane.f32.xlu1 %v590_v40  ;;  %v558_v41 = vpop.xlane.xlu0 %557  ;;  %v561_v42 = vpop.xlane.xlu1 %560 }
  0xb4   : > { %v569_v44 = vmul.f32 0.03125, %v558_v41  ;;  %v570_v45 = vmul.f32 0.03125, %v561_v42  ;;  %v583_v46 = vmul.f32 %v7354_v38, %v7354_v38  ;;  %v584_v47 = vmul.f32 %v7356_v39, %v7356_v39 }
  0xb6   : > { %v7364_v48 = vsub.f32 %v535_v12, %v569_v44  ;;  %v7366_v49 = vsub.f32 %v536_v13, %v570_v45  ;;  %v599_v50 = vsel %vm537_vm0, %v583_v46, 0.0  ;;  %v602_v51 = vsel %vm537_vm0, %v584_v47, 0.0 }
  0xb7   : > { %597 = vadd.xlane.f32.xlu1 %v596_v43  ;;  %600 = vadd.xlane.f32.xlu0 %v599_v50 }
  0xb8   : > { %v585_v52 = vmul.f32 %v7364_v48, %v7364_v48  ;;  %v586_v53 = vmul.f32 %v7366_v49, %v7366_v49 }
  0xba   : > { %v605_v54 = vsel %vm537_vm0, %v585_v52, 0.0  ;;  %v608_v55 = vsel %vm537_vm0, %v586_v53, 0.0 }
  0xbb   : > { %603 = vadd.xlane.f32.xlu1 %v602_v51  ;;  %606 = vadd.xlane.f32.xlu0 %v605_v54 }
  0xbf   : > { %609 = vadd.xlane.f32.xlu1 %v608_v55 }
 0x138   : > { %v589_v60 = vpop.xlane.xlu0 %588 }
 0x139   : > { %v611_v61 = vmul.f32 0.032258064, %v589_v60 }
 0x13b   : > { %6946 = vrsqrt.f32 %v611_v61  ;;  %vm621_vm1 = vcmp.eq.f32.partialorder %v611_v61, inf  ;;  %v624_v14 = vand.u32 2147483648, %v611_v61  ;;  %vm623_vm2 = vcmp.eq.f32.partialorder %v611_v61, 0.0 }
 0x13c   : > { %v592_v62 = vpop.xlane.xlu1 %591  ;;  %v595_v63 = vpop.xlane.xlu0 %594 }
 0x13d   : > { %v612_v0 = vmul.f32 0.032258064, %v592_v62  ;;  %v613_v1 = vmul.f32 0.032258064, %v595_v63 }
 0x13f   : > { %6948 = vrsqrt.f32 %v612_v0  ;;  %vm628_vm3 = vcmp.eq.f32.partialorder %v612_v0, inf  ;;  %vm630_vm4 = vcmp.eq.f32.partialorder %v612_v0, 0.0  ;;  %v631_v22 = vand.u32 2147483648, %v612_v0 }
 0x140   : > { %6950 = vrsqrt.f32 %v613_v1  ;;  %v598_v2 = vpop.xlane.xlu1 %597  ;;  %v601_v3 = vpop.xlane.xlu0 %600  ;;  %vm635_vm5 = vcmp.eq.f32.partialorder %v613_v1, inf  ;;  %vm637_vm6 = vcmp.eq.f32.partialorder %v613_v1, 0.0  ;;  %v638_v25 = vand.u32 2147483648, %v613_v1 }
 0x141   : > { %v614_v4 = vmul.f32 0.032258064, %v598_v2  ;;  %v615_v5 = vmul.f32 0.032258064, %v601_v3 }
 0x143   : > { %6952 = vrsqrt.f32 %v614_v4  ;;  %vm642_vm7 = vcmp.eq.f32.partialorder %v614_v4, inf  ;;  %vm644_vm8 = vcmp.eq.f32.partialorder %v614_v4, 0.0  ;;  %v645_v31 = vand.u32 2147483648, %v614_v4 }
 0x144   : > { %6954 = vrsqrt.f32 %v615_v5  ;;  %v604_v6 = vpop.xlane.xlu1 %603  ;;  %v607_v7 = vpop.xlane.xlu0 %606  ;;  %vm649_vm9 = vcmp.eq.f32.partialorder %v615_v5, inf  ;;  %v652_v36 = vand.u32 2147483648, %v615_v5  ;;  %vm651_vm10 = vcmp.eq.f32.partialorder %v615_v5, 0.0 }
 0x145   : > { %v7388_v8 = vmul.f32 0.032258064, %v604_v6  ;;  %v7390_v9 = vmul.f32 0.032258064, %v607_v7 }
 0x147   : > { %6956 = vrsqrt.f32 %v7388_v8  ;;  %vm656_vm11 = vcmp.eq.f32.partialorder %v7388_v8, inf  ;;  %vm658_vm12 = vcmp.eq.f32.partialorder %v7388_v8, 0.0  ;;  %v659_v43 = vand.u32 2147483648, %v7388_v8 }
 0x148   : > { %v6947_v10 = vpop.eup %6946  ;;  %6958 = vrsqrt.f32 %v7390_v9  ;;  %v610_v11 = vpop.xlane.xlu1 %609  ;;  %vm663_vm13 = vcmp.eq.f32.partialorder %v7390_v9, inf  ;;  %v666_v53 = vand.u32 2147483648, %v7390_v9  ;;  %vm665_vm14 = vcmp.eq.f32.partialorder %v7390_v9, 0.0 }
 0x149   : > { %v620_v12 = vmul.f32 %v6947_v10, %v611_v61  ;;  %v7394_v13 = vmul.f32 0.032258064, %v610_v11 }
 0x14b   : > { %v622_v15 = vsel %vm621_vm1, %v611_v61, %v620_v12  ;;  %6960 = vrsqrt.f32 %v7394_v13  ;;  %vm670_vm15 = vcmp.eq.f32.partialorder %v7394_v13, inf  ;;  %v673_v60 = vand.u32 2147483648, %v7394_v13 }
 0x14c   : > { %v6949_v16 = vpop.eup %6948  ;;  %v625_v17 = vsel %vm623_vm2, %v624_v14, %v622_v15  ;;  %vm672_vm1 = vcmp.eq.f32.partialorder %v7394_v13, 0.0  ;;  %vm739_vm2 = vcmask 257024  }
 0x14d   : > { %v6951_v18 = vpop.eup %6950  ;;  %v627_v19 = vmul.f32 %v6949_v16, %v612_v0  ;;  %v675_v23 = vadd.f32 1000000.0, %v625_v17 }
 0x14e   : > { %v634_v24 = vmul.f32 %v6951_v18, %v613_v1 }
 0x14f   : > { %v629_v26 = vsel %vm628_vm3, %v612_v0, %v627_v19  ;;  %6962 = vrcp.f32 %v675_v23 }
 0x150   : > { %v6953_v27 = vpop.eup %6952  ;;  %v636_v30 = vsel %vm635_vm5, %v613_v1, %v634_v24  ;;  %v632_v32 = vsel %vm630_vm4, %v631_v22, %v629_v26 }
 0x151   : > { %v6955_v33 = vpop.eup %6954  ;;  %v639_v34 = vsel %vm637_vm6, %v638_v25, %v636_v30  ;;  %v641_v35 = vmul.f32 %v6953_v27, %v614_v4  ;;  %v676_v37 = vadd.f32 1000000.0, %v632_v32 }
 0x152   : > { %v677_v40 = vadd.f32 1000000.0, %v639_v34  ;;  %v648_v41 = vmul.f32 %v6955_v33, %v615_v5 }
 0x153   : > { %v643_v42 = vsel %vm642_vm7, %v614_v4, %v641_v35  ;;  %6964 = vrcp.f32 %v676_v37  ;;  %v7461_v35 = vld [vmem:[%s8787_s7] ss:$0 sm:$0xff] }
 0x154   : > { %v6957_v44 = vpop.eup %6956  ;;  %6966 = vrcp.f32 %v677_v40  ;;  %v646_v45 = vsel %vm644_vm8, %v645_v31, %v643_v42  ;;  %v650_v46 = vsel %vm649_vm9, %v615_v5, %v648_v41 }
 0x155   : > { %v6959_v47 = vpop.eup %6958  ;;  %v678_v50 = vadd.f32 1000000.0, %v646_v45  ;;  %v653_v51 = vsel %vm651_vm10, %v652_v36, %v650_v46  ;;  %v655_v52 = vmul.f32 %v6957_v44, %v7388_v8 }
 0x156   : > { %v679_v54 = vadd.f32 1000000.0, %v653_v51  ;;  %v662_v55 = vmul.f32 %v6959_v47, %v7390_v9 }
 0x157   : > { %6968 = vrcp.f32 %v678_v50  ;;  %v657_v56 = vsel %vm656_vm11, %v7388_v8, %v655_v52 }
 0x158   : > { %v6961_v57 = vpop.eup %6960  ;;  %6970 = vrcp.f32 %v679_v54  ;;  %v660_v58 = vsel %vm658_vm12, %v659_v43, %v657_v56  ;;  %v664_v59 = vsel %vm663_vm13, %v7390_v9, %v662_v55 }
 0x159   : > { %v680_v61 = vadd.f32 1000000.0, %v660_v58  ;;  %v667_v62 = vsel %vm665_vm14, %v666_v53, %v664_v59  ;;  %v669_v63 = vmul.f32 %v6961_v57, %v7394_v13 }
 0x15a   : > { %v681_v0 = vadd.f32 1000000.0, %v667_v62 }
 0x15b   : > { %6972 = vrcp.f32 %v680_v61  ;;  %v671_v1 = vsel %vm670_vm15, %v7394_v13, %v669_v63 }
 0x15c   : > { %v6963_v2 = vpop.eup %6962  ;;  %6974 = vrcp.f32 %v681_v0  ;;  %v674_v3 = vsel %vm672_vm1, %v673_v60, %v671_v1 }
 0x15d   : > { %v682_v4 = vadd.f32 1000000.0, %v674_v3  ;;  %v691_v5 = vmul.f32 %v6963_v2, %v7336_v20  ;;  %v7183_v2 = vmov 1983009808  }
 0x15e   : > { %v1019_v3 = vunpack.c.l.s4 %v7183_v2 }
 0x15f   : > { %6976 = vrcp.f32 %v682_v4  ;;  %v6566_v6 = vpack.c.bf16 %v691_v5, %v691_v5  ;;  %v1021_v4 = vlaneseq }
 0x160   : > { %v6965_v7 = vpop.eup %6964 }
 0x161   : > { %v6967_v8 = vpop.eup %6966  ;;  %v692_v9 = vmul.f32 %v6965_v7, %v7344_v28  ;;  %740 = vst.msk [vmem:[#allocation4] sm:$0xf] %vm739_vm2, %v6566_v6  ;;  %v1020_v7 = vunpack.c.0.s8 %v1019_v3 }
 0x162   : > { %v693_v10 = vmul.f32 %v6967_v8, %v7338_v21  ;;  %v1022_v8 = vshrl.u32 %v1021_v4, 7 }
 0x163   : > { %v707_v11 = vpack.c.bf16 %v692_v9, %v691_v5  ;;  %v6567_v12 = vpack.c.bf16 %v692_v9, %v692_v9  ;;  %v7184_v5 = vmov 1934713408  }
 0x164   : > { %v6969_v13 = vpop.eup %6968  ;;  %v6568_v14 = vpack.c.bf16 %v693_v10, %v693_v10  ;;  %v1051_v6 = vunpack.c.l.s4 %v7184_v5 }
 0x165   : > { %v6971_v15 = vpop.eup %6970  ;;  %741 = vst.msk [vmem:[#allocation4 + $0x4] sm:$0xf] %vm739_vm2, %v6567_v12  ;;  %6720 = vmatprep.mubr.msk.bf16.mxu0 %vm537_vm0, %v707_v11  ;;  %6732 = vmatprep.mubr.msk.bf16.mxu1 %vm537_vm0, %v707_v11  ;;  %v694_v20 = vmul.f32 %v6969_v13, %v7346_v29  ;;  %v7597_v12 = vsub.s32 %v1020_v7, %v1022_v8 }
 0x166   : > { %742 = vst.msk [vmem:[#allocation4 + $0x8] sm:$0xf] %vm739_vm2, %v6568_v14  ;;  %v695_v28 = vmul.f32 %v6971_v15, %v7354_v38  ;;  %v1052_v11 = vunpack.c.0.s8 %v1051_v6 }
 0x167   : > { %v708_v16 = vpack.c.bf16 %v694_v20, %v693_v10  ;;  %v6569_v17 = vpack.c.bf16 %v694_v20, %v694_v20 }
 0x168   : > { %v6973_v21 = vpop.eup %6972  ;;  %v6570_v18 = vpack.c.bf16 %v695_v28, %v695_v28 }
 0x169   : > { %v6975_v19 = vpop.eup %6974  ;;  %743 = vst.msk [vmem:[#allocation4 + $0xc] sm:$0xf] %vm739_vm2, %v6569_v17  ;;  %6721 = vmatmul.mubr.msk.bf16.vlgmr.msra.gmra.mxu0 %vm537_vm0, %v708_v16  ;;  %6733 = vmatmul.mubr.msk.bf16.vlgmr.msra.gmra.mxu1 %vm537_vm0, %v708_v16  ;;  %v696_v22 = vmul.f32 %v6973_v21, %v7356_v39  ;;  %v7601_v17 = vsub.s32 %v1052_v11, %v1022_v8 }
 0x16a   : > { %744 = vst.msk [vmem:[#allocation4 + $0x10] sm:$0xf] %vm739_vm2, %v6570_v18  ;;  %v697_v29 = vmul.f32 %v6975_v19, %v7364_v48  ;;  %v7446_v48 = vld [vmem:[%s8785_s5] ss:$0 sm:$0xff] }
 0x16b   : > { %v709_v23 = vpack.c.bf16 %v696_v22, %v695_v28  ;;  %v6571_v24 = vpack.c.bf16 %v696_v22, %v696_v22 }
 0x16c   : > { %v6977_v38 = vpop.eup %6976  ;;  %v6572_v25 = vpack.c.bf16 %v697_v29, %v697_v29 }
 0x16d   : > { %745 = vst.msk [vmem:[#allocation4 + $0x14] sm:$0xf] %vm739_vm2, %v6571_v24  ;;  %6724 = vmatprep.mubr.msk.bf16.mxu0 %vm537_vm0, %v709_v23  ;;  %6736 = vmatprep.mubr.msk.bf16.mxu1 %vm537_vm0, %v709_v23  ;;  %v698_v26 = vmul.f32 %v6977_v38, %v7366_v49 }
 0x16e   : > { %746 = vst.msk [vmem:[#allocation4 + $0x18] sm:$0xf] %vm739_vm2, %v6572_v25 }
 0x16f   : > { %v710_v27 = vpack.c.bf16 %v698_v26, %v697_v29  ;;  %v6573_v39 = vpack.c.bf16 %v698_v26, %v698_v26 }
 0x171   : > { %747 = vst.msk [vmem:[#allocation4 + $0x1c] sm:$0xf] %vm739_vm2, %v6573_v39  ;;  %6725 = vmatmul.mubr.msk.bf16.gmra.mxu0 %vm537_vm0, %v710_v27  ;;  %6737 = vmatmul.mubr.msk.bf16.gmra.mxu1 %vm537_vm0, %v710_v27  ;;  %vm2232_vm0 = vcmask 60416  }
 0x229   : > { %v6722_v30 = vpop.f32.mrf.mxu0  ;;  %v6734_v34 = vpop.f32.mrf.mxu1 }
 0x22a   : > { %v7449_v31 = vadd.f32 %v6722_v30, %v7446_v48  ;;  %v7468_v36 = vadd.f32 %v6734_v34, %v7461_v35 }
 0x22b   : > { %v817_v49 = vpop.f32.mrf.mxu0  ;;  %v905_v37 = vpop.f32.mrf.mxu1 }
 0x22c   : > { %972 = vrot.lane.b32.xlu0 %v7449_v31, %s7180_s22  ;;  %948 = vrot.lane.b32.xlu1 %v7449_v31, %s7181_s23  ;;  %v7486_v42 = vadd.f32 %v7446_v48, %v817_v49  ;;  %v7504_v45 = vadd.f32 %v7461_v35, %v905_v37 }
 0x22d   : > { %v6723_v32 = vpop.f32.mrf.mxu0  ;;  %v6735_v40 = vpop.f32.mrf.mxu1 }
 0x22e   : > { %v7456_v33 = vadd.f32 %v6723_v32, %v7446_v48  ;;  %v7479_v41 = vadd.f32 %v6735_v40, %v7461_v35 }
 0x22f   : > { %v820_v43 = vpop.f32.mrf.mxu0  ;;  %v908_v46 = vpop.f32.mrf.mxu1 }
 0x230   : > { %996 = vrot.lane.b32.xlu0 %v7449_v31, %s7182_s27  ;;  %950 = vrot.lane.b32.xlu1 %v7456_v33, %s7181_s23  ;;  %v7497_v44 = vadd.f32 %v7446_v48, %v820_v43  ;;  %v7515_v47 = vadd.f32 %v7461_v35, %v908_v46 }
 0x231   : > { %v6726_v50 = vpop.f32.mrf.mxu0  ;;  %v6738_v55 = vpop.f32.mrf.mxu1 }
 0x232   : > { %v7522_v51 = vadd.f32 %v6726_v50, %v7446_v48  ;;  %v7540_v56 = vadd.f32 %v6738_v55, %v7461_v35 }
 0x233   : > { %v833_v52 = vpop.f32.mrf.mxu0  ;;  %v921_v57 = vpop.f32.mrf.mxu1 }
 0x234   : > { %2277 = vrot.lane.b32.xlu0 %v7468_v36, %s7181_s23  ;;  %974 = vrot.lane.b32.xlu1 %v7456_v33, %s7180_s22  ;;  %v7551_v59 = vadd.f32 %v7446_v48, %v833_v52  ;;  %v7572_v63 = vadd.f32 %v7461_v35, %v921_v57 }
 0x235   : > { %v6727_v53 = vpop.f32.mrf.mxu0  ;;  %v6739_v58 = vpop.f32.mrf.mxu1 }
 0x236   : > { %v7533_v54 = vadd.f32 %v6727_v53, %v7446_v48  ;;  %v7554_v60 = vadd.f32 %v6739_v58, %v7461_v35 }
 0x237   : > { %v836_v61 = vpop.f32.mrf.mxu0  ;;  %v924_v0 = vpop.f32.mrf.mxu1 }
 0x238   : > { %2301 = vrot.lane.b32.xlu0 %v7468_v36, %s7180_s22  ;;  %998 = vrot.lane.b32.xlu1 %v7456_v33, %s7182_s27  ;;  %v7565_v62 = vadd.f32 %v7446_v48, %v836_v61  ;;  %v7583_v1 = vadd.f32 %v7461_v35, %v924_v0 }
 0x23c   : > { %2325 = vrot.lane.b32.xlu0 %v7468_v36, %s7182_s27  ;;  %2279 = vrot.lane.b32.xlu1 %v7479_v41, %s7181_s23 }
 0x240   : > { %2303 = vrot.lane.b32.xlu1 %v7479_v41, %s7180_s22  ;;  %944 = vrot.lane.b32.xlu0 %v7486_v42, %s7181_s23 }
 0x244   : > { %2327 = vrot.lane.b32.xlu1 %v7479_v41, %s7182_s27  ;;  %968 = vrot.lane.b32.xlu0 %v7486_v42, %s7180_s22 }
 0x248   : > { %946 = vrot.lane.b32.xlu1 %v7497_v44, %s7181_s23  ;;  %992 = vrot.lane.b32.xlu0 %v7486_v42, %s7182_s27 }
 0x24c   : > { %970 = vrot.lane.b32.xlu1 %v7497_v44, %s7180_s22  ;;  %2273 = vrot.lane.b32.xlu0 %v7504_v45, %s7181_s23 }
 0x250   : > { %994 = vrot.lane.b32.xlu1 %v7497_v44, %s7182_s27  ;;  %2297 = vrot.lane.b32.xlu0 %v7504_v45, %s7180_s22 }
 0x254   : > { %2275 = vrot.lane.b32.xlu1 %v7515_v47, %s7181_s23  ;;  %2321 = vrot.lane.b32.xlu0 %v7504_v45, %s7182_s27 }
 0x258   : > { %2299 = vrot.lane.b32.xlu1 %v7515_v47, %s7180_s22  ;;  %956 = vrot.lane.b32.xlu0 %v7522_v51, %s7181_s23 }
 0x25c   : > { %2323 = vrot.lane.b32.xlu1 %v7515_v47, %s7182_s27  ;;  %980 = vrot.lane.b32.xlu0 %v7522_v51, %s7180_s22 }
 0x260   : > { %1004 = vrot.lane.b32.xlu0 %v7522_v51, %s7182_s27  ;;  %958 = vrot.lane.b32.xlu1 %v7533_v54, %s7181_s23 }
 0x264   : > { %2285 = vrot.lane.b32.xlu0 %v7540_v56, %s7181_s23  ;;  %982 = vrot.lane.b32.xlu1 %v7533_v54, %s7180_s22 }
 0x268   : > { %2309 = vrot.lane.b32.xlu0 %v7540_v56, %s7180_s22  ;;  %1006 = vrot.lane.b32.xlu1 %v7533_v54, %s7182_s27 }
 0x26c   : > { %2287 = vrot.lane.b32.xlu1 %v7554_v60, %s7181_s23  ;;  %952 = vrot.lane.b32.xlu0 %v7551_v59, %s7181_s23 }
 0x270   : > { %2311 = vrot.lane.b32.xlu1 %v7554_v60, %s7180_s22  ;;  %976 = vrot.lane.b32.xlu0 %v7551_v59, %s7180_s22 }
 0x274   : > { %954 = vrot.lane.b32.xlu1 %v7565_v62, %s7181_s23  ;;  %1000 = vrot.lane.b32.xlu0 %v7551_v59, %s7182_s27 }
 0x278   : > { %978 = vrot.lane.b32.xlu1 %v7565_v62, %s7180_s22  ;;  %2281 = vrot.lane.b32.xlu0 %v7572_v63, %s7181_s23 }
 0x27c   : > { %1002 = vrot.lane.b32.xlu1 %v7565_v62, %s7182_s27  ;;  %2305 = vrot.lane.b32.xlu0 %v7572_v63, %s7180_s22 }
 0x280   : > { %2283 = vrot.lane.b32.xlu1 %v7583_v1, %s7181_s23  ;;  %2329 = vrot.lane.b32.xlu0 %v7572_v63, %s7182_s27 }
 0x284   : > { %2307 = vrot.lane.b32.xlu1 %v7583_v1, %s7180_s22  ;;  %2333 = vrot.lane.b32.xlu0 %v7540_v56, %s7182_s27 }
 0x288   : > { %2331 = vrot.lane.b32.xlu1 %v7583_v1, %s7182_s27 }
 0x28c   : > { %2335 = vrot.lane.b32.xlu1 %v7554_v60, %s7182_s27 }
 0x29e   : > { %v949_v9 = vpop.permute.xlu1 %948  ;;  %v973_v10 = vpop.permute.xlu0 %972 }
 0x29f   : > { %v1152_v13 = vcombine.low %v7449_v31, %v973_v10  ;;  %v1153_v14 = vcombine.high %v7449_v31, %v973_v10 }
 0x2a1   : > { %v1160_v21 = vrot.slane %v1152_v13, %v7597_v12  ;;  %v1167_v18 = vrot.slane %v1153_v14, %v7597_v12 }
 0x2a2   : > { %v951_v15 = vpop.permute.xlu1 %950  ;;  %v997_v20 = vpop.permute.xlu0 %996 }
 0x2a3   : > { %v1168_v28 = vcombine.low %v949_v9, %v997_v20  ;;  %v1169_v16 = vcombine.high %v949_v9, %v997_v20 }
 0x2a5   : > { %v1176_v19 = vrot.slane %v1168_v28, %v7597_v12  ;;  %v1183_v22 = vrot.slane %v1169_v16, %v7597_v12 }
 0x2a6   : > { %v975_v29 = vpop.permute.xlu1 %974  ;;  %v7607_v23 = vpop.permute.xlu0 %2277 }
 0x2a7   : > { %v1184_v24 = vcombine.low %v1160_v21, %v1176_v19  ;;  %v1185_v38 = vcombine.high %v1160_v21, %v1176_v19  ;;  %v1200_v25 = vcombine.low %v1167_v18, %v1183_v22  ;;  %v1201_v26 = vcombine.high %v1167_v18, %v1183_v22 }
 0x2a8   : > { %v1220_v27 = vcombine.low %v7456_v33, %v975_v29  ;;  %v1221_v39 = vcombine.high %v7456_v33, %v975_v29 }
 0x2a9   : > { %v1192_v48 = vrot.slane %v1184_v24, %v7601_v17  ;;  %v1199_v30 = vrot.slane %v1185_v38, %v7601_v17  ;;  %v1208_v31 = vrot.slane %v1200_v25, %v7601_v17  ;;  %v1215_v49 = vrot.slane %v1201_v26, %v7601_v17 }
 0x2aa   : > { %v999_v32 = vpop.permute.xlu1 %998  ;;  %v2302_v34 = vpop.permute.xlu0 %2301  ;;  %v1228_v46 = vrot.slane %v1220_v27, %v7597_v12  ;;  %v1235_v50 = vrot.slane %v1221_v39, %v7597_v12 }
 0x2ab   : > { %v1696_v35 = vcombine.low %v1192_v48, %v1199_v30  ;;  %v6381_v37 = vcombine.high %v1192_v48, %v1199_v30  ;;  %v1712_v40 = vcombine.low %v1208_v31, %v1215_v49  ;;  %v6382_v43 = vcombine.high %v1208_v31, %v1215_v49 }
 0x2ac   : > { %v1236_v33 = vcombine.low %v951_v15, %v999_v32  ;;  %v1237_v52 = vcombine.high %v951_v15, %v999_v32  ;;  %v2481_v2 = vcombine.low %v7468_v36, %v2302_v34  ;;  %v2482_v3 = vcombine.high %v7468_v36, %v2302_v34 }
 0x2ad   : > { %v1703_v53 = vrot.slane %v1696_v35, %v7597_v12  ;;  %v1711_v55 = vrot.slane %v6381_v37, %v7597_v12  ;;  %v1719_v57 = vrot.slane %v1712_v40, %v7597_v12  ;;  %v1727_v58 = vrot.slane %v6382_v43, %v7597_v12 }
 0x2ae   : > { %v1244_v61 = vrot.slane %v1236_v33, %v7597_v12  ;;  %v1251_v0 = vrot.slane %v1237_v52, %v7597_v12  ;;  %v7625_v4 = vpop.permute.xlu1 %2279  ;;  %v2326_v5 = vpop.permute.xlu0 %2325 }
 0x2af   : > { %v1728_v6 = vcombine.low %v1703_v53, %v1711_v55  ;;  %v1729_v7 = vcombine.high %v1703_v53, %v1711_v55  ;;  %v1744_v8 = vcombine.low %v1719_v57, %v1727_v58  ;;  %v1745_v9 = vcombine.high %v1719_v57, %v1727_v58 }
 0x2b0   : > { %v1252_v10 = vcombine.low %v1228_v46, %v1244_v61  ;;  %v1253_v11 = vcombine.high %v1228_v46, %v1244_v61  ;;  %v1268_v13 = vcombine.low %v1235_v50, %v1251_v0  ;;  %v1269_v14 = vcombine.high %v1235_v50, %v1251_v0 }
 0x2b1   : > { %v1736_v15 = vrot.slane %v1728_v6, %v7601_v17  ;;  %v1743_v20 = vrot.slane %v1729_v7, %v7601_v17  ;;  %v1752_v28 = vrot.slane %v1744_v8, %v7601_v17  ;;  %v1759_v16 = vrot.slane %v1745_v9, %v7601_v17 }
 0x2b2   : > { %v1260_v36 = vrot.slane %v1252_v10, %v7601_v17  ;;  %v1267_v21 = vrot.slane %v1253_v11, %v7601_v17  ;;  %v1276_v18 = vrot.slane %v1268_v13, %v7601_v17  ;;  %v1283_v19 = vrot.slane %v1269_v14, %v7601_v17  ;;  %v7635_v25 = vpop.permute.xlu1 %2303  ;;  %v7637_v26 = vpop.permute.xlu0 %944 }
 0x2b3   : > { %v1760_v22 = vcombine.low %v1736_v15, %v1752_v28  ;;  %v1761_v29 = vcombine.high %v1736_v15, %v1752_v28  ;;  %v1762_v24 = vcombine.low %v1743_v20, %v1759_v16  ;;  %v1763_v38 = vcombine.high %v1743_v20, %v1759_v16 }
 0x2b4   : > { %v1764_v27 = vcombine.low %v1260_v36, %v1267_v21  ;;  %v6383_v39 = vcombine.high %v1260_v36, %v1267_v21  ;;  %v1780_v48 = vcombine.low %v1276_v18, %v1283_v19  ;;  %v6384_v30 = vcombine.high %v1276_v18, %v1283_v19 }
 0x2b5   : > { %v6576_v31 = vpack.c.bf16 %v1760_v22, %v1760_v22  ;;  %v6584_v49 = vpack.c.bf16 %v1761_v29, %v1761_v29  ;;  %v6592_v32 = vpack.c.bf16 %v1762_v24, %v1762_v24  ;;  %v6600_v34 = vpack.c.bf16 %v1763_v38, %v1763_v38 }
 0x2b6   : > { %v1771_v35 = vrot.slane %v1764_v27, %v7597_v12  ;;  %v1779_v37 = vrot.slane %v6383_v39, %v7597_v12  ;;  %v1787_v40 = vrot.slane %v1780_v48, %v7597_v12  ;;  %v1795_v43 = vrot.slane %v6384_v30, %v7597_v12  ;;  %v2328_v7 = vpop.permute.xlu1 %2327 }
 0x2b7   : > { %2235 = vst.msk [vmem:[#allocation2 + $0x8] sm:$0xf] %vm2232_vm0, %v6576_v31  ;;  %2243 = vst.msk [vmem:[#allocation2 + $0x28] sm:$0xf] %vm2232_vm0, %v6584_v49  ;;  %v2489_v46 = vrot.slane %v2481_v2, %v7597_v12  ;;  %v2496_v50 = vrot.slane %v2482_v3, %v7597_v12  ;;  %v2497_v33 = vcombine.low %v7607_v23, %v2326_v5  ;;  %v7657_v3 = vpop.permute.xlu0 %968 }
 0x2b8   : > { %2251 = vst.msk [vmem:[#allocation2 + $0x48] sm:$0xf] %vm2232_vm0, %v6592_v32  ;;  %2259 = vst.msk [vmem:[#allocation2 + $0x68] sm:$0xf] %vm2232_vm0, %v6600_v34  ;;  %v2498_v52 = vcombine.high %v7607_v23, %v2326_v5  ;;  %v1796_v53 = vcombine.low %v1771_v35, %v1779_v37  ;;  %v1797_v55 = vcombine.high %v1771_v35, %v1779_v37 }
 0x2b9   : > { %v1812_v57 = vcombine.low %v1787_v40, %v1795_v43  ;;  %v1813_v58 = vcombine.high %v1787_v40, %v1795_v43  ;;  %v2505_v61 = vrot.slane %v2497_v33, %v7597_v12  ;;  %v2549_v6 = vcombine.low %v7479_v41, %v7635_v25 }
 0x2ba   : > { %v2512_v0 = vrot.slane %v2498_v52, %v7597_v12  ;;  %v2550_v2 = vcombine.high %v7479_v41, %v7635_v25  ;;  %v1804_v8 = vrot.slane %v1796_v53, %v7601_v17  ;;  %v1811_v23 = vrot.slane %v1797_v55, %v7601_v17  ;;  %v7667_v48 = vpop.permute.xlu1 %946 }
 0x2bb   : > { %v1820_v5 = vrot.slane %v1812_v57, %v7601_v17  ;;  %v1827_v9 = vrot.slane %v1813_v58, %v7601_v17  ;;  %v2513_v10 = vcombine.low %v2489_v46, %v2505_v61  ;;  %v2514_v11 = vcombine.high %v2489_v46, %v2505_v61  ;;  %v7669_v30 = vpop.permute.xlu0 %992 }
 0x2bc   : > { %v2529_v13 = vcombine.low %v2496_v50, %v2512_v0  ;;  %v2530_v14 = vcombine.high %v2496_v50, %v2512_v0  ;;  %v2557_v31 = vrot.slane %v2549_v6, %v7597_v12  ;;  %v2564_v49 = vrot.slane %v2550_v2, %v7597_v12 }
 0x2bd   : > { %v1828_v15 = vcombine.low %v1804_v8, %v1820_v5  ;;  %v1829_v20 = vcombine.high %v1804_v8, %v1820_v5  ;;  %v1830_v28 = vcombine.low %v1811_v23, %v1827_v9  ;;  %v1831_v16 = vcombine.high %v1811_v23, %v1827_v9 }
 0x2be   : > { %v2521_v41 = vrot.slane %v2513_v10, %v7601_v17  ;;  %v2528_v36 = vrot.slane %v2514_v11, %v7601_v17  ;;  %v2537_v21 = vrot.slane %v2529_v13, %v7601_v17  ;;  %v2544_v18 = vrot.slane %v2530_v14, %v7601_v17  ;;  %v7693_v5 = vpop.permute.xlu1 %970 }
 0x2bf   : > { %v6577_v19 = vpack.c.bf16 %v1828_v15, %v1828_v15  ;;  %v6585_v22 = vpack.c.bf16 %v1829_v20, %v1829_v20  ;;  %v6593_v29 = vpack.c.bf16 %v1830_v28, %v1830_v28  ;;  %v6601_v24 = vpack.c.bf16 %v1831_v16, %v1831_v16  ;;  %v7695_v9 = vpop.permute.xlu0 %2273 }
 0x2c0   : > { %v3025_v38 = vcombine.low %v2521_v41, %v2528_v36  ;;  %v6429_v25 = vcombine.high %v2521_v41, %v2528_v36  ;;  %v3041_v27 = vcombine.low %v2537_v21, %v2544_v18  ;;  %v6430_v39 = vcombine.high %v2537_v21, %v2544_v18 }
 0x2c1   : > { %2236 = vst.msk [vmem:[#allocation2 + $0xc] sm:$0xf] %vm2232_vm0, %v6577_v19  ;;  %2244 = vst.msk [vmem:[#allocation2 + $0x2c] sm:$0xf] %vm2232_vm0, %v6585_v22  ;;  %v2565_v32 = vcombine.low %v7625_v4, %v2328_v7  ;;  %v2566_v34 = vcombine.high %v7625_v4, %v2328_v7  ;;  %v1016_v33 = vcombine.low %v7486_v42, %v7657_v3 }
 0x2c2   : > { %2252 = vst.msk [vmem:[#allocation2 + $0x4c] sm:$0xf] %vm2232_vm0, %v6593_v29  ;;  %2260 = vst.msk [vmem:[#allocation2 + $0x6c] sm:$0xf] %vm2232_vm0, %v6601_v24  ;;  %v3032_v35 = vrot.slane %v3025_v38, %v7597_v12  ;;  %v3040_v37 = vrot.slane %v6429_v25, %v7597_v12  ;;  %v3048_v40 = vrot.slane %v3041_v27, %v7597_v12 }
 0x2c3   : > { %v3056_v43 = vrot.slane %v6430_v39, %v7597_v12  ;;  %v2573_v46 = vrot.slane %v2565_v32, %v7597_v12  ;;  %v2580_v50 = vrot.slane %v2566_v34, %v7597_v12  ;;  %v1017_v52 = vcombine.high %v7486_v42, %v7657_v3  ;;  %v995_v32 = vpop.permute.xlu1 %994  ;;  %v7715_v34 = vpop.permute.xlu0 %2297 }
 0x2c4   : > { %v3057_v53 = vcombine.low %v3032_v35, %v3040_v37  ;;  %v3058_v4 = vcombine.high %v3032_v35, %v3040_v37  ;;  %v1024_v27 = vrot.slane %v1016_v33, %v7597_v12  ;;  %v1084_v33 = vcombine.low %v7497_v44, %v7693_v5 }
 0x2c5   : > { %v3073_v55 = vcombine.low %v3048_v40, %v3056_v43  ;;  %v3074_v57 = vcombine.high %v3048_v40, %v3056_v43  ;;  %v2581_v58 = vcombine.low %v2557_v31, %v2573_v46  ;;  %v2582_v61 = vcombine.high %v2557_v31, %v2573_v46 }
 0x2c6   : > { %v2597_v0 = vcombine.low %v2564_v49, %v2580_v50  ;;  %v2598_v6 = vcombine.high %v2564_v49, %v2580_v50  ;;  %v3065_v2 = vrot.slane %v3057_v53, %v7601_v17  ;;  %v3072_v7 = vrot.slane %v3058_v4, %v7601_v17 }
 0x2c7   : > { %v3081_v8 = vrot.slane %v3073_v55, %v7601_v17  ;;  %v3088_v23 = vrot.slane %v3074_v57, %v7601_v17  ;;  %v2589_v42 = vrot.slane %v2581_v58, %v7601_v17  ;;  %v2596_v3 = vrot.slane %v2582_v61, %v7601_v17 }
 0x2c8   : > { %v2605_v10 = vrot.slane %v2597_v0, %v7601_v17  ;;  %v2612_v11 = vrot.slane %v2598_v6, %v7601_v17  ;;  %v1031_v39 = vrot.slane %v1017_v52, %v7597_v12  ;;  %v1032_v31 = vcombine.low %v7637_v26, %v7669_v30 }
 0x2c9   : > { %v3089_v13 = vcombine.low %v3065_v2, %v3081_v8  ;;  %v3090_v14 = vcombine.high %v3065_v2, %v3081_v8  ;;  %v3091_v15 = vcombine.low %v3072_v7, %v3088_v23  ;;  %v3092_v20 = vcombine.high %v3072_v7, %v3088_v23 }
 0x2ca   : > { %v3093_v28 = vcombine.low %v2589_v42, %v2596_v3  ;;  %v6431_v16 = vcombine.high %v2589_v42, %v2596_v3  ;;  %v3109_v41 = vcombine.low %v2605_v10, %v2612_v11  ;;  %v6432_v36 = vcombine.high %v2605_v10, %v2612_v11  ;;  %v7731_v42 = vpop.permute.xlu1 %2275  ;;  %v7733_v3 = vpop.permute.xlu0 %2321 }
 0x2cb   : > { %v6608_v21 = vpack.c.bf16 %v3089_v13, %v3089_v13  ;;  %v6616_v18 = vpack.c.bf16 %v3090_v14, %v3090_v14  ;;  %v6624_v19 = vpack.c.bf16 %v3091_v15, %v3091_v15  ;;  %v6632_v22 = vpack.c.bf16 %v3092_v20, %v3092_v20 }
 0x2cc   : > { %v3100_v29 = vrot.slane %v3093_v28, %v7597_v12  ;;  %v3108_v24 = vrot.slane %v6431_v16, %v7597_v12  ;;  %v3116_v38 = vrot.slane %v3109_v41, %v7597_v12  ;;  %v3124_v25 = vrot.slane %v6432_v36, %v7597_v12 }
 0x2cd   : > { %3563 = vst.msk [vmem:[#allocation3 + $0x8] sm:$0xf] %vm2232_vm0, %v6608_v21  ;;  %3571 = vst.msk [vmem:[#allocation3 + $0x28] sm:$0xf] %vm2232_vm0, %v6616_v18  ;;  %v1033_v49 = vcombine.high %v7637_v26, %v7669_v30  ;;  %v1040_v46 = vrot.slane %v1032_v31, %v7597_v12  ;;  %v1085_v52 = vcombine.high %v7497_v44, %v7693_v5 }
 0x2ce   : > { %3579 = vst.msk [vmem:[#allocation3 + $0x48] sm:$0xf] %vm2232_vm0, %v6624_v19  ;;  %3587 = vst.msk [vmem:[#allocation3 + $0x68] sm:$0xf] %vm2232_vm0, %v6632_v22  ;;  %v3125_v35 = vcombine.low %v3100_v29, %v3108_v24  ;;  %v3126_v37 = vcombine.high %v3100_v29, %v3108_v24  ;;  %v3141_v40 = vcombine.low %v3116_v38, %v3124_v25 }
 0x2cf   : > { %v3142_v43 = vcombine.high %v3116_v38, %v3124_v25  ;;  %v1047_v50 = vrot.slane %v1033_v49, %v7597_v12  ;;  %v1048_v55 = vcombine.low %v1024_v27, %v1040_v46  ;;  %v1049_v57 = vcombine.high %v1024_v27, %v1040_v46 }
 0x2d0   : > { %v3133_v53 = vrot.slane %v3125_v35, %v7601_v17  ;;  %v3140_v26 = vrot.slane %v3126_v37, %v7601_v17  ;;  %v3149_v30 = vrot.slane %v3141_v40, %v7601_v17  ;;  %v1092_v41 = vrot.slane %v1084_v33, %v7597_v12  ;;  %v7753_v35 = vpop.permute.xlu1 %2299  ;;  %v7755_v37 = vpop.permute.xlu0 %956 }
 0x2d1   : > { %v3156_v4 = vrot.slane %v3142_v43, %v7601_v17  ;;  %v1064_v58 = vcombine.low %v1031_v39, %v1047_v50  ;;  %v1065_v61 = vcombine.high %v1031_v39, %v1047_v50  ;;  %v1056_v8 = vrot.slane %v1048_v55, %v7601_v17 }
 0x2d2   : > { %v3157_v0 = vcombine.low %v3133_v53, %v3149_v30  ;;  %v3158_v6 = vcombine.high %v3133_v53, %v3149_v30  ;;  %v1063_v44 = vrot.slane %v1049_v57, %v7601_v17  ;;  %v1099_v36 = vrot.slane %v1085_v52, %v7597_v12 }
 0x2d3   : > { %v3159_v2 = vcombine.low %v3140_v26, %v3156_v4  ;;  %v3160_v7 = vcombine.high %v3140_v26, %v3156_v4  ;;  %v1072_v23 = vrot.slane %v1064_v58, %v7601_v17  ;;  %v1079_v5 = vrot.slane %v1065_v61, %v7601_v17 }
 0x2d4   : > { %v6609_v10 = vpack.c.bf16 %v3157_v0, %v3157_v0  ;;  %v6617_v11 = vpack.c.bf16 %v3158_v6, %v3158_v6  ;;  %v1560_v15 = vcombine.low %v1056_v8, %v1063_v44  ;;  %v6377_v20 = vcombine.high %v1056_v8, %v1063_v44 }
 0x2d5   : > { %v6625_v13 = vpack.c.bf16 %v3159_v2, %v3159_v2  ;;  %v6633_v14 = vpack.c.bf16 %v3160_v7, %v3160_v7  ;;  %v1576_v28 = vcombine.low %v1072_v23, %v1079_v5  ;;  %v6378_v16 = vcombine.high %v1072_v23, %v1079_v5 }
 0x2d6   : > { %3564 = vst.msk [vmem:[#allocation3 + $0xc] sm:$0xf] %vm2232_vm0, %v6609_v10  ;;  %3572 = vst.msk [vmem:[#allocation3 + $0x2c] sm:$0xf] %vm2232_vm0, %v6617_v11  ;;  %v1100_v21 = vcombine.low %v7667_v48, %v995_v32  ;;  %v1101_v18 = vcombine.high %v7667_v48, %v995_v32  ;;  %v1567_v19 = vrot.slane %v1560_v15, %v7597_v12  ;;  %v7765_v10 = vpop.permute.xlu1 %2323  ;;  %v7767_v11 = vpop.permute.xlu0 %980 }
 0x2d7   : > { %3580 = vst.msk [vmem:[#allocation3 + $0x4c] sm:$0xf] %vm2232_vm0, %v6625_v13  ;;  %3588 = vst.msk [vmem:[#allocation3 + $0x6c] sm:$0xf] %vm2232_vm0, %v6633_v14  ;;  %v1575_v22 = vrot.slane %v6377_v20, %v7597_v12  ;;  %v1583_v29 = vrot.slane %v1576_v28, %v7597_v12  ;;  %v1591_v24 = vrot.slane %v6378_v16, %v7597_v12 }
 0x2d8   : > { %v1108_v38 = vrot.slane %v1100_v21, %v7597_v12  ;;  %v1115_v25 = vrot.slane %v1101_v18, %v7597_v12  ;;  %v2345_v27 = vcombine.low %v7504_v45, %v7715_v34  ;;  %v2346_v39 = vcombine.high %v7504_v45, %v7715_v34 }
 0x2d9   : > { %v1592_v31 = vcombine.low %v1567_v19, %v1575_v22  ;;  %v1593_v48 = vcombine.high %v1567_v19, %v1575_v22  ;;  %v1608_v49 = vcombine.low %v1583_v29, %v1591_v24  ;;  %v1609_v32 = vcombine.high %v1583_v29, %v1591_v24 }
 0x2da   : > { %v1116_v40 = vcombine.low %v1092_v41, %v1108_v38  ;;  %v1117_v43 = vcombine.high %v1092_v41, %v1108_v38  ;;  %v1132_v46 = vcombine.low %v1099_v36, %v1115_v25  ;;  %v1133_v50 = vcombine.high %v1099_v36, %v1115_v25 }
 0x2db   : > { %v1600_v33 = vrot.slane %v1592_v31, %v7601_v17  ;;  %v1607_v52 = vrot.slane %v1593_v48, %v7601_v17  ;;  %v1616_v53 = vrot.slane %v1608_v49, %v7601_v17  ;;  %v1623_v45 = vrot.slane %v1609_v32, %v7601_v17 }
 0x2dc   : > { %v1124_v34 = vrot.slane %v1116_v40, %v7601_v17  ;;  %v1131_v26 = vrot.slane %v1117_v43, %v7601_v17  ;;  %v1140_v30 = vrot.slane %v1132_v46, %v7601_v17  ;;  %v1147_v4 = vrot.slane %v1133_v50, %v7601_v17  ;;  %v7793_v40 = vpop.permute.xlu1 %958  ;;  %v7795_v43 = vpop.permute.xlu0 %1004 }
 0x2dd   : > { %v1624_v55 = vcombine.low %v1600_v33, %v1616_v53  ;;  %v1625_v57 = vcombine.high %v1600_v33, %v1616_v53  ;;  %v1626_v58 = vcombine.low %v1607_v52, %v1623_v45  ;;  %v1627_v61 = vcombine.high %v1607_v52, %v1623_v45 }
 0x2de   : > { %v1628_v0 = vcombine.low %v1124_v34, %v1131_v26  ;;  %v6379_v6 = vcombine.high %v1124_v34, %v1131_v26  ;;  %v1644_v2 = vcombine.low %v1140_v30, %v1147_v4  ;;  %v6380_v7 = vcombine.high %v1140_v30, %v1147_v4 }
 0x2df   : > { %v6574_v8 = vpack.c.bf16 %v1624_v55, %v1624_v55  ;;  %v6582_v44 = vpack.c.bf16 %v1625_v57, %v1625_v57  ;;  %v6590_v23 = vpack.c.bf16 %v1626_v58, %v1626_v58  ;;  %v6598_v5 = vpack.c.bf16 %v1627_v61, %v1627_v61 }
 0x2e0   : > { %v1635_v13 = vrot.slane %v1628_v0, %v7597_v12  ;;  %v1643_v14 = vrot.slane %v6379_v6, %v7597_v12  ;;  %v1651_v15 = vrot.slane %v1644_v2, %v7597_v12  ;;  %v1659_v20 = vrot.slane %v6380_v7, %v7597_v12 }
 0x2e1   : > { %2233 = vst.msk [vmem:[#allocation2] sm:$0xf] %vm2232_vm0, %v6574_v8  ;;  %2241 = vst.msk [vmem:[#allocation2 + $0x20] sm:$0xf] %vm2232_vm0, %v6582_v44  ;;  %v2353_v28 = vrot.slane %v2345_v27, %v7597_v12  ;;  %v2360_v16 = vrot.slane %v2346_v39, %v7597_v12  ;;  %v2361_v41 = vcombine.low %v7695_v9, %v7733_v3 }
 0x2e2   : > { %2249 = vst.msk [vmem:[#allocation2 + $0x40] sm:$0xf] %vm2232_vm0, %v6590_v23  ;;  %2257 = vst.msk [vmem:[#allocation2 + $0x60] sm:$0xf] %vm2232_vm0, %v6598_v5  ;;  %v2362_v36 = vcombine.high %v7695_v9, %v7733_v3  ;;  %v1660_v21 = vcombine.low %v1635_v13, %v1643_v14  ;;  %v1661_v18 = vcombine.high %v1635_v13, %v1643_v14  ;;  %v7815_v13 = vpop.permute.xlu1 %982  ;;  %v7817_v14 = vpop.permute.xlu0 %2285 }
 0x2e3   : > { %v1676_v19 = vcombine.low %v1651_v15, %v1659_v20  ;;  %v1677_v22 = vcombine.high %v1651_v15, %v1659_v20  ;;  %v2369_v29 = vrot.slane %v2361_v41, %v7597_v12  ;;  %v2413_v38 = vcombine.low %v7515_v47, %v7753_v35 }
 0x2e4   : > { %v2376_v24 = vrot.slane %v2362_v36, %v7597_v12  ;;  %v2414_v25 = vcombine.high %v7515_v47, %v7753_v35  ;;  %v1668_v27 = vrot.slane %v1660_v21, %v7601_v17  ;;  %v1675_v39 = vrot.slane %v1661_v18, %v7601_v17 }
 0x2e5   : > { %v1684_v9 = vrot.slane %v1676_v19, %v7601_v17  ;;  %v1691_v3 = vrot.slane %v1677_v22, %v7601_v17  ;;  %v2377_v31 = vcombine.low %v2353_v28, %v2369_v29  ;;  %v2378_v48 = vcombine.high %v2353_v28, %v2369_v29 }
 0x2e6   : > { %v2393_v49 = vcombine.low %v2360_v16, %v2376_v24  ;;  %v2394_v32 = vcombine.high %v2360_v16, %v2376_v24  ;;  %v2421_v0 = vrot.slane %v2413_v38, %v7597_v12  ;;  %v2428_v6 = vrot.slane %v2414_v25, %v7597_v12 }
 0x2e7   : > { %v1692_v46 = vcombine.low %v1668_v27, %v1684_v9  ;;  %v1693_v50 = vcombine.high %v1668_v27, %v1684_v9  ;;  %v1694_v33 = vcombine.low %v1675_v39, %v1691_v3  ;;  %v1695_v47 = vcombine.high %v1675_v39, %v1691_v3 }
 0x2e8   : > { %v2385_v35 = vrot.slane %v2377_v31, %v7601_v17  ;;  %v2392_v52 = vrot.slane %v2378_v48, %v7601_v17  ;;  %v2401_v53 = vrot.slane %v2393_v49, %v7601_v17  ;;  %v2408_v45 = vrot.slane %v2394_v32, %v7601_v17  ;;  %v7833_v49 = vpop.permute.xlu1 %1006  ;;  %v7835_v32 = vpop.permute.xlu0 %2309 }
 0x2e9   : > { %v6575_v34 = vpack.c.bf16 %v1692_v46, %v1692_v46  ;;  %v6583_v26 = vpack.c.bf16 %v1693_v50, %v1693_v50  ;;  %v6591_v30 = vpack.c.bf16 %v1694_v33, %v1694_v33  ;;  %v6599_v4 = vpack.c.bf16 %v1695_v47, %v1695_v47 }
 0x2ea   : > { %v2889_v55 = vcombine.low %v2385_v35, %v2392_v52  ;;  %v6425_v57 = vcombine.high %v2385_v35, %v2392_v52  ;;  %v2905_v58 = vcombine.low %v2401_v53, %v2408_v45  ;;  %v6426_v61 = vcombine.high %v2401_v53, %v2408_v45 }
 0x2eb   : > { %2234 = vst.msk [vmem:[#allocation2 + $0x4] sm:$0xf] %vm2232_vm0, %v6575_v34  ;;  %2242 = vst.msk [vmem:[#allocation2 + $0x24] sm:$0xf] %vm2232_vm0, %v6583_v26  ;;  %v2429_v2 = vcombine.low %v7731_v42, %v7765_v10  ;;  %v2430_v7 = vcombine.high %v7731_v42, %v7765_v10  ;;  %v1424_v28 = vcombine.low %v7522_v51, %v7767_v11 }
 0x2ec   : > { %2250 = vst.msk [vmem:[#allocation2 + $0x44] sm:$0xf] %vm2232_vm0, %v6591_v30  ;;  %2258 = vst.msk [vmem:[#allocation2 + $0x64] sm:$0xf] %vm2232_vm0, %v6599_v4  ;;  %v2896_v8 = vrot.slane %v2889_v55, %v7597_v12  ;;  %v2904_v44 = vrot.slane %v6425_v57, %v7597_v12  ;;  %v2912_v23 = vrot.slane %v2905_v58, %v7597_v12 }
 0x2ed   : > { %v2920_v5 = vrot.slane %v6426_v61, %v7597_v12  ;;  %v2437_v15 = vrot.slane %v2429_v2, %v7597_v12  ;;  %v2444_v20 = vrot.slane %v2430_v7, %v7597_v12  ;;  %v1425_v42 = vcombine.high %v7522_v51, %v7767_v11 }
 0x2ee   : > { %v2921_v10 = vcombine.low %v2896_v8, %v2904_v44  ;;  %v2922_v16 = vcombine.high %v2896_v8, %v2904_v44  ;;  %v1432_v55 = vrot.slane %v1424_v28, %v7597_v12  ;;  %v1440_v58 = vcombine.low %v7755_v37, %v7795_v43 }
 0x2ef   : > { %v2937_v41 = vcombine.low %v2912_v23, %v2920_v5  ;;  %v2938_v36 = vcombine.high %v2912_v23, %v2920_v5  ;;  %v2445_v21 = vcombine.low %v2421_v0, %v2437_v15  ;;  %v2446_v18 = vcombine.high %v2421_v0, %v2437_v15  ;;  %v7857_v15 = vpop.permute.xlu1 %2287 }
 0x2f0   : > { %v2461_v19 = vcombine.low %v2428_v6, %v2444_v20  ;;  %v2462_v22 = vcombine.high %v2428_v6, %v2444_v20  ;;  %v2929_v29 = vrot.slane %v2921_v10, %v7601_v17  ;;  %v2936_v24 = vrot.slane %v2922_v16, %v7601_v17  ;;  %v7859_v20 = vpop.permute.xlu0 %952 }
 0x2f1   : > { %v2945_v38 = vrot.slane %v2937_v41, %v7601_v17  ;;  %v2952_v25 = vrot.slane %v2938_v36, %v7601_v17  ;;  %v2453_v27 = vrot.slane %v2445_v21, %v7601_v17  ;;  %v2460_v51 = vrot.slane %v2446_v18, %v7601_v17 }
 0x2f2   : > { %v2469_v11 = vrot.slane %v2461_v19, %v7601_v17  ;;  %v2476_v39 = vrot.slane %v2462_v22, %v7601_v17  ;;  %v1439_v57 = vrot.slane %v1425_v42, %v7597_v12  ;;  %v1441_v61 = vcombine.high %v7755_v37, %v7795_v43 }
 0x2f3   : > { %v2953_v9 = vcombine.low %v2929_v29, %v2945_v38  ;;  %v2954_v3 = vcombine.high %v2929_v29, %v2945_v38  ;;  %v2955_v31 = vcombine.low %v2936_v24, %v2952_v25  ;;  %v2956_v48 = vcombine.high %v2936_v24, %v2952_v25 }
 0x2f4   : > { %v2957_v46 = vcombine.low %v2453_v27, %v2460_v51  ;;  %v6427_v50 = vcombine.high %v2453_v27, %v2460_v51  ;;  %v2973_v33 = vcombine.low %v2469_v11, %v2476_v39  ;;  %v6428_v47 = vcombine.high %v2469_v11, %v2476_v39 }
 0x2f5   : > { %v6606_v35 = vpack.c.bf16 %v2953_v9, %v2953_v9  ;;  %v6614_v52 = vpack.c.bf16 %v2954_v3, %v2954_v3  ;;  %v6622_v53 = vpack.c.bf16 %v2955_v31, %v2955_v31  ;;  %v6630_v45 = vpack.c.bf16 %v2956_v48, %v2956_v48  ;;  %v7869_v31 = vpop.permute.xlu1 %2311  ;;  %v7871_v48 = vpop.permute.xlu0 %976 }
 0x2f6   : > { %v2964_v34 = vrot.slane %v2957_v46, %v7597_v12  ;;  %v2972_v26 = vrot.slane %v6427_v50, %v7597_v12  ;;  %v2980_v30 = vrot.slane %v2973_v33, %v7597_v12  ;;  %v2988_v4 = vrot.slane %v6428_v47, %v7597_v12 }
 0x2f7   : > { %3561 = vst.msk [vmem:[#allocation3] sm:$0xf] %vm2232_vm0, %v6606_v35  ;;  %3569 = vst.msk [vmem:[#allocation3 + $0x20] sm:$0xf] %vm2232_vm0, %v6614_v52  ;;  %v1448_v8 = vrot.slane %v1440_v58, %v7597_v12  ;;  %v1455_v44 = vrot.slane %v1441_v61, %v7597_v12  ;;  %v1492_v23 = vcombine.low %v7533_v54, %v7815_v13 }
 0x2f8   : > { %3577 = vst.msk [vmem:[#allocation3 + $0x40] sm:$0xf] %vm2232_vm0, %v6622_v53  ;;  %3585 = vst.msk [vmem:[#allocation3 + $0x60] sm:$0xf] %vm2232_vm0, %v6630_v45  ;;  %v2989_v0 = vcombine.low %v2964_v34, %v2972_v26  ;;  %v2990_v6 = vcombine.high %v2964_v34, %v2972_v26  ;;  %v3005_v2 = vcombine.low %v2980_v30, %v2988_v4 }
 0x2f9   : > { %v3006_v7 = vcombine.high %v2980_v30, %v2988_v4  ;;  %v1493_v5 = vcombine.high %v7533_v54, %v7815_v13  ;;  %v1456_v10 = vcombine.low %v1432_v55, %v1448_v8  ;;  %v1457_v16 = vcombine.high %v1432_v55, %v1448_v8 }
 0x2fa   : > { %v2997_v37 = vrot.slane %v2989_v0, %v7601_v17  ;;  %v3004_v43 = vrot.slane %v2990_v6, %v7601_v17  ;;  %v3013_v28 = vrot.slane %v3005_v2, %v7601_v17  ;;  %v1472_v41 = vcombine.low %v1439_v57, %v1455_v44 }
 0x2fb   : > { %v3020_v42 = vrot.slane %v3006_v7, %v7601_v17  ;;  %v1473_v36 = vcombine.high %v1439_v57, %v1455_v44  ;;  %v1464_v13 = vrot.slane %v1456_v10, %v7601_v17  ;;  %v1471_v22 = vrot.slane %v1457_v16, %v7601_v17 }
 0x2fc   : > { %v3021_v21 = vcombine.low %v2997_v37, %v3013_v28  ;;  %v3022_v18 = vcombine.high %v2997_v37, %v3013_v28  ;;  %v1480_v29 = vrot.slane %v1472_v41, %v7601_v17  ;;  %v1500_v46 = vrot.slane %v1492_v23, %v7597_v12  ;;  %v7897_v23 = vpop.permute.xlu1 %954 }
 0x2fd   : > { %v3023_v19 = vcombine.low %v3004_v43, %v3020_v42  ;;  %v3024_v54 = vcombine.high %v3004_v43, %v3020_v42  ;;  %v1487_v24 = vrot.slane %v1473_v36, %v7601_v17  ;;  %v1968_v11 = vcombine.low %v1464_v13, %v1471_v22 }
 0x2fe   : > { %v6607_v38 = vpack.c.bf16 %v3021_v21, %v3021_v21  ;;  %v6615_v25 = vpack.c.bf16 %v3022_v18, %v3022_v18  ;;  %v6389_v39 = vcombine.high %v1464_v13, %v1471_v22  ;;  %v1507_v50 = vrot.slane %v1493_v5, %v7597_v12  ;;  %v1001_v5 = vpop.permute.xlu0 %1000 }
 0x2ff   : > { %v6623_v27 = vpack.c.bf16 %v3023_v19, %v3023_v19  ;;  %v6631_v51 = vpack.c.bf16 %v3024_v54, %v3024_v54  ;;  %v1984_v9 = vcombine.low %v1480_v29, %v1487_v24  ;;  %v6390_v3 = vcombine.high %v1480_v29, %v1487_v24 }
 0x300   : > { %3562 = vst.msk [vmem:[#allocation3 + $0x4] sm:$0xf] %vm2232_vm0, %v6607_v38  ;;  %3570 = vst.msk [vmem:[#allocation3 + $0x24] sm:$0xf] %vm2232_vm0, %v6615_v25  ;;  %v1508_v33 = vcombine.low %v7793_v40, %v7833_v49  ;;  %v1509_v47 = vcombine.high %v7793_v40, %v7833_v49  ;;  %v1975_v35 = vrot.slane %v1968_v11, %v7597_v12 }
 0x301   : > { %3578 = vst.msk [vmem:[#allocation3 + $0x44] sm:$0xf] %vm2232_vm0, %v6623_v27  ;;  %3586 = vst.msk [vmem:[#allocation3 + $0x64] sm:$0xf] %vm2232_vm0, %v6631_v51  ;;  %v1983_v52 = vrot.slane %v6389_v39, %v7597_v12  ;;  %v1991_v53 = vrot.slane %v1984_v9, %v7597_v12  ;;  %v1999_v45 = vrot.slane %v6390_v3, %v7597_v12  ;;  %v979_v9 = vpop.permute.xlu1 %978 }
 0x302   : > { %v1516_v34 = vrot.slane %v1508_v33, %v7597_v12  ;;  %v1523_v26 = vrot.slane %v1509_v47, %v7597_v12  ;;  %v2753_v30 = vcombine.low %v7540_v56, %v7835_v32  ;;  %v2754_v4 = vcombine.high %v7540_v56, %v7835_v32  ;;  %v7921_v3 = vpop.permute.xlu0 %2281 }
 0x303   : > { %v2000_v55 = vcombine.low %v1975_v35, %v1983_v52  ;;  %v2001_v40 = vcombine.high %v1975_v35, %v1983_v52  ;;  %v2016_v49 = vcombine.low %v1991_v53, %v1999_v45  ;;  %v2017_v57 = vcombine.high %v1991_v53, %v1999_v45 }
 0x304   : > { %v1524_v58 = vcombine.low %v1500_v46, %v1516_v34  ;;  %v1525_v61 = vcombine.high %v1500_v46, %v1516_v34  ;;  %v1540_v0 = vcombine.low %v1507_v50, %v1523_v26  ;;  %v1541_v6 = vcombine.high %v1507_v50, %v1523_v26 }
 0x305   : > { %v2008_v2 = vrot.slane %v2000_v55, %v7601_v17  ;;  %v2015_v7 = vrot.slane %v2001_v40, %v7601_v17  ;;  %v2024_v8 = vrot.slane %v2016_v49, %v7601_v17  ;;  %v2031_v44 = vrot.slane %v2017_v57, %v7601_v17 }
 0x306   : > { %v1532_v56 = vrot.slane %v1524_v58, %v7601_v17  ;;  %v1539_v32 = vrot.slane %v1525_v61, %v7601_v17  ;;  %v1548_v37 = vrot.slane %v1540_v0, %v7601_v17  ;;  %v1555_v43 = vrot.slane %v1541_v6, %v7601_v17 }
 0x307   : > { %v2032_v28 = vcombine.low %v2008_v2, %v2024_v8  ;;  %v2033_v42 = vcombine.high %v2008_v2, %v2024_v8  ;;  %v2034_v10 = vcombine.low %v2015_v7, %v2031_v44  ;;  %v2035_v16 = vcombine.high %v2015_v7, %v2031_v44  ;;  %v1003_v8 = vpop.permute.xlu1 %1002  ;;  %v2306_v44 = vpop.permute.xlu0 %2305 }
 0x308   : > { %v2036_v41 = vcombine.low %v1532_v56, %v1539_v32  ;;  %v6391_v36 = vcombine.high %v1532_v56, %v1539_v32  ;;  %v2052_v21 = vcombine.low %v1548_v37, %v1555_v43  ;;  %v6392_v18 = vcombine.high %v1548_v37, %v1555_v43 }
 0x309   : > { %v6580_v19 = vpack.c.bf16 %v2032_v28, %v2032_v28  ;;  %v6588_v54 = vpack.c.bf16 %v2033_v42, %v2033_v42  ;;  %v6596_v13 = vpack.c.bf16 %v2034_v10, %v2034_v10  ;;  %v6604_v22 = vpack.c.bf16 %v2035_v16, %v2035_v16 }
 0x30a   : > { %v2043_v29 = vrot.slane %v2036_v41, %v7597_v12  ;;  %v2051_v24 = vrot.slane %v6391_v36, %v7597_v12  ;;  %v2059_v38 = vrot.slane %v2052_v21, %v7597_v12  ;;  %v2067_v25 = vrot.slane %v6392_v18, %v7597_v12 }
 0x30b   : > { %2239 = vst.msk [vmem:[#allocation2 + $0x18] sm:$0xf] %vm2232_vm0, %v6580_v19  ;;  %2247 = vst.msk [vmem:[#allocation2 + $0x38] sm:$0xf] %vm2232_vm0, %v6588_v54  ;;  %v7912_v27 = vrot.slane %v2753_v30, %v7597_v12  ;;  %v7915_v51 = vrot.slane %v2754_v4, %v7597_v12  ;;  %v1288_v11 = vcombine.low %v7551_v59, %v7871_v48 }
 0x30c   : > { %2255 = vst.msk [vmem:[#allocation2 + $0x58] sm:$0xf] %vm2232_vm0, %v6596_v13  ;;  %2263 = vst.msk [vmem:[#allocation2 + $0x78] sm:$0xf] %vm2232_vm0, %v6604_v22  ;;  %v1289_v39 = vcombine.high %v7551_v59, %v7871_v48  ;;  %v2068_v46 = vcombine.low %v2043_v29, %v2051_v24  ;;  %v2069_v50 = vcombine.high %v2043_v29, %v2051_v24 }
 0x30d   : > { %v2084_v33 = vcombine.low %v2059_v38, %v2067_v25  ;;  %v2085_v47 = vcombine.high %v2059_v38, %v2067_v25  ;;  %v2821_v35 = vcombine.low %v7554_v60, %v7869_v31  ;;  %v2822_v52 = vcombine.high %v7554_v60, %v7869_v31 }
 0x30e   : > { %v1296_v53 = vrot.slane %v1288_v11, %v7597_v12  ;;  %v1303_v45 = vrot.slane %v1289_v39, %v7597_v12  ;;  %v2076_v34 = vrot.slane %v2068_v46, %v7601_v17  ;;  %v2083_v59 = vrot.slane %v2069_v50, %v7601_v17 }
 0x30f   : > { %v2092_v48 = vrot.slane %v2084_v33, %v7601_v17  ;;  %v2099_v26 = vrot.slane %v2085_v47, %v7601_v17  ;;  %v1304_v30 = vcombine.low %v7859_v20, %v1001_v5  ;;  %v1305_v4 = vcombine.high %v7859_v20, %v1001_v5 }
 0x310   : > { %v1356_v55 = vcombine.low %v7565_v62, %v979_v9  ;;  %v1357_v40 = vcombine.high %v7565_v62, %v979_v9  ;;  %v1372_v42 = vcombine.low %v7897_v23, %v1003_v8  ;;  %v1373_v10 = vcombine.high %v7897_v23, %v1003_v8 }
 0x311   : > { %v2100_v49 = vcombine.low %v2076_v34, %v2092_v48  ;;  %v2101_v57 = vcombine.high %v2076_v34, %v2092_v48  ;;  %v2102_v58 = vcombine.low %v2083_v59, %v2099_v26  ;;  %v2103_v61 = vcombine.high %v2083_v59, %v2099_v26 }
 0x312   : > { %v1312_v0 = vrot.slane %v1304_v30, %v7597_v12  ;;  %v1319_v6 = vrot.slane %v1305_v4, %v7597_v12  ;;  %v1364_v2 = vrot.slane %v1356_v55, %v7597_v12  ;;  %v1371_v7 = vrot.slane %v1357_v40, %v7597_v12 }
 0x313   : > { %v6581_v56 = vpack.c.bf16 %v2100_v49, %v2100_v49  ;;  %v6589_v20 = vpack.c.bf16 %v2101_v57, %v2101_v57  ;;  %v6597_v5 = vpack.c.bf16 %v2102_v58, %v2102_v58  ;;  %v6605_v32 = vpack.c.bf16 %v2103_v61, %v2103_v61 }
 0x314   : > { %v1320_v37 = vcombine.low %v1296_v53, %v1312_v0  ;;  %v1321_v62 = vcombine.high %v1296_v53, %v1312_v0  ;;  %v1336_v43 = vcombine.low %v1303_v45, %v1319_v6  ;;  %v1337_v28 = vcombine.high %v1303_v45, %v1319_v6  ;;  %v7965_v53 = vpop.permute.xlu1 %2283 }
 0x315   : > { %2240 = vst.msk [vmem:[#allocation2 + $0x1c] sm:$0xf] %vm2232_vm0, %v6581_v56  ;;  %2248 = vst.msk [vmem:[#allocation2 + $0x3c] sm:$0xf] %vm2232_vm0, %v6589_v20  ;;  %v2617_v16 = vcombine.low %v7572_v63, %v2306_v44  ;;  %v2618_v41 = vcombine.high %v7572_v63, %v2306_v44  ;;  %v1380_v54 = vrot.slane %v1372_v42, %v7597_v12 }
 0x316   : > { %2256 = vst.msk [vmem:[#allocation2 + $0x5c] sm:$0xf] %vm2232_vm0, %v6597_v5  ;;  %2264 = vst.msk [vmem:[#allocation2 + $0x7c] sm:$0xf] %vm2232_vm0, %v6605_v32  ;;  %v1328_v36 = vrot.slane %v1320_v37, %v7601_v17  ;;  %v1335_v21 = vrot.slane %v1321_v62, %v7601_v17  ;;  %v1344_v18 = vrot.slane %v1336_v43, %v7601_v17  ;;  %v2330_v62 = vpop.permute.xlu0 %2329 }
 0x317   : > { %v1351_v19 = vrot.slane %v1337_v28, %v7601_v17  ;;  %v1387_v13 = vrot.slane %v1373_v10, %v7597_v12  ;;  %v7956_v22 = vrot.slane %v2617_v16, %v7597_v12  ;;  %v7959_v23 = vrot.slane %v2618_v41, %v7597_v12 }
 0x318   : > { %v1832_v29 = vcombine.low %v1328_v36, %v1335_v21  ;;  %v6385_v63 = vcombine.high %v1328_v36, %v1335_v21  ;;  %v1388_v25 = vcombine.low %v1364_v2, %v1380_v54  ;;  %v1389_v11 = vcombine.high %v1364_v2, %v1380_v54  ;;  %v2308_v43 = vpop.permute.xlu1 %2307 }
 0x319   : > { %v1848_v24 = vcombine.low %v1344_v18, %v1351_v19  ;;  %v6386_v38 = vcombine.high %v1344_v18, %v1351_v19  ;;  %v1404_v39 = vcombine.low %v1371_v7, %v1387_v13  ;;  %v1405_v9 = vcombine.high %v1371_v7, %v1387_v13 }
 0x31a   : > { %v1839_v46 = vrot.slane %v1832_v29, %v7597_v12  ;;  %v1847_v50 = vrot.slane %v6385_v63, %v7597_v12  ;;  %v1396_v45 = vrot.slane %v1388_v25, %v7601_v17  ;;  %v1403_v34 = vrot.slane %v1389_v11, %v7601_v17 }
 0x31b   : > { %v1855_v33 = vrot.slane %v1848_v24, %v7597_v12  ;;  %v1863_v47 = vrot.slane %v6386_v38, %v7597_v12  ;;  %v1412_v59 = vrot.slane %v1404_v39, %v7601_v17  ;;  %v1419_v48 = vrot.slane %v1405_v9, %v7601_v17 }
 0x31c   : > { %v1864_v26 = vcombine.low %v1839_v46, %v1847_v50  ;;  %v1865_v30 = vcombine.high %v1839_v46, %v1847_v50  ;;  %v1900_v40 = vcombine.low %v1396_v45, %v1403_v34  ;;  %v6387_v49 = vcombine.high %v1396_v45, %v1403_v34  ;;  %v2334_v34 = vpop.permute.xlu0 %2333 }
 0x31d   : > { %v1880_v4 = vcombine.low %v1855_v33, %v1863_v47  ;;  %v1881_v55 = vcombine.high %v1855_v33, %v1863_v47  ;;  %v1916_v57 = vcombine.low %v1412_v59, %v1419_v48  ;;  %v6388_v58 = vcombine.high %v1412_v59, %v1419_v48 }
 0x31e   : > { %v1872_v61 = vrot.slane %v1864_v26, %v7601_v17  ;;  %v1879_v0 = vrot.slane %v1865_v30, %v7601_v17  ;;  %v1907_v7 = vrot.slane %v1900_v40, %v7597_v12  ;;  %v1915_v8 = vrot.slane %v6387_v49, %v7597_v12 }
 0x31f   : > { %v1888_v6 = vrot.slane %v1880_v4, %v7601_v17  ;;  %v1895_v2 = vrot.slane %v1881_v55, %v7601_v17  ;;  %v1923_v44 = vrot.slane %v1916_v57, %v7597_v12  ;;  %v1931_v56 = vrot.slane %v6388_v58, %v7597_v12 }
 0x320   : > { %v1932_v28 = vcombine.low %v1907_v7, %v1915_v8  ;;  %v1933_v42 = vcombine.high %v1907_v7, %v1915_v8  ;;  %v2633_v63 = vcombine.low %v7921_v3, %v2330_v62  ;;  %v2634_v24 = vcombine.high %v7921_v3, %v2330_v62  ;;  %v2332_v3 = vpop.permute.xlu1 %2331 }
 0x321   : > { %v1896_v20 = vcombine.low %v1872_v61, %v1888_v6  ;;  %v1897_v5 = vcombine.high %v1872_v61, %v1888_v6  ;;  %v1898_v32 = vcombine.low %v1879_v0, %v1895_v2  ;;  %v1899_v37 = vcombine.high %v1879_v0, %v1895_v2 }
 0x322   : > { %v1948_v10 = vcombine.low %v1923_v44, %v1931_v56  ;;  %v1949_v16 = vcombine.high %v1923_v44, %v1931_v56  ;;  %v1940_v19 = vrot.slane %v1932_v28, %v7601_v17  ;;  %v1947_v54 = vrot.slane %v1933_v42, %v7601_v17 }
 0x323   : > { %v6578_v41 = vpack.c.bf16 %v1896_v20, %v1896_v20  ;;  %v6586_v36 = vpack.c.bf16 %v1897_v5, %v1897_v5  ;;  %v6594_v21 = vpack.c.bf16 %v1898_v32, %v1898_v32  ;;  %v6602_v18 = vpack.c.bf16 %v1899_v37, %v1899_v37 }
 0x324   : > { %v1956_v13 = vrot.slane %v1948_v10, %v7601_v17  ;;  %v1963_v29 = vrot.slane %v1949_v16, %v7601_v17  ;;  %v2685_v38 = vcombine.low %v7583_v1, %v2308_v43  ;;  %v2686_v25 = vcombine.high %v7583_v1, %v2308_v43 }
 0x325   : > { %2237 = vst.msk [vmem:[#allocation2 + $0x10] sm:$0xf] %vm2232_vm0, %v6578_v41  ;;  %2245 = vst.msk [vmem:[#allocation2 + $0x30] sm:$0xf] %vm2232_vm0, %v6586_v36  ;;  %v2641_v50 = vrot.slane %v2633_v63, %v7597_v12  ;;  %v2648_v33 = vrot.slane %v2634_v24, %v7597_v12  ;;  %v2769_v49 = vcombine.low %v7817_v14, %v2334_v34 }
 0x326   : > { %2253 = vst.msk [vmem:[#allocation2 + $0x50] sm:$0xf] %vm2232_vm0, %v6594_v21  ;;  %2261 = vst.msk [vmem:[#allocation2 + $0x70] sm:$0xf] %vm2232_vm0, %v6602_v18  ;;  %v1964_v11 = vcombine.low %v1940_v19, %v1956_v13  ;;  %v1965_v39 = vcombine.high %v1940_v19, %v1956_v13  ;;  %v1966_v9 = vcombine.low %v1947_v54, %v1963_v29 }
 0x327   : > { %v1967_v46 = vcombine.high %v1947_v54, %v1963_v29  ;;  %v7994_v47 = vrot.slane %v2685_v38, %v7597_v12  ;;  %v7997_v45 = vrot.slane %v2686_v25, %v7597_v12  ;;  %v2649_v30 = vcombine.low %v7956_v22, %v2641_v50 }
 0x328   : > { %v6579_v59 = vpack.c.bf16 %v1964_v11, %v1964_v11  ;;  %v6587_v48 = vpack.c.bf16 %v1965_v39, %v1965_v39  ;;  %v6595_v26 = vpack.c.bf16 %v1966_v9, %v1966_v9  ;;  %v2650_v4 = vcombine.high %v7956_v22, %v2641_v50 }
 0x329   : > { %v6603_v1 = vpack.c.bf16 %v1967_v46, %v1967_v46  ;;  %v2665_v55 = vcombine.low %v7959_v23, %v2648_v33  ;;  %v2666_v40 = vcombine.high %v7959_v23, %v2648_v33  ;;  %v2770_v57 = vcombine.high %v7817_v14, %v2334_v34 }
 0x32a   : > { %2238 = vst.msk [vmem:[#allocation2 + $0x14] sm:$0xf] %vm2232_vm0, %v6579_v59  ;;  %2246 = vst.msk [vmem:[#allocation2 + $0x34] sm:$0xf] %vm2232_vm0, %v6587_v48  ;;  %v2701_v58 = vcombine.low %v7965_v53, %v2332_v3  ;;  %v2702_v22 = vcombine.high %v7965_v53, %v2332_v3  ;;  %v2657_v61 = vrot.slane %v2649_v30, %v7601_v17 }
 0x32b   : > { %2254 = vst.msk [vmem:[#allocation2 + $0x54] sm:$0xf] %vm2232_vm0, %v6595_v26  ;;  %2262 = vst.msk [vmem:[#allocation2 + $0x74] sm:$0xf] %vm2232_vm0, %v6603_v1  ;;  %v2664_v23 = vrot.slane %v2650_v4, %v7601_v17  ;;  %v2673_v0 = vrot.slane %v2665_v55, %v7601_v17  ;;  %v2680_v6 = vrot.slane %v2666_v40, %v7601_v17 }
 0x32c   : > { %v2777_v2 = vrot.slane %v2769_v49, %v7597_v12  ;;  %v2784_v7 = vrot.slane %v2770_v57, %v7597_v12  ;;  %v8018_v8 = vrot.slane %v2701_v58, %v7597_v12  ;;  %v8021_v14 = vrot.slane %v2702_v22, %v7597_v12 }
 0x32d   : > { %v3161_v44 = vcombine.low %v2657_v61, %v2664_v23  ;;  %v6433_v53 = vcombine.high %v2657_v61, %v2664_v23  ;;  %v3177_v56 = vcombine.low %v2673_v0, %v2680_v6  ;;  %v6434_v20 = vcombine.high %v2673_v0, %v2680_v6 }
 0x32e   : > { %v2785_v5 = vcombine.low %v7912_v27, %v2777_v2  ;;  %v2786_v32 = vcombine.high %v7912_v27, %v2777_v2  ;;  %v2801_v37 = vcombine.low %v7915_v51, %v2784_v7  ;;  %v2802_v62 = vcombine.high %v7915_v51, %v2784_v7 }
 0x32f   : > { %v3168_v43 = vrot.slane %v3161_v44, %v7597_v12  ;;  %v3176_v28 = vrot.slane %v6433_v53, %v7597_v12  ;;  %v3184_v42 = vrot.slane %v3177_v56, %v7597_v12  ;;  %v3192_v10 = vrot.slane %v6434_v20, %v7597_v12 }
 0x330   : > { %v2793_v16 = vrot.slane %v2785_v5, %v7601_v17  ;;  %v2800_v41 = vrot.slane %v2786_v32, %v7601_v17  ;;  %v2809_v36 = vrot.slane %v2801_v37, %v7601_v17  ;;  %v2816_v27 = vrot.slane %v2802_v62, %v7601_v17  ;;  %v2336_v62 = vpop.permute.xlu1 %2335 }
 0x331   : > { %v3193_v21 = vcombine.low %v3168_v43, %v3176_v28  ;;  %v3194_v18 = vcombine.high %v3168_v43, %v3176_v28  ;;  %v3209_v19 = vcombine.low %v3184_v42, %v3192_v10  ;;  %v3210_v51 = vcombine.high %v3184_v42, %v3192_v10 }
 0x332   : > { %v3297_v54 = vcombine.low %v2793_v16, %v2800_v41  ;;  %v6437_v13 = vcombine.high %v2793_v16, %v2800_v41  ;;  %v3313_v29 = vcombine.low %v2809_v36, %v2816_v27  ;;  %v6438_v63 = vcombine.high %v2809_v36, %v2816_v27 }
 0x333   : > { %v3201_v24 = vrot.slane %v3193_v21, %v7601_v17  ;;  %v3208_v38 = vrot.slane %v3194_v18, %v7601_v17  ;;  %v3217_v25 = vrot.slane %v3209_v19, %v7601_v17  ;;  %v3224_v11 = vrot.slane %v3210_v51, %v7601_v17 }
 0x334   : > { %v3304_v39 = vrot.slane %v3297_v54, %v7597_v12  ;;  %v3312_v9 = vrot.slane %v6437_v13, %v7597_v12  ;;  %v3320_v46 = vrot.slane %v3313_v29, %v7597_v12  ;;  %v3328_v50 = vrot.slane %v6438_v63, %v7597_v12 }
 0x335   : > { %v3225_v33 = vcombine.low %v3201_v24, %v3217_v25  ;;  %v3226_v34 = vcombine.high %v3201_v24, %v3217_v25  ;;  %v3227_v3 = vcombine.low %v3208_v38, %v3224_v11  ;;  %v3228_v59 = vcombine.high %v3208_v38, %v3224_v11 }
 0x336   : > { %v3329_v48 = vcombine.low %v3304_v39, %v3312_v9  ;;  %v3330_v26 = vcombine.high %v3304_v39, %v3312_v9  ;;  %v3345_v1 = vcombine.low %v3320_v46, %v3328_v50  ;;  %v3346_v30 = vcombine.high %v3320_v46, %v3328_v50 }
 0x337   : > { %v6610_v4 = vpack.c.bf16 %v3225_v33, %v3225_v33  ;;  %v6618_v55 = vpack.c.bf16 %v3226_v34, %v3226_v34  ;;  %v6626_v40 = vpack.c.bf16 %v3227_v3, %v3227_v3  ;;  %v6634_v49 = vpack.c.bf16 %v3228_v59, %v3228_v59 }
 0x338   : > { %v3337_v57 = vrot.slane %v3329_v48, %v7601_v17  ;;  %v3344_v58 = vrot.slane %v3330_v26, %v7601_v17  ;;  %v3353_v22 = vrot.slane %v3345_v1, %v7601_v17  ;;  %v3360_v61 = vrot.slane %v3346_v30, %v7601_v17 }
 0x339   : > { %3565 = vst.msk [vmem:[#allocation3 + $0x10] sm:$0xf] %vm2232_vm0, %v6610_v4  ;;  %3573 = vst.msk [vmem:[#allocation3 + $0x30] sm:$0xf] %vm2232_vm0, %v6618_v55  ;;  %v2717_v23 = vcombine.low %v7994_v47, %v8018_v8  ;;  %v2718_v0 = vcombine.high %v7994_v47, %v8018_v8  ;;  %v2733_v6 = vcombine.low %v7997_v45, %v8021_v14 }
 0x33a   : > { %3581 = vst.msk [vmem:[#allocation3 + $0x50] sm:$0xf] %vm2232_vm0, %v6626_v40  ;;  %3589 = vst.msk [vmem:[#allocation3 + $0x70] sm:$0xf] %vm2232_vm0, %v6634_v49  ;;  %v2734_v2 = vcombine.high %v7997_v45, %v8021_v14  ;;  %v3361_v7 = vcombine.low %v3337_v57, %v3353_v22  ;;  %v3362_v44 = vcombine.high %v3337_v57, %v3353_v22 }
 0x33b   : > { %v3363_v53 = vcombine.low %v3344_v58, %v3360_v61  ;;  %v3364_v56 = vcombine.high %v3344_v58, %v3360_v61  ;;  %v2725_v20 = vrot.slane %v2717_v23, %v7601_v17  ;;  %v2732_v5 = vrot.slane %v2718_v0, %v7601_v17 }
 0x33c   : > { %v2741_v32 = vrot.slane %v2733_v6, %v7601_v17  ;;  %v2748_v37 = vrot.slane %v2734_v2, %v7601_v17  ;;  %v6612_v47 = vpack.c.bf16 %v3361_v7, %v3361_v7  ;;  %v6620_v8 = vpack.c.bf16 %v3362_v44, %v3362_v44 }
 0x33d   : > { %v6628_v43 = vpack.c.bf16 %v3363_v53, %v3363_v53  ;;  %v6636_v28 = vpack.c.bf16 %v3364_v56, %v3364_v56  ;;  %v3229_v42 = vcombine.low %v2725_v20, %v2732_v5  ;;  %v6435_v10 = vcombine.high %v2725_v20, %v2732_v5 }
 0x33e   : > { %v3245_v45 = vcombine.low %v2741_v32, %v2748_v37  ;;  %v6436_v14 = vcombine.high %v2741_v32, %v2748_v37  ;;  %3567 = vst.msk [vmem:[#allocation3 + $0x18] sm:$0xf] %vm2232_vm0, %v6612_v47  ;;  %3575 = vst.msk [vmem:[#allocation3 + $0x38] sm:$0xf] %vm2232_vm0, %v6620_v8  ;;  %v2837_v16 = vcombine.low %v7857_v15, %v2336_v62 }
 0x33f   : > { %3583 = vst.msk [vmem:[#allocation3 + $0x58] sm:$0xf] %vm2232_vm0, %v6628_v43  ;;  %3591 = vst.msk [vmem:[#allocation3 + $0x78] sm:$0xf] %vm2232_vm0, %v6636_v28  ;;  %v2838_v41 = vcombine.high %v7857_v15, %v2336_v62  ;;  %v3236_v36 = vrot.slane %v3229_v42, %v7597_v12  ;;  %v3244_v27 = vrot.slane %v6435_v10, %v7597_v12 }
 0x340   : > { %v3252_v21 = vrot.slane %v3245_v45, %v7597_v12  ;;  %v3260_v18 = vrot.slane %v6436_v14, %v7597_v12  ;;  %v2829_v19 = vrot.slane %v2821_v35, %v7597_v12  ;;  %v2836_v51 = vrot.slane %v2822_v52, %v7597_v12 }
 0x341   : > { %v2845_v15 = vrot.slane %v2837_v16, %v7597_v12  ;;  %v2852_v54 = vrot.slane %v2838_v41, %v7597_v12  ;;  %v3261_v13 = vcombine.low %v3236_v36, %v3244_v27  ;;  %v3262_v29 = vcombine.high %v3236_v36, %v3244_v27 }
 0x342   : > { %v3277_v63 = vcombine.low %v3252_v21, %v3260_v18  ;;  %v3278_v24 = vcombine.high %v3252_v21, %v3260_v18 }
 0x343   : > { %v2853_v38 = vcombine.low %v2829_v19, %v2845_v15  ;;  %v2854_v25 = vcombine.high %v2829_v19, %v2845_v15  ;;  %v2869_v11 = vcombine.low %v2836_v51, %v2852_v54  ;;  %v2870_v39 = vcombine.high %v2836_v51, %v2852_v54 }
 0x344   : > { %v3269_v9 = vrot.slane %v3261_v13, %v7601_v17  ;;  %v3276_v35 = vrot.slane %v3262_v29, %v7601_v17  ;;  %v3285_v46 = vrot.slane %v3277_v63, %v7601_v17  ;;  %v3292_v60 = vrot.slane %v3278_v24, %v7601_v17 }
 0x345   : > { %v2861_v31 = vrot.slane %v2853_v38, %v7601_v17  ;;  %v2868_v52 = vrot.slane %v2854_v25, %v7601_v17  ;;  %v2877_v50 = vrot.slane %v2869_v11, %v7601_v17  ;;  %v2884_v33 = vrot.slane %v2870_v39, %v7601_v17 }
 0x346   : > { %v3293_v34 = vcombine.low %v3269_v9, %v3285_v46  ;;  %v3294_v3 = vcombine.high %v3269_v9, %v3285_v46  ;;  %v3295_v59 = vcombine.low %v3276_v35, %v3292_v60  ;;  %v3296_v48 = vcombine.high %v3276_v35, %v3292_v60 }
 0x347   : > { %v3365_v26 = vcombine.low %v2861_v31, %v2868_v52  ;;  %v6439_v1 = vcombine.high %v2861_v31, %v2868_v52  ;;  %v3381_v30 = vcombine.low %v2877_v50, %v2884_v33  ;;  %v6440_v4 = vcombine.high %v2877_v50, %v2884_v33 }
 0x348   : > { %v6611_v55 = vpack.c.bf16 %v3293_v34, %v3293_v34  ;;  %v6619_v40 = vpack.c.bf16 %v3294_v3, %v3294_v3  ;;  %v6627_v49 = vpack.c.bf16 %v3295_v59, %v3295_v59  ;;  %v6635_v57 = vpack.c.bf16 %v3296_v48, %v3296_v48 }
 0x349   : > { %v3372_v58 = vrot.slane %v3365_v26, %v7597_v12  ;;  %v3380_v22 = vrot.slane %v6439_v1, %v7597_v12  ;;  %v3388_v61 = vrot.slane %v3381_v30, %v7597_v12  ;;  %v3396_v23 = vrot.slane %v6440_v4, %v7597_v12 }
 0x34a   : > { %3566 = vst.msk [vmem:[#allocation3 + $0x14] sm:$0xf] %vm2232_vm0, %v6611_v55  ;;  %3574 = vst.msk [vmem:[#allocation3 + $0x34] sm:$0xf] %vm2232_vm0, %v6619_v40 }
 0x34b   : > { %3582 = vst.msk [vmem:[#allocation3 + $0x54] sm:$0xf] %vm2232_vm0, %v6627_v49  ;;  %3590 = vst.msk [vmem:[#allocation3 + $0x74] sm:$0xf] %vm2232_vm0, %v6635_v57  ;;  %v3397_v0 = vcombine.low %v3372_v58, %v3380_v22  ;;  %v3398_v6 = vcombine.high %v3372_v58, %v3380_v22  ;;  %v3413_v2 = vcombine.low %v3388_v61, %v3396_v23 }
 0x34c   : > { %v3414_v7 = vcombine.high %v3388_v61, %v3396_v23 }
 0x34d   : > { %v3405_v44 = vrot.slane %v3397_v0, %v7601_v17  ;;  %v3412_v53 = vrot.slane %v3398_v6, %v7601_v17  ;;  %v3421_v56 = vrot.slane %v3413_v2, %v7601_v17 }
 0x34e   : > { %v3428_v12 = vrot.slane %v3414_v7, %v7601_v17 }
 0x34f   : > { %v3429_v20 = vcombine.low %v3405_v44, %v3421_v56  ;;  %v3430_v5 = vcombine.high %v3405_v44, %v3421_v56 }
 0x350   : > { %v3431_v32 = vcombine.low %v3412_v53, %v3428_v12  ;;  %v3432_v37 = vcombine.high %v3412_v53, %v3428_v12 }
 0x351   : > { %v6613_v62 = vpack.c.bf16 %v3429_v20, %v3429_v20  ;;  %v6621_v47 = vpack.c.bf16 %v3430_v5, %v3430_v5 }
 0x352   : > { %v6629_v8 = vpack.c.bf16 %v3431_v32, %v3431_v32  ;;  %v6637_v43 = vpack.c.bf16 %v3432_v37, %v3432_v37 }
 0x353   : > { %3568 = vst.msk [vmem:[#allocation3 + $0x1c] sm:$0xf] %vm2232_vm0, %v6613_v62  ;;  %3576 = vst.msk [vmem:[#allocation3 + $0x3c] sm:$0xf] %vm2232_vm0, %v6621_v47 }
 0x354   : > { %3584 = vst.msk [vmem:[#allocation3 + $0x5c] sm:$0xf] %vm2232_vm0, %v6629_v8  ;;  %3592 = vst.msk [vmem:[#allocation3 + $0x7c] sm:$0xf] %vm2232_vm0, %v6637_v43 }
 0x355 PF: > { %v7008_v17 = vld [vmem:[%s8782_s2 + $0x8] sm:$0xff]   ;;  %s6473_s12 = sshll.u32 %s7162_s29, 5  ;;  %v7009_v28 = vld [vmem:[%s8782_s2] sm:$0xff]   ;;  %vm3640_vm3 = vcmask 261120   ;;  %v7012_v45 = vld [vmem:[#allocation2 + $0x18] sm:$0xff]   ;;  %vm4372_vm4 = vcmask 64512   ;;  %v3741_v59 = vlaneseq }
 0x356   : > { %s3599_s15 = sshra.s32 %s6473_s12, 3  ;;  %6740 = vmatprep.subr.bf16.mxu0 %v7008_v17  ;;  %v7013_v14 = vld [vmem:[#allocation2 + $0x38] sm:$0xff]   ;;  %v6475_v16 = vld [vmem:[%s8783_s3] ss:$0 sm:$0xff]  ;;  %6872 = vmatprep.subr.msk.bf16.mxu1 %vm4372_vm4, %v7012_v45  ;;  %v4389_v41 = vsel %vm4372_vm4, %v7012_v45, 0  ;;  %s7185_s21 = smov 120  }
 0x357   : > { %s6474_s17 = sshll.u32 %s3599_s15, 2  ;;  %6741 = vmatpush3.bf16.msra.mxu0 %v7008_v17  ;;  %v4476_v36 = vsel %vm4372_vm4, %v7013_v14, 0  ;;  %6749 = vmatpush3.bf16.xpose.msra.mxu1 %v4389_v41  ;;  %s7186_s22 = smov 112   ;;  %v7014_v15 = vld [vmem:[#allocation2 + $0x10] sm:$0xff]   ;;  %v7016_v25 = vld [vmem:[#allocation2 + $0x8] sm:$0xff]   ;;  %v7018_v35 = vld [vmem:[#allocation2] sm:$0xff]  }
 0x358   : > { %6742 = vmatprep.subr.bf16.mxu0 %v7009_v28  ;;  %s3602_s18 = scalar_lea.vmem [#allocation4], %s6474_s17  ;;  %v7015_v54 = vld [vmem:[#allocation2 + $0x30] sm:$0xff]   ;;  %6873 = vmatprep.subr.msk.bf16.mxu1 %vm4372_vm4, %v7014_v15  ;;  %v4386_v29 = vsel %vm4372_vm4, %v7014_v15, 0  ;;  %s7187_s23 = smov 104   ;;  %v7017_v11 = vld [vmem:[#allocation2 + $0x28] sm:$0xff]   ;;  %v4383_v39 = vsel %vm4372_vm4, %v7016_v25, 0 }
 0x359   : > { %v7010_v42 = vld [vmem:[%s3602_s18] sm:$0xff]   ;;  %v7011_v10 = vld [vmem:[%s3602_s18 + $0x8] sm:$0xff]   ;;  %v4473_v63 = vsel %vm4372_vm4, %v7015_v54, 0  ;;  %v4470_v9 = vsel %vm4372_vm4, %v7017_v11, 0  ;;  %v4380_v60 = vsel %vm4372_vm4, %v7018_v35, 0  ;;  %v8157_v52 = vld [vmem:[#allocation2 + $0x58] sm:$0xff]   ;;  %s3594_s17 = scalar_lea.vmem %s7307_s26, %s6473_s12 }
 0x35a   : > { %6744 = vmatprep.mubr.msk.bf16.mxu0 %vm3640_vm3, %v7010_v42  ;;  %v7019_v46 = vld [vmem:[#allocation2 + $0x20] sm:$0xff]   ;;  %v8159_v50 = vld [vmem:[#allocation2 + $0x78] sm:$0xff]   ;;  %v7188_v34 = vmov 1983009808   ;;  %v3742_v30 = vshrl.u32 %v3741_v59, 7  ;;  %vm4756_vm11 = vcmask 523264  }
 0x35b   : > { %6743 = vmatpush3.bf16.msra.mxu0 %v7009_v28  ;;  %v4467_v31 = vsel %vm4372_vm4, %v7019_v46, 0  ;;  %v3739_v3 = vunpack.c.l.s4 %v7188_v34  ;;  %v7189_v40 = vmov 1934713408   ;;  %s7192_s27 = smov 8   ;;  %s7193_s28 = smov 24   ;;  %vm5853_vm15 = vcmask 130048  }
 0x35c   : > { %6876 = vmatprep.subr.msk.bf16.mxu0 %vm4372_vm4, %v7013_v14  ;;  %v3771_v49 = vunpack.c.l.s4 %v7189_v40  ;;  %vm5858_vm1 = vcmask 195584   ;;  %s8817_s12 = sld [smem:[#allocation10_spill]] }
 0x35d   : > { %v3740_v1 = vunpack.c.0.s8 %v3739_v3  ;;  %s8819_s30 = sld [smem:[#allocation11_spill]] }
 0x35e   : > { %6745 = vmatmul.mubr.msk.bf16.vlgmr.msra.gmra.mxu0 %vm3640_vm3, %v7011_v10  ;;  %v3772_v23 = vunpack.c.0.s8 %v3771_v49  ;;  %s8820_s29 = sld [smem:[#allocation13_spill]] }
 0x35f   : > { %6761 = vmatpush3.bf16.xpose.msra.mxu0 %v4476_v36  ;;  %6751 = vmatpush3.bf16.xpose.msra.mxu1 %v4386_v29  ;;  %v8167_v57 = vsub.s32 %v3740_v1, %v3742_v30 }
 0x360   : > { %6877 = vmatprep.subr.msk.bf16.mxu0 %vm4372_vm4, %v7015_v54  ;;  %6874 = vmatprep.subr.msk.bf16.mxu1 %vm4372_vm4, %v7016_v25  ;;  %v8177_v32 = vsub.s32 %v3772_v23, %v3742_v30 }
 0x367   : > { %6763 = vmatpush3.bf16.xpose.msra.mxu0 %v4473_v63  ;;  %6753 = vmatpush3.bf16.xpose.msra.mxu1 %v4383_v39 }
 0x368   : > { %6878 = vmatprep.subr.msk.bf16.mxu0 %vm4372_vm4, %v7017_v11  ;;  %6875 = vmatprep.subr.msk.bf16.mxu1 %vm4372_vm4, %v7018_v35 }
 0x36f   : > { %6765 = vmatpush3.bf16.xpose.msra.mxu0 %v4470_v9  ;;  %6755 = vmatpush3.bf16.xpose.msra.mxu1 %v4380_v60 }
 0x370   : > { %6879 = vmatprep.subr.msk.bf16.mxu0 %vm4372_vm4, %v7019_v46  ;;  %6880 = vmatprep.subr.msk.bf16.mxu1 %vm4372_vm4, %v8157_v52 }
 0x377   : > { %6767 = vmatpush3.bf16.xpose.msra.mxu0 %v4467_v31 }
 0x378   : > { %6884 = vmatprep.subr.msk.bf16.mxu0 %vm4372_vm4, %v8159_v50 }
 0x41e   : > { %v6746_v27 = vpop.f32.mrf.mxu0 }
 0x41f   : > { %v8125_v21 = vadd.f32 %v6746_v27, %v6475_v16 }
 0x420   : > { %v3681_v18 = vpop.f32.mrf.mxu0 }
 0x421   : > { %v8127_v19 = vadd.f32 %v6475_v16, %v3681_v18  ;;  %3704 = vrot.lane.b32.xlu0 %v8125_v21, %s7185_s21 }
 0x422   : > { %v6747_v51 = vpop.f32.mrf.mxu0 }
 0x423   : > { %3712 = vrot.lane.b32.xlu1 %v8127_v19, %s7186_s22  ;;  %v8131_v13 = vadd.f32 %v6747_v51, %v6475_v16 }
 0x424   : > { %v3684_v24 = vpop.f32.mrf.mxu0 }
 0x425   : > { %3716 = vrot.lane.b32.xlu0 %v8125_v21, %s7186_s22  ;;  %v8141_v38 = vadd.f32 %v6475_v16, %v3684_v24 }
 0x427   : > { %3706 = vrot.lane.b32.xlu1 %v8131_v13, %s7185_s21 }
 0x429   : > { %3700 = vrot.lane.b32.xlu0 %v8127_v19, %s7185_s21 }
 0x42b   : > { %3718 = vrot.lane.b32.xlu1 %v8131_v13, %s7186_s22 }
 0x42d   : > { %3724 = vrot.lane.b32.xlu0 %v8127_v19, %s7187_s23 }
 0x42f   : > { %3714 = vrot.lane.b32.xlu1 %v8141_v38, %s7186_s22  ;;  %s8818_s22 = sld [smem:[#allocation12_spill]] }
 0x431   : > { %3702 = vrot.lane.b32.xlu0 %v8141_v38, %s7185_s21 }
 0x433   : > { %3726 = vrot.lane.b32.xlu1 %v8141_v38, %s7187_s23 }
 0x435   : > { %3728 = vrot.lane.b32.xlu0 %v8125_v21, %s7187_s23 }
 0x437   : > { %3730 = vrot.lane.b32.xlu1 %v8131_v13, %s7187_s23 }
 0x493   : > { %v8165_v33 = vpop.permute.xlu0 %3704 }
 0x495   : > { %v3713_v48 = vpop.permute.xlu1 %3712 }
 0x496   : > { %v3736_v58 = vcombine.low %v8127_v19, %v3713_v48  ;;  %v3737_v61 = vcombine.high %v8127_v19, %v3713_v48 }
 0x497   : > { %v3717_v26 = vpop.permute.xlu0 %3716 }
 0x498   : > { %v3744_v7 = vrot.slane %v3736_v58, %v8167_v57  ;;  %v3751_v53 = vrot.slane %v3737_v61, %v8167_v57  ;;  %v3872_v56 = vcombine.low %v8125_v21, %v3717_v26  ;;  %v3873_v5 = vcombine.high %v8125_v21, %v3717_v26 }
 0x499   : > { %v3707_v4 = vpop.permute.xlu1 %3706 }
 0x49a   : > { %v3880_v42 = vrot.slane %v3872_v56, %v8167_v57  ;;  %v3887_v18 = vrot.slane %v3873_v5, %v8167_v57 }
 0x49b   : > { %v3701_v55 = vpop.permute.xlu0 %3700 }
 0x49d   : > { %v3719_v22 = vpop.permute.xlu1 %3718 }
 0x49e   : > { %v3940_v10 = vcombine.low %v8131_v13, %v3719_v22  ;;  %v3941_v45 = vcombine.high %v8131_v13, %v3719_v22 }
 0x49f   : > { %v3725_v0 = vpop.permute.xlu0 %3724 }
 0x4a0   : > { %v3752_v6 = vcombine.low %v3701_v55, %v3725_v0  ;;  %v3753_v2 = vcombine.high %v3701_v55, %v3725_v0  ;;  %v3955_v25 = vrot.slane %v3941_v45, %v8167_v57 }
 0x4a1   : > { %v3715_v44 = vpop.permute.xlu1 %3714 }
 0x4a2   : > { %v3760_v12 = vrot.slane %v3752_v6, %v8167_v57  ;;  %v3767_v20 = vrot.slane %v3753_v2, %v8167_v57  ;;  %v3804_v37 = vcombine.low %v8141_v38, %v3715_v44  ;;  %v3805_v14 = vcombine.high %v8141_v38, %v3715_v44 }
 0x4a3   : > { %v3703_v62 = vpop.permute.xlu0 %3702  ;;  %v3948_v38 = vrot.slane %v3940_v10, %v8167_v57 }
 0x4a4   : > { %v3768_v47 = vcombine.low %v3744_v7, %v3760_v12  ;;  %v3769_v8 = vcombine.high %v3744_v7, %v3760_v12  ;;  %v3784_v43 = vcombine.low %v3751_v53, %v3767_v20  ;;  %v3785_v17 = vcombine.high %v3751_v53, %v3767_v20 }
 0x4a5   : > { %v3727_v28 = vpop.permute.xlu1 %3726  ;;  %v3812_v15 = vrot.slane %v3804_v37, %v8167_v57  ;;  %v3819_v35 = vrot.slane %v3805_v14, %v8167_v57 }
 0x4a6   : > { %v3776_v16 = vrot.slane %v3768_v47, %v8177_v32  ;;  %v3783_v41 = vrot.slane %v3769_v8, %v8177_v32  ;;  %v3820_v36 = vcombine.low %v3703_v62, %v3727_v28  ;;  %v3821_v27 = vcombine.high %v3703_v62, %v3727_v28 }
 0x4a7   : > { %v3729_v21 = vpop.permute.xlu0 %3728  ;;  %v3792_v19 = vrot.slane %v3784_v43, %v8177_v32  ;;  %v3799_v51 = vrot.slane %v3785_v17, %v8177_v32 }
 0x4a8   : > { %v3828_v54 = vrot.slane %v3820_v36, %v8167_v57  ;;  %v3835_v13 = vrot.slane %v3821_v27, %v8167_v57  ;;  %v3888_v29 = vcombine.low %v8165_v33, %v3729_v21  ;;  %v3889_v63 = vcombine.high %v8165_v33, %v3729_v21 }
 0x4a9   : > { %v3731_v24 = vpop.permute.xlu1 %3730  ;;  %v4008_v9 = vcombine.low %v3776_v16, %v3783_v41  ;;  %v6482_v31 = vcombine.high %v3776_v16, %v3783_v41  ;;  %v4024_v34 = vcombine.low %v3792_v19, %v3799_v51  ;;  %v6483_v49 = vcombine.high %v3792_v19, %v3799_v51 }
 0x4aa   : > { %v3956_v11 = vcombine.low %v3707_v4, %v3731_v24  ;;  %v3957_v39 = vcombine.high %v3707_v4, %v3731_v24  ;;  %v3836_v46 = vcombine.low %v3812_v15, %v3828_v54  ;;  %v3837_v60 = vcombine.high %v3812_v15, %v3828_v54 }
 0x4ab   : > { %v3896_v3 = vrot.slane %v3888_v29, %v8167_v57  ;;  %v3903_v59 = vrot.slane %v3889_v63, %v8167_v57  ;;  %v3852_v48 = vcombine.low %v3819_v35, %v3835_v13  ;;  %v3853_v33 = vcombine.high %v3819_v35, %v3835_v13 }
 0x4ac   : > { %v3964_v26 = vrot.slane %v3956_v11, %v8167_v57  ;;  %v3971_v1 = vrot.slane %v3957_v39, %v8167_v57  ;;  %v3844_v58 = vrot.slane %v3836_v46, %v8177_v32  ;;  %v3851_v22 = vrot.slane %v3837_v60, %v8177_v32 }
 0x4ad   : > { %v3904_v30 = vcombine.low %v3880_v42, %v3896_v3  ;;  %v3905_v55 = vcombine.high %v3880_v42, %v3896_v3  ;;  %v3920_v4 = vcombine.low %v3887_v18, %v3903_v59  ;;  %v3921_v40 = vcombine.high %v3887_v18, %v3903_v59 }
 0x4ae   : > { %v8204_v61 = vrot.slane %v4008_v9, %v8167_v57  ;;  %v3972_v7 = vcombine.low %v3948_v38, %v3964_v26  ;;  %v3973_v44 = vcombine.high %v3948_v38, %v3964_v26  ;;  %v3988_v53 = vcombine.low %v3955_v25, %v3971_v1 }
 0x4af   : > { %v3912_v23 = vrot.slane %v3904_v30, %v8177_v32  ;;  %v3919_v0 = vrot.slane %v3905_v55, %v8177_v32  ;;  %v3928_v6 = vrot.slane %v3920_v4, %v8177_v32  ;;  %v3935_v2 = vrot.slane %v3921_v40, %v8177_v32 }
 0x4b0   : > { %v3989_v56 = vcombine.high %v3955_v25, %v3971_v1  ;;  %v3860_v12 = vrot.slane %v3852_v48, %v8177_v32  ;;  %v3867_v20 = vrot.slane %v3853_v33, %v8177_v32  ;;  %v3980_v62 = vrot.slane %v3972_v7, %v8177_v32 }
 0x4b1   : > { %v4144_v5 = vcombine.low %v3912_v23, %v3919_v0  ;;  %v6486_v37 = vcombine.high %v3912_v23, %v3919_v0  ;;  %v3987_v47 = vrot.slane %v3973_v44, %v8177_v32  ;;  %v3996_v8 = vrot.slane %v3988_v53, %v8177_v32 }
 0x4b2   : > { %v4003_v43 = vrot.slane %v3989_v56, %v8177_v32  ;;  %v4076_v17 = vcombine.low %v3844_v58, %v3851_v22  ;;  %v4160_v28 = vcombine.low %v3928_v6, %v3935_v2  ;;  %v6487_v42 = vcombine.high %v3928_v6, %v3935_v2 }
 0x4b3   : > { %v4023_v10 = vrot.slane %v6482_v31, %v8167_v57  ;;  %v4212_v45 = vcombine.low %v3980_v62, %v3987_v47  ;;  %v6488_v14 = vcombine.high %v3980_v62, %v3987_v47  ;;  %v6484_v36 = vcombine.high %v3844_v58, %v3851_v22 }
 0x4b4   : > { %v4228_v16 = vcombine.low %v3996_v8, %v4003_v43  ;;  %v6489_v41 = vcombine.high %v3996_v8, %v4003_v43  ;;  %v4092_v27 = vcombine.low %v3860_v12, %v3867_v20  ;;  %v4031_v21 = vrot.slane %v4024_v34, %v8167_v57 }
 0x4b5   : > { %v4039_v18 = vrot.slane %v6483_v49, %v8167_v57  ;;  %v6485_v19 = vcombine.high %v3860_v12, %v3867_v20  ;;  %v8220_v51 = vrot.slane %v4144_v5, %v8167_v57  ;;  %v8223_v15 = vrot.slane %v6486_v37, %v8167_v57 }
 0x4b6   : > { %v8226_v54 = vrot.slane %v4160_v28, %v8167_v57  ;;  %v8229_v13 = vrot.slane %v6487_v42, %v8167_v57  ;;  %v8232_v29 = vrot.slane %v4212_v45, %v8167_v57  ;;  %v4040_v63 = vcombine.low %v8204_v61, %v4023_v10 }
 0x4b7   : > { %v8236_v24 = vrot.slane %v6488_v14, %v8167_v57  ;;  %v8239_v38 = vrot.slane %v4228_v16, %v8167_v57  ;;  %v8242_v25 = vrot.slane %v6489_v41, %v8167_v57  ;;  %v4056_v11 = vcombine.low %v4031_v21, %v4039_v18  ;;  %v7022_v41 = vld [vmem:[#allocation2 + $0x50] sm:$0xff]  }
 0x4b8   : > { %v4041_v39 = vcombine.high %v8204_v61, %v4023_v10  ;;  %v4083_v9 = vrot.slane %v4076_v17, %v8167_v57  ;;  %v4091_v35 = vrot.slane %v6484_v36, %v8167_v57  ;;  %v4099_v46 = vrot.slane %v4092_v27, %v8167_v57  ;;  %v7023_v36 = vld [vmem:[#allocation2 + $0x70] sm:$0xff]  }
 0x4b9   : > { %v4048_v60 = vrot.slane %v4040_v63, %v8177_v32  ;;  %v4057_v31 = vcombine.high %v4031_v21, %v4039_v18  ;;  %v4064_v34 = vrot.slane %v4056_v11, %v8177_v32  ;;  %v4107_v3 = vrot.slane %v6485_v19, %v8167_v57  ;;  %v7024_v18 = vld [vmem:[#allocation2 + $0x48] sm:$0xff]  }
 0x4ba   : > { %v4108_v59 = vcombine.low %v4083_v9, %v4091_v35  ;;  %v4109_v48 = vcombine.high %v4083_v9, %v4091_v35  ;;  %v4176_v33 = vcombine.low %v8220_v51, %v8223_v15  ;;  %v4192_v26 = vcombine.low %v8226_v54, %v8229_v13  ;;  %v7025_v19 = vld [vmem:[#allocation2 + $0x68] sm:$0xff]   ;;  %v7027_v9 = vld [vmem:[#allocation2 + $0x60] sm:$0xff]  }
 0x4bb   : > { %v4124_v1 = vcombine.low %v4099_v46, %v4107_v3  ;;  %v4125_v30 = vcombine.high %v4099_v46, %v4107_v3  ;;  %v4244_v49 = vcombine.low %v8232_v29, %v8236_v24  ;;  %v4072_v58 = vcombine.low %v4048_v60, %v4064_v34 }
 0x4bc   : > { %v4116_v55 = vrot.slane %v4108_v59, %v8177_v32  ;;  %v4184_v4 = vrot.slane %v4176_v33, %v8177_v32  ;;  %v4200_v40 = vrot.slane %v4192_v26, %v8177_v32  ;;  %v4260_v61 = vcombine.low %v8239_v38, %v8242_v25  ;;  %v4701_v33 = vld [vmem:[%s7312_s16] sm:$0xff]  ;;  %s7191_s16 = smov 16  }
 0x4bd   : > { %v4132_v22 = vrot.slane %v4124_v1, %v8177_v32  ;;  %v4252_v23 = vrot.slane %v4244_v49, %v8177_v32  ;;  %v4055_v0 = vrot.slane %v4041_v39, %v8177_v32  ;;  %v4071_v6 = vrot.slane %v4057_v31, %v8177_v32  ;;  %v7026_v39 = vld [vmem:[#allocation2 + $0x40] sm:$0xff]  }
 0x4be   : > { %v4123_v2 = vrot.slane %v4109_v48, %v8177_v32  ;;  %v4073_v7 = vcombine.high %v4048_v60, %v4064_v34  ;;  %v4268_v56 = vrot.slane %v4260_v61, %v8177_v32  ;;  %v4208_v12 = vcombine.low %v4184_v4, %v4200_v40 }
 0x4bf   : > { %v4140_v44 = vcombine.low %v4116_v55, %v4132_v22  ;;  %v4141_v53 = vcombine.high %v4116_v55, %v4132_v22  ;;  %v4209_v20 = vcombine.high %v4184_v4, %v4200_v40  ;;  %v4139_v5 = vrot.slane %v4125_v30, %v8177_v32 }
 0x4c0   : > { %v4276_v47 = vcombine.low %v4252_v23, %v4268_v56  ;;  %v4277_v8 = vcombine.high %v4252_v23, %v4268_v56  ;;  %v4563_v43 = vsel %vm4372_vm4, %v8157_v52, 0  ;;  %v4074_v17 = vcombine.low %v4055_v0, %v4071_v6 }
 0x4c1   : > { %v4280_v37 = vpack.c.bf16 %v4140_v44, %v4072_v58  ;;  %v4282_v62 = vpack.c.bf16 %v4141_v53, %v4073_v7  ;;  %v4142_v28 = vcombine.low %v4123_v2, %v4139_v5  ;;  %v4143_v42 = vcombine.high %v4123_v2, %v4139_v5 }
 0x4c2   : > { %v4281_v10 = vpack.c.bf16 %v4276_v47, %v4208_v12  ;;  %v4283_v45 = vpack.c.bf16 %v4277_v8, %v4209_v20  ;;  %v4650_v14 = vsel %vm4372_vm4, %v8159_v50, 0  ;;  %v4075_v16 = vcombine.high %v4055_v0, %v4071_v6 }
 0x4c3   : > { %6756 = vmatprep.mubr.msk.bf16.mxu1 %vm4372_vm4, %v4280_v37  ;;  %6768 = vmatprep.mubr.msk.bf16.mxu0 %vm4372_vm4, %v4282_v62  ;;  %v4284_v52 = vpack.c.bf16 %v4142_v28, %v4074_v17  ;;  %v4560_v50 = vsel %vm4372_vm4, %v7022_v41, 0  ;;  %v4647_v21 = vsel %vm4372_vm4, %v7023_v36, 0  ;;  %v4557_v63 = vsel %vm4372_vm4, %v7024_v18, 0 }
 0x4c4   : > { %6757 = vmatmul.mubr.msk.bf16.vlgmr.msra.gmra.mxu1 %vm4372_vm4, %v4281_v10  ;;  %6769 = vmatmul.mubr.msk.bf16.vlgmr.msra.gmra.mxu0 %vm4372_vm4, %v4283_v45  ;;  %v4286_v27 = vpack.c.bf16 %v4143_v42, %v4075_v16  ;;  %v4644_v11 = vsel %vm4372_vm4, %v7025_v19, 0  ;;  %v4245_v35 = vcombine.high %v8232_v29, %v8236_v24  ;;  %v4261_v46 = vcombine.high %v8239_v38, %v8242_v25 }
 0x4c5   : > { %6773 = vmatpush3.bf16.xpose.msra.mxu1 %v4563_v43  ;;  %6785 = vmatpush3.bf16.xpose.msra.mxu0 %v4650_v14  ;;  %v4177_v60 = vcombine.high %v8220_v51, %v8223_v15  ;;  %v4193_v31 = vcombine.high %v8226_v54, %v8229_v13  ;;  %v4554_v29 = vsel %vm4372_vm4, %v7026_v39, 0  ;;  %v4641_v24 = vsel %vm4372_vm4, %v7027_v9, 0 }
 0x4c6   : > { %6780 = vmatprep.mubr.msk.bf16.mxu1 %vm4372_vm4, %v4284_v52  ;;  %6792 = vmatprep.mubr.msk.bf16.mxu0 %vm4372_vm4, %v4286_v27  ;;  %v4259_v34 = vrot.slane %v4245_v35, %v8177_v32  ;;  %v4275_v3 = vrot.slane %v4261_v46, %v8177_v32  ;;  %vm4702_vm5 = vnez %v4701_v33  ;;  %v7190_v26 = vmov 0  }
 0x4c7   : > { %6881 = vmatprep.subr.msk.bf16.mxu1 %vm4372_vm4, %v7022_v41  ;;  %6885 = vmatprep.subr.msk.bf16.mxu0 %vm4372_vm4, %v7023_v36  ;;  %v4191_v38 = vrot.slane %v4177_v60, %v8177_v32  ;;  %v4207_v25 = vrot.slane %v4193_v31, %v8177_v32  ;;  %v4703_v1 = vsel %vm4702_vm5, 16843009, %v7190_v26 }
 0x4c8   : > { %v4278_v59 = vcombine.low %v4259_v34, %v4275_v3  ;;  %v4279_v51 = vcombine.high %v4259_v34, %v4275_v3  ;;  %v4706_v30 = vunpack.c.2.s8 %v4703_v1  ;;  %v4704_v55 = vunpack.c.0.s8 %v4703_v1 }
 0x4c9   : > { %v4210_v15 = vcombine.low %v4191_v38, %v4207_v25  ;;  %v4211_v48 = vcombine.high %v4191_v38, %v4207_v25  ;;  %v4705_v49 = vunpack.c.1.s8 %v4703_v1  ;;  %v4707_v22 = vunpack.c.3.s8 %v4703_v1 }
 0x4ca   : > { %v4712_v4 = vpack.c.b16 %v4706_v30, %v4706_v30  ;;  %v4708_v40 = vpack.c.b16 %v4704_v55, %v4704_v55 }
 0x4cb   : > { %v4285_v54 = vpack.c.bf16 %v4278_v59, %v4210_v15  ;;  %v4287_v13 = vpack.c.bf16 %v4279_v51, %v4211_v48  ;;  %v4710_v23 = vpack.c.b16 %v4705_v49, %v4705_v49  ;;  %v4714_v0 = vpack.c.b16 %v4707_v22, %v4707_v22 }
 0x4cc   : > { %v4713_v58 = vpack.c.b8 %v4712_v4, %v4712_v4  ;;  %v4709_v61 = vpack.c.b8 %v4708_v40, %v4708_v40 }
 0x4cd   : > { %6775 = vmatpush3.bf16.xpose.msra.mxu1 %v4560_v50  ;;  %6787 = vmatpush3.bf16.xpose.msra.mxu0 %v4647_v21  ;;  %v4711_v6 = vpack.c.b8 %v4710_v23, %v4710_v23  ;;  %v4715_v7 = vpack.c.b8 %v4714_v0, %v4714_v0 }
 0x4ce   : > { %6882 = vmatprep.subr.msk.bf16.mxu1 %vm4372_vm4, %v7024_v18  ;;  %6886 = vmatprep.subr.msk.bf16.mxu0 %vm4372_vm4, %v7025_v19  ;;  %vm4718_vm6 = vnez %v4713_v58  ;;  %vm4716_vm7 = vnez %v4709_v61 }
 0x4cf   : > { %v4722_v2 = vsel %vm4718_vm6, 16843009, %v7190_v26  ;;  %v4720_v44 = vsel %vm4716_vm7, 16843009, %v7190_v26  ;;  %vm4717_vm8 = vnez %v4711_v6  ;;  %vm4719_vm9 = vnez %v4715_v7 }
 0x4d0   : > { %v4726_v53 = vunpack.c.0.s8 %v4722_v2  ;;  %v4724_v56 = vunpack.c.0.s8 %v4720_v44  ;;  %v4721_v12 = vsel %vm4717_vm8, 16843009, %v7190_v26  ;;  %v4723_v5 = vsel %vm4719_vm9, 16843009, %v7190_v26 }
 0x4d1   : > { %v4725_v8 = vunpack.c.0.s8 %v4721_v12  ;;  %v4727_v10 = vunpack.c.0.s8 %v4723_v5 }
 0x4d2   : > { %vm8306_vm10 = vcmp.ne.s32.totalorder %v4726_v53, 0  ;;  %vm8310_vm12 = vcmp.ne.s32.totalorder %v4724_v56, 0 }
 0x4d3   : > { %vm8330_vm13 = vcmp.ne.s32.totalorder %v4725_v8, 0  ;;  %vm8338_vm14 = vcmp.ne.s32.totalorder %v4727_v10, 0 }
 0x4d5   : > { %6777 = vmatpush3.bf16.xpose.msra.mxu1 %v4557_v63  ;;  %6789 = vmatpush3.bf16.xpose.msra.mxu0 %v4644_v11 }
 0x4d6   : > { %6883 = vmatprep.subr.msk.bf16.mxu1 %vm4372_vm4, %v7026_v39  ;;  %6887 = vmatprep.subr.msk.bf16.mxu0 %vm4372_vm4, %v7027_v9 }
 0x4dd   : > { %6779 = vmatpush3.bf16.xpose.msra.mxu1 %v4554_v29  ;;  %6791 = vmatpush3.bf16.xpose.msra.mxu0 %v4641_v24 }
 0x4e4   : > { %6781 = vmatmul.mubr.msk.bf16.vlgmr.msra.gmra.mxu1 %vm4372_vm4, %v4285_v54  ;;  %6793 = vmatmul.mubr.msk.bf16.vlgmr.msra.gmra.mxu0 %vm4372_vm4, %v4287_v13 }
 0x584   : > { %v6758_v37 = vpop.f32.mrf.mxu1  ;;  %v6770_v62 = vpop.f32.mrf.mxu0 }
 0x585   : > { %v8316_v43 = vsel %vm8306_vm10, %v6758_v37, -1e+09  ;;  %v8322_v45 = vsel %vm8306_vm10, %v6770_v62, -1e+09 }
 0x586   : > { %v4425_v17 = vpop.f32.mrf.mxu1  ;;  %v4512_v28 = vpop.f32.mrf.mxu0  ;;  %v4763_v42 = vsel %vm4756_vm11, %v8316_v43, -inf  ;;  %v4775_v21 = vsel %vm4756_vm11, %v8322_v45, -inf }
 0x587   : > { %v8326_v14 = vsel %vm8310_vm12, %v4425_v17, -1e+09  ;;  %4764 = vmax.xlane.f32.xlu1 %v4763_v42  ;;  %v8336_v52 = vsel %vm8310_vm12, %v4512_v28, -1e+09 }
 0x588   : > { %v6759_v16 = vpop.f32.mrf.mxu1  ;;  %v4757_v41 = vsel %vm4756_vm11, %v8326_v14, -inf  ;;  %v4769_v19 = vsel %vm4756_vm11, %v8336_v52, -inf  ;;  %v6771_v11 = vpop.f32.mrf.mxu0 }
 0x589   : > { %4758 = vmax.xlane.f32.xlu0 %v4757_v41  ;;  %v8352_v63 = vsel %vm8338_vm14, %v6759_v16, -1e+09  ;;  %v8360_v35 = vsel %vm8338_vm14, %v6771_v11, -1e+09 }
 0x58a   : > { %v4428_v50 = vpop.f32.mrf.mxu1  ;;  %v4766_v9 = vsel %vm4756_vm11, %v8352_v63, -inf  ;;  %v4515_v46 = vpop.f32.mrf.mxu0  ;;  %v4778_v60 = vsel %vm4756_vm11, %v8360_v35, -inf }
 0x58b   : > { %v8346_v18 = vsel %vm8330_vm13, %v4428_v50, -1e+09  ;;  %4776 = vmax.xlane.f32.xlu1 %v4775_v21  ;;  %v8366_v31 = vsel %vm8330_vm13, %v4515_v46, -1e+09 }
 0x58c   : > { %v4760_v39 = vsel %vm4756_vm11, %v8346_v18, -inf  ;;  %v4772_v34 = vsel %vm4756_vm11, %v8366_v31, -inf }
 0x58d   : > { %4770 = vmax.xlane.f32.xlu0 %v4769_v19 }
 0x58f   : > { %4761 = vmax.xlane.f32.xlu1 %v4760_v39 }
 0x591   : > { %4767 = vmax.xlane.f32.xlu0 %v4766_v9 }
 0x595   : > { %4779 = vmax.xlane.f32.xlu0 %v4778_v60 }
 0x599   : > { %4773 = vmax.xlane.f32.xlu0 %v4772_v34 }
 0x5a4   : > { %v6782_v3 = vpop.f32.mrf.mxu1  ;;  %v6794_v29 = vpop.f32.mrf.mxu0 }
 0x5a5   : > { %v8372_v24 = vsel %vm8306_vm10, %v6782_v3, -1e+09  ;;  %v8402_v49 = vsel %vm8306_vm10, %v6794_v29, -1e+09 }
 0x5a6   : > { %v4599_v38 = vpop.f32.mrf.mxu1  ;;  %v4686_v25 = vpop.f32.mrf.mxu0  ;;  %v4787_v59 = vsel %vm4756_vm11, %v8372_v24, -inf  ;;  %v4799_v22 = vsel %vm4756_vm11, %v8402_v49, -inf }
 0x5a7   : > { %v8378_v51 = vsel %vm8310_vm12, %v4599_v38, -1e+09  ;;  %4788 = vmax.xlane.f32.xlu1 %v4787_v59  ;;  %v8390_v1 = vsel %vm8310_vm12, %v4686_v25, -1e+09 }
 0x5a8   : > { %v6783_v15 = vpop.f32.mrf.mxu1  ;;  %v6795_v48 = vpop.f32.mrf.mxu0  ;;  %v4781_v33 = vsel %vm4756_vm11, %v8378_v51, -inf  ;;  %v4793_v4 = vsel %vm4756_vm11, %v8390_v1, -inf }
 0x5a9   : > { %v8382_v54 = vsel %vm8338_vm14, %v6783_v15, -1e+09  ;;  %v8414_v23 = vsel %vm8338_vm14, %v6795_v48, -1e+09 }
 0x5aa   : > { %v4602_v13 = vpop.f32.mrf.mxu1  ;;  %v4790_v26 = vsel %vm4756_vm11, %v8382_v54, -inf  ;;  %v4689_v55 = vpop.f32.mrf.mxu0  ;;  %v4802_v0 = vsel %vm4756_vm11, %v8414_v23, -inf }
 0x5ab   : > { %v8394_v30 = vsel %vm8330_vm13, %v4602_v13, -1e+09  ;;  %4782 = vmax.xlane.f32.xlu1 %v4781_v33  ;;  %4791 = vmax.xlane.f32.xlu0 %v4790_v26  ;;  %v8406_v58 = vsel %vm8330_vm13, %v4689_v55, -1e+09 }
 0x5ac   : > { %v4784_v40 = vsel %vm4756_vm11, %v8394_v30, -inf  ;;  %v4796_v61 = vsel %vm4756_vm11, %v8406_v58, -inf }
 0x5af   : > { %4794 = vmax.xlane.f32.xlu1 %v4793_v4  ;;  %4785 = vmax.xlane.f32.xlu0 %v4784_v40 }
 0x5b3   : > { %4800 = vmax.xlane.f32.xlu1 %v4799_v22  ;;  %4797 = vmax.xlane.f32.xlu0 %v4796_v61 }
 0x5b7   : > { %4803 = vmax.xlane.f32.xlu0 %v4802_v0 }
 0x610   : > { %v4765_v6 = vpop.xlane.xlu1 %4764 }
 0x611   : > { %v4807_v2 = vsub.f32 %v8316_v43, %v4765_v6 }
 0x612   : > { %v4759_v7 = vpop.xlane.xlu0 %4758 }
 0x613   : > { %v4825_v44 = vmul.f32 1.442695, %v4807_v2  ;;  %v4805_v53 = vsub.f32 %v8326_v14, %v4759_v7 }
 0x614   : > { %v4777_v56 = vpop.xlane.xlu1 %4776 }
 0x615   : > { %7052 = vpow2.f32 %v4825_v44  ;;  %v4811_v12 = vsub.f32 %v8322_v45, %v4777_v56  ;;  %v4821_v5 = vmul.f32 1.442695, %v4805_v53  ;;  %v7028_v53 = vld [vmem:[#allocation3 + $0x18] sm:$0xff]  }
 0x616   : > { %v4771_v20 = vpop.xlane.xlu0 %4770  ;;  %6796 = vmatprep.subr.bf16.mxu1 %v7028_v53 }
 0x617   : > { %v4833_v37 = vmul.f32 1.442695, %v4811_v12  ;;  %v4809_v62 = vsub.f32 %v8336_v52, %v4771_v20  ;;  %6797 = vmatpush3.bf16.msra.mxu1 %v7028_v53 }
 0x618   : > { %v4762_v8 = vpop.xlane.xlu1 %4761 }
 0x619   : > { %7054 = vpow2.f32 %v4833_v37  ;;  %v4829_v47 = vmul.f32 1.442695, %v4809_v62  ;;  %v4806_v28 = vsub.f32 %v8346_v18, %v4762_v8  ;;  %v7032_v37 = vld [vmem:[#allocation3 + $0x30] sm:$0xff]  }
 0x61a   : > { %v4768_v17 = vpop.xlane.xlu0 %4767  ;;  %7056 = vpow2.f32 %v4821_v5  ;;  %v7031_v5 = vld [vmem:[#allocation3 + $0x8] sm:$0xff]  }
 0x61b   : > { %v4808_v43 = vsub.f32 %v8352_v63, %v4768_v17  ;;  %7058 = vpow2.f32 %v4829_v47  ;;  %v4823_v14 = vmul.f32 1.442695, %v4806_v28 }
 0x61d   : > { %v4827_v42 = vmul.f32 1.442695, %v4808_v43 }
 0x61e   : > { %v4780_v10 = vpop.xlane.xlu0 %4779 }
 0x61f   : > { %7060 = vpow2.f32 %v4827_v42  ;;  %v4812_v45 = vsub.f32 %v8360_v35, %v4780_v10 }
 0x621   : > { %v4835_v16 = vmul.f32 1.442695, %v4812_v45  ;;  %v7033_v45 = vld [vmem:[#allocation3] sm:$0xff]  }
 0x622   : > { %v8425_v41 = vpop.eup %7052  ;;  %v4774_v36 = vpop.xlane.xlu0 %4773 }
 0x623   : > { %7062 = vpow2.f32 %v4835_v16  ;;  %v4810_v52 = vsub.f32 %v8366_v31, %v4774_v36  ;;  %v4859_v27 = vsel %vm4756_vm11, %v8425_v41, 0.0 }
 0x624   : > { %4860 = vadd.xlane.f32.xlu1 %v4859_v27  ;;  %7064 = vpow2.f32 %v4823_v14  ;;  %v7034_v14 = vld [vmem:[#allocation3 + $0x28] sm:$0xff]  }
 0x625   : > { %v4831_v50 = vmul.f32 1.442695, %v4810_v52 }
 0x626   : > { %v8430_v21 = vpop.eup %7054 }
 0x627   : > { %v4871_v18 = vsel %vm4756_vm11, %v8430_v21, 0.0  ;;  %v8434_v19 = vpop.eup %7056  ;;  %7066 = vpow2.f32 %v4831_v50 }
 0x628   : > { %4872 = vadd.xlane.f32.xlu1 %v4871_v18  ;;  %v8436_v63 = vpop.eup %7058  ;;  %v4853_v11 = vsel %vm4756_vm11, %v8434_v19, 0.0  ;;  %v7035_v18 = vld [vmem:[#allocation3 + $0x20] sm:$0xff]  }
 0x629   : > { %v4865_v35 = vsel %vm4756_vm11, %v8436_v63, 0.0 }
 0x62c   : > { %v8440_v39 = vpop.eup %7060  ;;  %4854 = vadd.xlane.f32.xlu1 %v4853_v11  ;;  %v7036_v11 = vld [vmem:[#allocation3 + $0x58] sm:$0xff]  }
 0x62d   : > { %v4862_v9 = vsel %vm4756_vm11, %v8440_v39, 0.0 }
 0x62e   : > { %4863 = vadd.xlane.f32.xlu0 %v4862_v9  ;;  %v7038_v9 = vld [vmem:[#allocation3 + $0x78] sm:$0xff]  }
 0x630   : > { %v8446_v46 = vpop.eup %7062  ;;  %v4789_v60 = vpop.xlane.xlu1 %4788  ;;  %4866 = vadd.xlane.f32.xlu1 %v4865_v35 }
 0x631   : > { %v4815_v31 = vsub.f32 %v8372_v24, %v4789_v60  ;;  %v4874_v34 = vsel %vm4756_vm11, %v8446_v46, 0.0  ;;  %v8451_v3 = vpop.eup %7064 }
 0x632   : > { %4875 = vadd.xlane.f32.xlu0 %v4874_v34  ;;  %v4856_v48 = vsel %vm4756_vm11, %v8451_v3, 0.0 }
 0x633   : > { %v4841_v29 = vmul.f32 1.442695, %v4815_v31 }
 0x634   : > { %v4783_v38 = vpop.xlane.xlu1 %4782  ;;  %v4792_v25 = vpop.xlane.xlu0 %4791 }
 0x635   : > { %7068 = vpow2.f32 %v4841_v29  ;;  %v4813_v59 = vsub.f32 %v8378_v51, %v4783_v38  ;;  %v4816_v15 = vsub.f32 %v8382_v54, %v4792_v25  ;;  %v8457_v13 = vpop.eup %7066 }
 0x636   : > { %4857 = vadd.xlane.f32.xlu0 %v4856_v48  ;;  %v4868_v51 = vsel %vm4756_vm11, %v8457_v13, 0.0 }
 0x637   : > { %v4837_v24 = vmul.f32 1.442695, %v4813_v59  ;;  %v4843_v33 = vmul.f32 1.442695, %v4816_v15 }
 0x638   : > { %v4795_v26 = vpop.xlane.xlu1 %4794  ;;  %v4786_v55 = vpop.xlane.xlu0 %4785 }
 0x639   : > { %7070 = vpow2.f32 %v4837_v24  ;;  %v4817_v4 = vsub.f32 %v8390_v1, %v4795_v26  ;;  %v4814_v40 = vsub.f32 %v8394_v30, %v4786_v55 }
 0x63a   : > { %7072 = vpow2.f32 %v4843_v33  ;;  %4869 = vadd.xlane.f32.xlu0 %v4868_v51 }
 0x63b   : > { %v4845_v54 = vmul.f32 1.442695, %v4817_v4  ;;  %v4839_v22 = vmul.f32 1.442695, %v4814_v40 }
 0x63c   : > { %v4801_v61 = vpop.xlane.xlu1 %4800  ;;  %v4798_v0 = vpop.xlane.xlu0 %4797 }
 0x63d   : > { %7074 = vpow2.f32 %v4845_v54  ;;  %v4819_v6 = vsub.f32 %v8402_v49, %v4801_v61  ;;  %v4818_v2 = vsub.f32 %v8406_v58, %v4798_v0  ;;  %v7029_v49 = vld [vmem:[#allocation3 + $0x10] sm:$0xff]   ;;  %v7030_v58 = vld [vmem:[#allocation3 + $0x38] sm:$0xff]  }
 0x63e   : > { %7076 = vpow2.f32 %v4839_v22  ;;  %6798 = vmatprep.subr.bf16.mxu1 %v7029_v49  ;;  %6808 = vmatprep.subr.bf16.mxu0 %v7030_v58 }
 0x63f   : > { %v4849_v7 = vmul.f32 1.442695, %v4819_v6  ;;  %v4847_v44 = vmul.f32 1.442695, %v4818_v2  ;;  %6799 = vmatpush3.bf16.msra.mxu1 %v7029_v49  ;;  %6809 = vmatpush3.bf16.msra.mxu0 %v7030_v58 }
 0x640   : > { %v4804_v1 = vpop.xlane.xlu0 %4803  ;;  %6800 = vmatprep.subr.bf16.mxu1 %v7031_v5  ;;  %6810 = vmatprep.subr.bf16.mxu0 %v7032_v37 }
 0x641   : > { %7078 = vpow2.f32 %v4849_v7  ;;  %v4820_v30 = vsub.f32 %v8414_v23, %v4804_v1  ;;  %v7037_v1 = vld [vmem:[#allocation3 + $0x50] sm:$0xff]  }
 0x642   : > { %v8466_v56 = vpop.eup %7068  ;;  %7080 = vpow2.f32 %v4847_v44 }
 0x643   : > { %v4851_v12 = vmul.f32 1.442695, %v4820_v30  ;;  %v4883_v20 = vsel %vm4756_vm11, %v8466_v56, 0.0  ;;  %6801 = vmatpush3.bf16.msra.mxu1 %v7031_v5  ;;  %6811 = vmatpush3.bf16.msra.mxu0 %v7032_v37  ;;  %v7043_v5 = vld [vmem:[#allocation3 + $0x60] sm:$0xff]  }
 0x644   : > { %4884 = vadd.xlane.f32.xlu1 %v4883_v20  ;;  %6802 = vmatprep.subr.bf16.mxu1 %v7033_v45  ;;  %v7040_v20 = vld [vmem:[#allocation3 + $0x70] sm:$0xff]  }
 0x645   : > { %7082 = vpow2.f32 %v4851_v12  ;;  %6812 = vmatprep.subr.bf16.mxu0 %v7034_v14 }
 0x646   : > { %v8470_v62 = vpop.eup %7070 }
 0x647   : > { %v8472_v23 = vpop.eup %7072  ;;  %v4877_v47 = vsel %vm4756_vm11, %v8470_v62, 0.0  ;;  %6803 = vmatpush3.bf16.msra.mxu1 %v7033_v45  ;;  %6813 = vmatpush3.bf16.msra.mxu0 %v7034_v14 }
 0x648   : > { %4878 = vadd.xlane.f32.xlu1 %v4877_v47  ;;  %v4886_v8 = vsel %vm4756_vm11, %v8472_v23, 0.0  ;;  %6814 = vmatprep.subr.bf16.mxu0 %v7035_v18 }
 0x649   : > { %4887 = vadd.xlane.f32.xlu0 %v4886_v8  ;;  %6820 = vmatprep.subr.bf16.mxu1 %v7036_v11 }
 0x64a   : > { %v8478_v17 = vpop.eup %7074 }
 0x64b   : > { %v8480_v43 = vpop.eup %7076  ;;  %v4889_v28 = vsel %vm4756_vm11, %v8478_v17, 0.0  ;;  %6815 = vmatpush3.bf16.msra.mxu0 %v7035_v18 }
 0x64c   : > { %4890 = vadd.xlane.f32.xlu1 %v4889_v28  ;;  %v4880_v42 = vsel %vm4756_vm11, %v8480_v43, 0.0  ;;  %6832 = vmatprep.subr.bf16.mxu0 %v7038_v9 }
 0x64d   : > { %4881 = vadd.xlane.f32.xlu0 %v4880_v42 }
 0x64e   : > { %v8486_v10 = vpop.eup %7078 }
 0x64f   : > { %v8488_v16 = vpop.eup %7080  ;;  %v4895_v36 = vsel %vm4756_vm11, %v8486_v10, 0.0 }
 0x650   : > { %4896 = vadd.xlane.f32.xlu1 %v4895_v36  ;;  %v4892_v52 = vsel %vm4756_vm11, %v8488_v16, 0.0 }
 0x651   : > { %4893 = vadd.xlane.f32.xlu0 %v4892_v52 }
 0x652   : > { %v8494_v27 = vpop.eup %7082 }
 0x653   : > { %v4898_v50 = vsel %vm4756_vm11, %v8494_v27, 0.0 }
 0x655   : > { %4899 = vadd.xlane.f32.xlu0 %v4898_v50 }
 0x6ad   : > { %v4861_v35 = vpop.xlane.xlu1 %4860 }
 0x6b1   : > { %v4873_v60 = vpop.xlane.xlu1 %4872 }
 0x6b5   : > { %v4855_v34 = vpop.xlane.xlu1 %4854 }
 0x6b7   : > { %v4864_v31 = vpop.xlane.xlu0 %4863 }
 0x6b8   : > { %7084 = vrcp.f32 %v4864_v31 }
 0x6b9   : > { %7086 = vrcp.f32 %v4855_v34  ;;  %v4867_v38 = vpop.xlane.xlu1 %4866 }
 0x6ba   : > { %7088 = vrcp.f32 %v4861_v35 }
 0x6bb   : > { %v4876_v29 = vpop.xlane.xlu0 %4875 }
 0x6bf   : > { %v4858_v25 = vpop.xlane.xlu0 %4857 }
 0x6c0   : > { %7090 = vrcp.f32 %v4858_v25 }
 0x6c1   : > { %7092 = vrcp.f32 %v4876_v29 }
 0x6c2   : > { %7094 = vrcp.f32 %v4867_v38 }
 0x6c3   : > { %7096 = vrcp.f32 %v4873_v60  ;;  %v4870_v59 = vpop.xlane.xlu0 %4869 }
 0x6c4   : > { %7098 = vrcp.f32 %v4870_v59 }
 0x6c5   : > { %v7085_v15 = vpop.eup %7084 }
 0x6c6   : > { %v7087_v48 = vpop.eup %7086  ;;  %v4920_v55 = vmul.f32 %v7085_v15, %v8440_v39 }
 0x6c7   : > { %v7089_v24 = vpop.eup %7088  ;;  %v4917_v40 = vmul.f32 %v7087_v48, %v8434_v19 }
 0x6c8   : > { %v4919_v22 = vmul.f32 %v7089_v24, %v8425_v41 }
 0x6ca   : > { %v4934_v7 = vpack.c.bf16 %v4920_v55, %v4919_v22 }
 0x6cd   : > { %v7091_v33 = vpop.eup %7090  ;;  %v4885_v26 = vpop.xlane.xlu1 %4884 }
 0x6ce   : > { %v7093_v4 = vpop.eup %7092  ;;  %v4918_v51 = vmul.f32 %v7091_v33, %v8451_v3 }
 0x6cf   : > { %v7095_v54 = vpop.eup %7094  ;;  %v4924_v44 = vmul.f32 %v7093_v4, %v8446_v46  ;;  %v7039_v46 = vld [vmem:[#allocation3 + $0x48] sm:$0xff]  }
 0x6d0   : > { %v7097_v61 = vpop.eup %7096  ;;  %v4933_v0 = vpack.c.bf16 %v4918_v51, %v4917_v40  ;;  %v4921_v39 = vmul.f32 %v7095_v54, %v8436_v63  ;;  %v7042_v63 = vld [vmem:[#allocation3 + $0x68] sm:$0xff]  }
 0x6d1   : > { %v7099_v6 = vpop.eup %7098  ;;  %v4879_v2 = vpop.xlane.xlu1 %4878  ;;  %v4923_v3 = vmul.f32 %v7097_v61, %v8430_v21  ;;  %v7041_v21 = vld [vmem:[#allocation3 + $0x40] sm:$0xff]  }
 0x6d2   : > { %v4888_v53 = vpop.xlane.xlu0 %4887  ;;  %6804 = vmatprep.mubr.msk.bf16.mxu1 %vm4756_vm11, %v4933_v0  ;;  %v4922_v19 = vmul.f32 %v7099_v6, %v8457_v13 }
 0x6d3   : > { %6805 = vmatmul.mubr.msk.bf16.vlgmr.msra.gmra.mxu1 %vm4756_vm11, %v4934_v7  ;;  %7100 = vrcp.f32 %v4888_v53  ;;  %v4936_v12 = vpack.c.bf16 %v4924_v44, %v4923_v3 }
 0x6d4   : > { %v4935_v41 = vpack.c.bf16 %v4922_v19, %v4921_v39  ;;  %6821 = vmatpush3.bf16.msra.mxu1 %v7036_v11  ;;  %7102 = vrcp.f32 %v4879_v2 }
 0x6d5   : > { %v4891_v30 = vpop.xlane.xlu1 %4890  ;;  %6822 = vmatprep.subr.bf16.mxu1 %v7037_v1  ;;  %7104 = vrcp.f32 %v4885_v26 }
 0x6d6   : > { %v4882_v49 = vpop.xlane.xlu0 %4881  ;;  %6816 = vmatprep.mubr.msk.bf16.mxu0 %vm4756_vm11, %v4935_v41 }
 0x6d7   : > { %7106 = vrcp.f32 %v4882_v49  ;;  %6817 = vmatmul.mubr.msk.bf16.vlgmr.msra.gmra.mxu0 %vm4756_vm11, %v4936_v12 }
 0x6d8   : > { %6823 = vmatpush3.bf16.msra.mxu1 %v7037_v1  ;;  %6833 = vmatpush3.bf16.msra.mxu0 %v7038_v9  ;;  %7108 = vrcp.f32 %v4891_v30 }
 0x6d9   : > { %6824 = vmatprep.subr.bf16.mxu1 %v7039_v46  ;;  %6834 = vmatprep.subr.bf16.mxu0 %v7040_v20  ;;  %v4897_v13 = vpop.xlane.xlu1 %4896 }
 0x6da   : > { %v4894_v58 = vpop.xlane.xlu0 %4893 }
 0x6db   : > { %7110 = vrcp.f32 %v4894_v58 }
 0x6dc   : > { %6825 = vmatpush3.bf16.msra.mxu1 %v7039_v46  ;;  %6835 = vmatpush3.bf16.msra.mxu0 %v7040_v20  ;;  %7112 = vrcp.f32 %v4897_v13 }
 0x6dd   : > { %6826 = vmatprep.subr.bf16.mxu1 %v7041_v21  ;;  %6836 = vmatprep.subr.bf16.mxu0 %v7042_v63 }
 0x6de   : > { %v4900_v37 = vpop.xlane.xlu0 %4899 }
 0x6df   : > { %7114 = vrcp.f32 %v4900_v37 }
 0x6e0   : > { %6827 = vmatpush3.bf16.msra.mxu1 %v7041_v21  ;;  %6837 = vmatpush3.bf16.msra.mxu0 %v7042_v63  ;;  %v7101_v47 = vpop.eup %7100 }
 0x6e1   : > { %6838 = vmatprep.subr.bf16.mxu0 %v7043_v5  ;;  %v7103_v8 = vpop.eup %7102  ;;  %v4928_v45 = vmul.f32 %v7101_v47, %v8472_v23 }
 0x6e2   : > { %v7105_v28 = vpop.eup %7104  ;;  %v4925_v14 = vmul.f32 %v7103_v8, %v8470_v62 }
 0x6e3   : > { %v4927_v50 = vmul.f32 %v7105_v28, %v8466_v56 }
 0x6e4   : > { %v7107_v42 = vpop.eup %7106  ;;  %6839 = vmatpush3.bf16.msra.mxu0 %v7043_v5 }
 0x6e5   : > { %v4926_v36 = vmul.f32 %v7107_v42, %v8480_v43  ;;  %v7109_v52 = vpop.eup %7108  ;;  %v4938_v9 = vpack.c.bf16 %v4928_v45, %v4927_v50 }
 0x6e6   : > { %v4929_v35 = vmul.f32 %v7109_v52, %v8478_v17 }
 0x6e7   : > { %v4937_v18 = vpack.c.bf16 %v4926_v36, %v4925_v14 }
 0x6e8   : > { %v7111_v11 = vpop.eup %7110 }
 0x6e9   : > { %6828 = vmatprep.mubr.msk.bf16.mxu1 %vm4756_vm11, %v4937_v18  ;;  %v4930_v60 = vmul.f32 %v7111_v11, %v8488_v16  ;;  %v7113_v31 = vpop.eup %7112 }
 0x6ea   : > { %6829 = vmatmul.mubr.msk.bf16.vlgmr.msra.gmra.mxu1 %vm4756_vm11, %v4938_v9  ;;  %v4931_v62 = vmul.f32 %v7113_v31, %v8486_v10 }
 0x6eb   : > { %v4939_v23 = vpack.c.bf16 %v4930_v60, %v4929_v35 }
 0x6ec   : > { %v7115_v34 = vpop.eup %7114 }
 0x6ed   : > { %6840 = vmatprep.mubr.msk.bf16.mxu0 %vm4756_vm11, %v4939_v23  ;;  %v4932_v56 = vmul.f32 %v7115_v34, %v8494_v27 }
 0x6ef   : > { %v4940_v43 = vpack.c.bf16 %v4932_v56, %v4931_v62 }
 0x6f1   : > { %6841 = vmatmul.mubr.msk.bf16.vlgmr.msra.gmra.mxu0 %vm4756_vm11, %v4940_v43 }
 0x793   : > { %v6806_v29 = vpop.f32.mrf.mxu1 }
 0x795   : > { %v5005_v38 = vpop.f32.mrf.mxu1 }
 0x797   : > { %v6818_v25 = vpop.f32.mrf.mxu0  ;;  %v6807_v17 = vpop.f32.mrf.mxu1 }
 0x799   : > { %v5084_v59 = vpop.f32.mrf.mxu0  ;;  %v5008_v16 = vpop.f32.mrf.mxu1 }
 0x79b   : > { %v8522_v48 = vpop.f32.mrf.mxu0 }
 0x79d   : > { %v8524_v26 = vpop.f32.mrf.mxu0 }
 0x7aa   : > { %v6830_v15 = vpop.f32.mrf.mxu1 }
 0x7ab   : > { %v5393_v55 = vcombine.low %v6806_v29, %v6830_v15  ;;  %v5394_v10 = vcombine.high %v6806_v29, %v6830_v15 }
 0x7ac   : > { %v5163_v24 = vpop.f32.mrf.mxu1 }
 0x7ad   : > { %v5257_v4 = vcombine.low %v5005_v38, %v5163_v24  ;;  %v5258_v27 = vcombine.high %v5005_v38, %v5163_v24  ;;  %v5401_v7 = vrot.slane %v5393_v55, %v8167_v57  ;;  %v5408_v44 = vrot.slane %v5394_v10, %v8167_v57 }
 0x7ae   : > { %v6831_v33 = vpop.f32.mrf.mxu1 }
 0x7af   : > { %v5461_v51 = vcombine.low %v6807_v17, %v6831_v33  ;;  %v5462_v54 = vcombine.high %v6807_v17, %v6831_v33  ;;  %v5265_v1 = vrot.slane %v5257_v4, %v8167_v57  ;;  %v5272_v53 = vrot.slane %v5258_v27, %v8167_v57 }
 0x7b0   : > { %v5166_v40 = vpop.f32.mrf.mxu1 }
 0x7b1   : > { %v5325_v22 = vcombine.low %v5008_v16, %v5166_v40  ;;  %v5326_v61 = vcombine.high %v5008_v16, %v5166_v40  ;;  %v6842_v0 = vpop.f32.mrf.mxu0  ;;  %v5469_v12 = vrot.slane %v5461_v51, %v8167_v57  ;;  %v5476_v46 = vrot.slane %v5462_v54, %v8167_v57 }
 0x7b2   : > { %v5409_v6 = vcombine.low %v6818_v25, %v6842_v0  ;;  %v5410_v2 = vcombine.high %v6818_v25, %v6842_v0 }
 0x7b3   : > { %v5242_v39 = vpop.f32.mrf.mxu0  ;;  %v8535_v20 = vrot.slane %v5325_v22, %v8167_v57  ;;  %v8538_v49 = vrot.slane %v5326_v61, %v8167_v57 }
 0x7b4   : > { %v5417_v19 = vrot.slane %v5409_v6, %v8167_v57  ;;  %v5424_v3 = vrot.slane %v5410_v2, %v8167_v57  ;;  %v5273_v41 = vcombine.low %v5084_v59, %v5242_v39  ;;  %v5274_v30 = vcombine.high %v5084_v59, %v5242_v39 }
 0x7b5   : > { %v6843_v21 = vpop.f32.mrf.mxu0 }
 0x7b6   : > { %v5425_v63 = vcombine.low %v5401_v7, %v5417_v19  ;;  %v5426_v13 = vcombine.high %v5401_v7, %v5417_v19  ;;  %v5441_v58 = vcombine.low %v5408_v44, %v5424_v3  ;;  %v5442_v5 = vcombine.high %v5408_v44, %v5424_v3 }
 0x7b7   : > { %v5281_v37 = vrot.slane %v5273_v41, %v8167_v57  ;;  %v5288_v47 = vrot.slane %v5274_v30, %v8167_v57  ;;  %v5477_v8 = vcombine.low %v8522_v48, %v6843_v21  ;;  %v5478_v28 = vcombine.high %v8522_v48, %v6843_v21  ;;  %v5245_v43 = vpop.f32.mrf.mxu0 }
 0x7b8   : > { %v5433_v42 = vrot.slane %v5425_v63, %v8177_v32  ;;  %v5440_v45 = vrot.slane %v5426_v13, %v8177_v32  ;;  %v5449_v14 = vrot.slane %v5441_v58, %v8177_v32  ;;  %v5456_v36 = vrot.slane %v5442_v5, %v8177_v32 }
 0x7b9   : > { %v5289_v52 = vcombine.low %v5265_v1, %v5281_v37  ;;  %v5290_v50 = vcombine.high %v5265_v1, %v5281_v37  ;;  %v5305_v18 = vcombine.low %v5272_v53, %v5288_v47  ;;  %v5306_v11 = vcombine.high %v5272_v53, %v5288_v47 }
 0x7ba   : > { %v5665_v9 = vcombine.low %v5433_v42, %v5440_v45  ;;  %v6542_v35 = vcombine.high %v5433_v42, %v5440_v45  ;;  %v5681_v60 = vcombine.low %v5449_v14, %v5456_v36  ;;  %v6543_v31 = vcombine.high %v5449_v14, %v5456_v36 }
 0x7bb   : > { %v5297_v23 = vrot.slane %v5289_v52, %v8177_v32  ;;  %v5304_v34 = vrot.slane %v5290_v50, %v8177_v32  ;;  %v5313_v62 = vrot.slane %v5305_v18, %v8177_v32  ;;  %v5320_v56 = vrot.slane %v5306_v11, %v8177_v32 }
 0x7bc   : > { %v8553_v29 = vrot.slane %v5665_v9, %v8167_v57  ;;  %v8556_v38 = vrot.slane %v6542_v35, %v8167_v57  ;;  %v8559_v25 = vrot.slane %v5681_v60, %v8167_v57  ;;  %v8562_v17 = vrot.slane %v6543_v31, %v8167_v57 }
 0x7bd   : > { %v5529_v59 = vcombine.low %v5297_v23, %v5304_v34  ;;  %v6538_v16 = vcombine.high %v5297_v23, %v5304_v34  ;;  %v5545_v15 = vcombine.low %v5313_v62, %v5320_v56  ;;  %v6539_v48 = vcombine.high %v5313_v62, %v5320_v56 }
 0x7be   : > { %v5485_v24 = vrot.slane %v5477_v8, %v8167_v57  ;;  %v5492_v33 = vrot.slane %v5478_v28, %v8167_v57  ;;  %v5341_v55 = vcombine.low %v8524_v26, %v5245_v43  ;;  %v5342_v10 = vcombine.high %v8524_v26, %v5245_v43 }
 0x7bf   : > { %v8569_v4 = vrot.slane %v5529_v59, %v8167_v57  ;;  %v8572_v27 = vrot.slane %v6538_v16, %v8167_v57  ;;  %v8575_v40 = vrot.slane %v5545_v15, %v8167_v57  ;;  %v8578_v51 = vrot.slane %v6539_v48, %v8167_v57 }
 0x7c0   : > { %v5493_v54 = vcombine.low %v5469_v12, %v5485_v24  ;;  %v5494_v22 = vcombine.high %v5469_v12, %v5485_v24  ;;  %v5509_v61 = vcombine.low %v5476_v46, %v5492_v33  ;;  %v5510_v0 = vcombine.high %v5476_v46, %v5492_v33 }
 0x7c1   : > { %v5349_v6 = vrot.slane %v5341_v55, %v8167_v57  ;;  %v5356_v26 = vrot.slane %v5342_v10, %v8167_v57  ;;  %v5698_v2 = vcombine.high %v8553_v29, %v8556_v38  ;;  %v5714_v7 = vcombine.high %v8559_v25, %v8562_v17 }
 0x7c2   : > { %v5501_v44 = vrot.slane %v5493_v54, %v8177_v32  ;;  %v5508_v1 = vrot.slane %v5494_v22, %v8177_v32  ;;  %v5517_v53 = vrot.slane %v5509_v61, %v8177_v32  ;;  %v5524_v39 = vrot.slane %v5510_v0, %v8177_v32 }
 0x7c3   : > { %v5357_v19 = vcombine.low %v8535_v20, %v5349_v6  ;;  %v5358_v3 = vcombine.high %v8535_v20, %v5349_v6  ;;  %v5373_v41 = vcombine.low %v8538_v49, %v5356_v26  ;;  %v5374_v30 = vcombine.high %v8538_v49, %v5356_v26 }
 0x7c4   : > { %v5733_v12 = vcombine.low %v5501_v44, %v5508_v1  ;;  %v6544_v46 = vcombine.high %v5501_v44, %v5508_v1  ;;  %v5749_v21 = vcombine.low %v5517_v53, %v5524_v39  ;;  %v6545_v63 = vcombine.high %v5517_v53, %v5524_v39 }
 0x7c5   : > { %v5365_v13 = vrot.slane %v5357_v19, %v8177_v32  ;;  %v5372_v58 = vrot.slane %v5358_v3, %v8177_v32  ;;  %v5381_v5 = vrot.slane %v5373_v41, %v8177_v32  ;;  %v5388_v37 = vrot.slane %v5374_v30, %v8177_v32  ;;  %v7044_v41 = vld [vmem:[%s8788_s8 + $0x8] sm:$0xff]  }
 0x7c6   : > { %v5740_v47 = vrot.slane %v5733_v12, %v8167_v57  ;;  %v5748_v20 = vrot.slane %v6544_v46, %v8167_v57  ;;  %v5756_v8 = vrot.slane %v5749_v21, %v8167_v57  ;;  %v5764_v49 = vrot.slane %v6545_v63, %v8167_v57  ;;  %6844 = vmatprep.subr.bf16.mxu1 %v7044_v41 }
 0x7c7   : > { %v5597_v28 = vcombine.low %v5365_v13, %v5372_v58  ;;  %v6540_v42 = vcombine.high %v5365_v13, %v5372_v58  ;;  %v5613_v45 = vcombine.low %v5381_v5, %v5388_v37  ;;  %v6541_v14 = vcombine.high %v5381_v5, %v5388_v37  ;;  %6845 = vmatpush3.bf16.msra.mxu1 %v7044_v41  ;;  %v7045_v58 = vld [vmem:[%s8788_s8] sm:$0xff]   ;;  %v3598_v41 = vld [vmem:[%s3594_s17 + $0x18] sm:$0xff] }
 0x7c8   : > { %v8603_v36 = vrot.slane %v5698_v2, %v8177_v32  ;;  %v8606_v52 = vrot.slane %v5714_v7, %v8177_v32  ;;  %v5766_v50 = vcombine.high %v5740_v47, %v5748_v20  ;;  %v5782_v18 = vcombine.high %v5756_v8, %v5764_v49  ;;  %6846 = vmatprep.subr.bf16.mxu1 %v7045_v58 }
 0x7c9   : > { %v5604_v11 = vrot.slane %v5597_v28, %v8167_v57  ;;  %v5612_v9 = vrot.slane %v6540_v42, %v8167_v57  ;;  %v5620_v35 = vrot.slane %v5613_v45, %v8167_v57  ;;  %v5628_v60 = vrot.slane %v6541_v14, %v8167_v57 }
 0x7ca   : > { %v5731_v31 = vcombine.low %v8603_v36, %v8606_v52  ;;  %v5780_v23 = vrot.slane %v5766_v50, %v8177_v32  ;;  %v5796_v34 = vrot.slane %v5782_v18, %v8177_v32  ;;  %v5697_v62 = vcombine.low %v8553_v29, %v8556_v38 }
 0x7cb   : > { %v5713_v56 = vcombine.low %v8559_v25, %v8562_v17  ;;  %v5765_v43 = vcombine.low %v5740_v47, %v5748_v20  ;;  %v5781_v59 = vcombine.low %v5756_v8, %v5764_v49  ;;  %v5562_v16 = vcombine.high %v8569_v4, %v8572_v27  ;;  %6847 = vmatpush3.bf16.msra.mxu1 %v7045_v58 }
 0x7cc   : > { %v5799_v15 = vcombine.low %v5780_v23, %v5796_v34  ;;  %v8623_v57 = vrot.slane %v5697_v62, %v8177_v32  ;;  %v5578_v48 = vcombine.high %v8575_v40, %v8578_v51  ;;  %v5630_v24 = vcombine.high %v5604_v11, %v5612_v9 }
 0x7cd   : > { %v8628_v33 = vrot.slane %v5713_v56, %v8177_v32  ;;  %v8631_v29 = vrot.slane %v5765_v43, %v8177_v32  ;;  %v8634_v38 = vrot.slane %v5781_v59, %v8177_v32  ;;  %v5576_v25 = vrot.slane %v5562_v16, %v8177_v32 }
 0x7ce   : > { %v6983_v17 = vpack.i.bf16 %v5799_v15, %v5731_v31  ;;  %v5592_v55 = vrot.slane %v5578_v48, %v8177_v32  ;;  %v5644_v10 = vrot.slane %v5630_v24, %v8177_v32  ;;  %v5646_v54 = vcombine.high %v5620_v35, %v5628_v60 }
 0x7cf   : > { %v5729_v22 = vcombine.low %v8623_v57, %v8628_v33  ;;  %v5730_v61 = vcombine.high %v8623_v57, %v8628_v33  ;;  %v5798_v0 = vcombine.high %v8631_v29, %v8634_v38  ;;  %v5797_v6 = vcombine.low %v8631_v29, %v8634_v38 }
 0x7d0   : > { %6984 = vrot.lane.b32.xlu1 %v6983_v17, %s7191_s16  ;;  %v5660_v26 = vrot.slane %v5646_v54, %v8177_v32  ;;  %v5561_v2 = vcombine.low %v8569_v4, %v8572_v27  ;;  %v5577_v7 = vcombine.low %v8575_v40, %v8578_v51  ;;  %v5629_v1 = vcombine.low %v5604_v11, %v5612_v9  ;;  %v6546_v54 = vld [vmem:[%s8789_s9] ss:$0 sm:$0xff] }
 0x7d1   : > { %v6978_v44 = vpack.i.bf16 %v5798_v0, %v5730_v61  ;;  %v5645_v53 = vcombine.low %v5620_v35, %v5628_v60  ;;  %v5596_v30 = vcombine.high %v5576_v25, %v5592_v55  ;;  %v5595_v5 = vcombine.low %v5576_v25, %v5592_v55  ;;  %v3595_v61 = vld [vmem:[%s3594_s17] sm:$0xff] }
 0x7d2   : > { %v5664_v39 = vcombine.high %v5644_v10, %v5660_v26  ;;  %v5569_v19 = vrot.slane %v5561_v2, %v8177_v32  ;;  %v5585_v3 = vrot.slane %v5577_v7, %v8177_v32  ;;  %v5637_v4 = vrot.slane %v5629_v1, %v8177_v32  ;;  %v3597_v2 = vld [vmem:[%s3594_s17 + $0x10] sm:$0xff]  ;;  %v3596_v1 = vld [vmem:[%s3594_s17 + $0x8] sm:$0xff] }
 0x7d3   : > { %6979 = vrot.lane.b32.xlu0 %v6978_v44, %s7192_s27  ;;  %v5653_v27 = vrot.slane %v5645_v53, %v8177_v32  ;;  %v5663_v13 = vcombine.low %v5644_v10, %v5660_v26  ;;  %v5800_v37 = vcombine.high %v5780_v23, %v5796_v34  ;;  %v5732_v47 = vcombine.high %v8603_v36, %v8606_v52 }
 0x7d4   : > { %v5593_v40 = vcombine.low %v5569_v19, %v5585_v3  ;;  %v6998_v51 = vpack.i.bf16 %v5664_v39, %v5596_v30  ;;  %v5594_v12 = vcombine.high %v5569_v19, %v5585_v3 }
 0x7d5   : > { %v5662_v46 = vcombine.high %v5637_v4, %v5653_v27  ;;  %v5661_v21 = vcombine.low %v5637_v4, %v5653_v27  ;;  %v6993_v32 = vpack.i.bf16 %v5663_v13, %v5595_v5  ;;  %v7003_v20 = vpack.i.bf16 %v5800_v37, %v5732_v47 }
 0x7d7   : > { %6999 = vrot.lane.b32.xlu0 %v6998_v51, %s7193_s28  ;;  %v6988_v63 = vpack.i.bf16 %v5662_v46, %v5594_v12 }
 0x7d9   : > { %6989 = vrot.lane.b32.xlu1 %v6988_v63, %s7192_s27 }
 0x7dd   : > { %6994 = vrot.lane.b32.xlu1 %v6993_v32, %s7191_s16 }
 0x7e1   : > { %7004 = vrot.lane.b32.xlu1 %v7003_v20, %s7193_s28 }
 0x842   : > { %v6985_v8 = vpop.permute.xlu1 %6984 }
 0x843   : > { %v6987_v9 = vunpack.i.h.bf16 %v6985_v8  ;;  %v6986_v35 = vunpack.i.l.bf16 %v6985_v8 }
 0x845   : > { %v6980_v49 = vpop.permute.xlu0 %6979 }
 0x846   : > { %v6982_v14 = vunpack.i.h.bf16 %v6980_v49  ;;  %v6981_v50 = vunpack.i.l.bf16 %v6980_v49 }
 0x848   : > { %v5851_v62 = vsel %vm4372_vm4, %v5729_v22, %v6981_v50  ;;  %v5852_v56 = vsel %vm4372_vm4, %v5797_v6, %v6982_v14 }
 0x849   : > { %v7000_v18 = vpop.permute.xlu0 %6999  ;;  %v5856_v57 = vsel %vm5853_vm15, %v5851_v62, %v6986_v35  ;;  %v5857_v33 = vsel %vm5853_vm15, %v5852_v56, %v6987_v9  ;;  %v7046_v9 = vld [vmem:[%s8817_s12 + $0x8] sm:$0xff]   ;;  %v7047_v35 = vld [vmem:[%s8817_s12] sm:$0xff]  }
 0x84a   : > { %v7002_v23 = vunpack.i.h.bf16 %v7000_v18  ;;  %v7001_v34 = vunpack.i.l.bf16 %v7000_v18  ;;  %6852 = vmatprep.subr.bf16.mxu0 %v7046_v9 }
 0x84b   : > { %v6990_v28 = vpop.permute.xlu1 %6989  ;;  %6853 = vmatpush3.bf16.msra.mxu0 %v7046_v9 }
 0x84c   : > { %v6992_v42 = vunpack.i.h.bf16 %v6990_v28  ;;  %v6991_v45 = vunpack.i.l.bf16 %v6990_v28  ;;  %6854 = vmatprep.subr.bf16.mxu0 %v7047_v35 }
 0x84e   : > { %v5849_v36 = vsel %vm4372_vm4, %v5593_v40, %v6991_v45  ;;  %v5850_v52 = vsel %vm4372_vm4, %v5661_v21, %v6992_v42 }
 0x84f   : > { %v6995_v11 = vpop.permute.xlu1 %6994  ;;  %6855 = vmatpush3.bf16.msra.mxu0 %v7047_v35 }
 0x850   : > { %v6997_v60 = vunpack.i.h.bf16 %v6995_v11  ;;  %v6996_v31 = vunpack.i.l.bf16 %v6995_v11 }
 0x852   : > { %v5854_v43 = vsel %vm5853_vm15, %v5849_v36, %v6996_v31  ;;  %v5855_v59 = vsel %vm5853_vm15, %v5850_v52, %v6997_v60 }
 0x853   : > { %v7005_v16 = vpop.permute.xlu1 %7004  ;;  %v5859_v15 = vsel %vm5858_vm1, %v5854_v43, %v7001_v34  ;;  %v5860_v48 = vsel %vm5858_vm1, %v5855_v59, %v7002_v23 }
 0x854   : > { %v7007_v24 = vunpack.i.h.bf16 %v7005_v16  ;;  %v7006_v29 = vunpack.i.l.bf16 %v7005_v16  ;;  %v5863_v38 = vpack.c.bf16 %v5860_v48, %v5859_v15 }
 0x856   : > { %v5862_v25 = vsel %vm5858_vm1, %v5857_v33, %v7007_v24  ;;  %v5861_v17 = vsel %vm5858_vm1, %v5856_v57, %v7006_v29  ;;  %6848 = vmatprep.mubr.msk.bf16.mxu1 %vm3640_vm3, %v5863_v38 }
 0x857   : > { %v5864_v55 = vpack.c.bf16 %v5862_v25, %v5861_v17 }
 0x859   : > { %6849 = vmatmul.mubr.msk.bf16.vlgmr.msra.gmra.mxu1 %vm3640_vm3, %v5864_v55 }
 0x919   : > { %v6850_v10 = vpop.f32.mrf.mxu1 }
 0x91a   : > { %v5937_v0 = vadd.f32 %v6850_v10, %v6546_v54 }
 0x91b   : > { %v5928_v22 = vpop.f32.mrf.mxu1 }
 0x91c   : > { %v5929_v6 = vadd.f32 %v6546_v54, %v5928_v22  ;;  %v5945_v3 = vadd.f32 %v5937_v0, %v3597_v2 }
 0x91d   : > { %v6851_v26 = vpop.f32.mrf.mxu1 }
 0x91e   : > { %v5943_v7 = vadd.f32 %v5929_v6, %v3595_v61  ;;  %v5940_v53 = vadd.f32 %v6851_v26, %v6546_v54  ;;  %v5953_v27 = vsel %vm3640_vm3, %v5945_v3, 0.0 }
 0x91f   : > { %v5931_v44 = vpop.f32.mrf.mxu1 }
 0x920   : > { %v5932_v39 = vadd.f32 %v6546_v54, %v5931_v44  ;;  %v5947_v19 = vsel %vm3640_vm3, %v5943_v7, 0.0  ;;  %v5946_v40 = vadd.f32 %v5940_v53, %v3598_v41 }
 0x921   : > { %5948 = vadd.xlane.f32.xlu0 %v5947_v19 }
 0x922   : > { %v5944_v30 = vadd.f32 %v5932_v39, %v3596_v1  ;;  %v5956_v51 = vsel %vm3640_vm3, %v5946_v40, 0.0 }
 0x924   : > { %v5950_v4 = vsel %vm3640_vm3, %v5944_v30, 0.0 }
 0x925   : > { %5951 = vadd.xlane.f32.xlu1 %v5950_v4  ;;  %5954 = vadd.xlane.f32.xlu0 %v5953_v27 }
 0x929   : > { %5957 = vadd.xlane.f32.xlu0 %v5956_v51 }
 0x9aa   : > { %v5949_v12 = vpop.xlane.xlu0 %5948 }
 0x9ab   : > { %v5960_v46 = vmul.f32 0.03125, %v5949_v12  ;;  %v7048_v12 = vld [vmem:[%s8818_s22 + $0x18] sm:$0xff]  }
 0x9ac   : > { %6860 = vmatprep.subr.bf16.mxu1 %v7048_v12 }
 0x9ad   : > { %v8693_v21 = vsub.f32 %v5943_v7, %v5960_v46  ;;  %6861 = vmatpush3.bf16.msra.mxu1 %v7048_v12  ;;  %v7049_v46 = vld [vmem:[%s8818_s22 + $0x10] sm:$0xff]  }
 0x9ae   : > { %v5952_v63 = vpop.xlane.xlu1 %5951  ;;  %v5955_v13 = vpop.xlane.xlu0 %5954  ;;  %6862 = vmatprep.subr.bf16.mxu1 %v7049_v46 }
 0x9af   : > { %v5961_v58 = vmul.f32 0.03125, %v5952_v63  ;;  %v5962_v5 = vmul.f32 0.03125, %v5955_v13  ;;  %v5968_v32 = vmul.f32 %v8693_v21, %v8693_v21  ;;  %v7051_v63 = vld [vmem:[%s8818_s22] sm:$0xff]  }
 0x9b0   : > { %v6551_v13 = vld [vmem:[%s8819_s30] ss:$0 sm:$0xff] }
 0x9b1   : > { %v8697_v37 = vsub.f32 %v5944_v30, %v5961_v58  ;;  %v8699_v47 = vsub.f32 %v5945_v3, %v5962_v5  ;;  %v5972_v20 = vsel %vm3640_vm3, %v5968_v32, 0.0  ;;  %6863 = vmatpush3.bf16.msra.mxu1 %v7049_v46 }
 0x9b2   : > { %5973 = vadd.xlane.f32.xlu1 %v5972_v20  ;;  %v5958_v8 = vpop.xlane.xlu0 %5957 }
 0x9b3   : > { %v5963_v49 = vmul.f32 0.03125, %v5958_v8  ;;  %v5969_v28 = vmul.f32 %v8697_v37, %v8697_v37  ;;  %v5970_v42 = vmul.f32 %v8699_v47, %v8699_v47 }
 0x9b5   : > { %v8706_v45 = vsub.f32 %v5946_v40, %v5963_v49  ;;  %v5975_v14 = vsel %vm3640_vm3, %v5969_v28, 0.0  ;;  %v5978_v50 = vsel %vm3640_vm3, %v5970_v42, 0.0 }
 0x9b6   : > { %5976 = vadd.xlane.f32.xlu0 %v5975_v14  ;;  %5979 = vadd.xlane.f32.xlu1 %v5978_v50 }
 0x9b7   : > { %v5971_v18 = vmul.f32 %v8706_v45, %v8706_v45 }
 0x9b9   : > { %v5981_v11 = vsel %vm3640_vm3, %v5971_v18, 0.0 }
 0x9ba   : > { %5982 = vadd.xlane.f32.xlu0 %v5981_v11 }
 0xa3b   : > { %v5974_v60 = vpop.xlane.xlu1 %5973 }
 0xa3c   : > { %v5984_v31 = vmul.f32 0.032258064, %v5974_v60 }
 0xa3e   : > { %7116 = vrsqrt.f32 %v5984_v31  ;;  %vm5990_vm2 = vcmp.eq.f32.partialorder %v5984_v31, inf  ;;  %v5993_v16 = vand.u32 2147483648, %v5984_v31  ;;  %vm5992_vm0 = vcmp.eq.f32.partialorder %v5984_v31, 0.0 }
 0xa3f   : > { %v5980_v23 = vpop.xlane.xlu1 %5979  ;;  %v5977_v34 = vpop.xlane.xlu0 %5976 }
 0xa40   : > { %v5986_v36 = vmul.f32 0.032258064, %v5980_v23  ;;  %v5985_v52 = vmul.f32 0.032258064, %v5977_v34 }
 0xa42   : > { %7118 = vrsqrt.f32 %v5986_v36  ;;  %vm6004_vm4 = vcmp.eq.f32.partialorder %v5986_v36, inf  ;;  %v6007_v33 = vand.u32 2147483648, %v5986_v36  ;;  %vm6006_vm5 = vcmp.eq.f32.partialorder %v5986_v36, 0.0 }
 0xa43   : > { %7120 = vrsqrt.f32 %v5985_v52  ;;  %v5983_v62 = vpop.xlane.xlu0 %5982  ;;  %vm5997_vm6 = vcmp.eq.f32.partialorder %v5985_v52, inf  ;;  %v6000_v55 = vand.u32 2147483648, %v5985_v52  ;;  %vm5999_vm7 = vcmp.eq.f32.partialorder %v5985_v52, 0.0 }
 0xa44   : > { %v5987_v56 = vmul.f32 0.032258064, %v5983_v62 }
 0xa46   : > { %7122 = vrsqrt.f32 %v5987_v56  ;;  %vm6011_vm8 = vcmp.eq.f32.partialorder %v5987_v56, inf  ;;  %v6014_v2 = vand.u32 2147483648, %v5987_v56  ;;  %vm6013_vm9 = vcmp.eq.f32.partialorder %v5987_v56, 0.0 }
 0xa4b   : > { %v7117_v43 = vpop.eup %7116 }
 0xa4c   : > { %v5989_v59 = vmul.f32 %v7117_v43, %v5984_v31 }
 0xa4e   : > { %v5991_v15 = vsel %vm5990_vm2, %v5984_v31, %v5989_v59 }
 0xa4f   : > { %v7119_v48 = vpop.eup %7118  ;;  %v5994_v24 = vsel %vm5992_vm0, %v5993_v16, %v5991_v15 }
 0xa50   : > { %v7121_v29 = vpop.eup %7120  ;;  %v6003_v38 = vmul.f32 %v7119_v48, %v5986_v36  ;;  %v6016_v57 = vadd.f32 1000000.0, %v5994_v24  ;;  %v6556_v24 = vld [vmem:[%s8820_s29] ss:$0 sm:$0xff] }
 0xa51   : > { %v5996_v25 = vmul.f32 %v7121_v29, %v5985_v52 }
 0xa52   : > { %v6005_v17 = vsel %vm6004_vm4, %v5986_v36, %v6003_v38  ;;  %7124 = vrcp.f32 %v6016_v57 }
 0xa53   : > { %v7123_v10 = vpop.eup %7122  ;;  %v6008_v54 = vsel %vm6006_vm5, %v6007_v33, %v6005_v17  ;;  %v5998_v22 = vsel %vm5997_vm6, %v5985_v52, %v5996_v25 }
 0xa54   : > { %v6018_v61 = vadd.f32 1000000.0, %v6008_v54  ;;  %v6001_v0 = vsel %vm5999_vm7, %v6000_v55, %v5998_v22  ;;  %v6010_v6 = vmul.f32 %v7123_v10, %v5987_v56 }
 0xa55   : > { %v6017_v26 = vadd.f32 1000000.0, %v6001_v0 }
 0xa56   : > { %v6012_v7 = vsel %vm6011_vm8, %v5987_v56, %v6010_v6 }
 0xa57   : > { %7126 = vrcp.f32 %v6017_v26  ;;  %v6015_v44 = vsel %vm6013_vm9, %v6014_v2, %v6012_v7 }
 0xa58   : > { %7128 = vrcp.f32 %v6018_v61  ;;  %v6019_v1 = vadd.f32 1000000.0, %v6015_v44 }
 0xa5a   : > { %7130 = vrcp.f32 %v6019_v1 }
 0xa5f   : > { %v7125_v53 = vpop.eup %7124 }
 0xa60   : > { %v8720_v3 = vmul.f32 %v7125_v53, %v8693_v21  ;;  %v7050_v21 = vld [vmem:[%s8818_s22 + $0x8] sm:$0xff]  }
 0xa61   : > { %6864 = vmatprep.subr.bf16.mxu1 %v7050_v21 }
 0xa62   : > { %6865 = vmatpush3.bf16.msra.mxu1 %v7050_v21 }
 0xa63   : > { %6866 = vmatprep.subr.bf16.mxu1 %v7051_v63 }
 0xa64   : > { %v7127_v39 = vpop.eup %7126 }
 0xa65   : > { %v7129_v19 = vpop.eup %7128  ;;  %v8723_v41 = vmul.f32 %v7127_v39, %v8697_v37 }
 0xa66   : > { %v6026_v27 = vmul.f32 %v7129_v19, %v8699_v47  ;;  %6867 = vmatpush3.bf16.msra.mxu1 %v7051_v63 }
 0xa67   : > { %v7131_v30 = vpop.eup %7130  ;;  %v6032_v4 = vpack.c.bf16 %v8723_v41, %v8720_v3 }
 0xa68   : > { %v8729_v40 = vmul.f32 %v7131_v30, %v8706_v45 }
 0xa69   : > { %6856 = vmatprep.mubr.msk.bf16.mxu0 %vm3640_vm3, %v6032_v4 }
 0xa6a   : > { %v6033_v51 = vpack.c.bf16 %v8729_v40, %v6026_v27 }
 0xa6c   : > { %6857 = vmatmul.mubr.msk.bf16.vlgmr.msra.gmra.mxu0 %vm3640_vm3, %v6033_v51 }
 0xb2c   : > { %v6858_v58 = vpop.f32.mrf.mxu0 }
 0xb2d   : > { %v6106_v5 = vadd.f32 %v6858_v58, %v6551_v13 }
 0xb2e   : > { %v6097_v32 = vpop.f32.mrf.mxu0 }
 0xb2f   : > { %v6098_v37 = vadd.f32 %v6551_v13, %v6097_v32  ;;  %v6118_v47 = vmul.f32 0.70710677, %v6106_v5  ;;  %v6114_v62 = vmul.f32 0.5, %v6106_v5 }
 0xb30   : > { %v6859_v20 = vpop.f32.mrf.mxu0 }
 0xb31   : > { %v6116_v8 = vmul.f32 0.70710677, %v6098_v37  ;;  %v6109_v49 = vadd.f32 %v6859_v20, %v6551_v13  ;;  %v6112_v34 = vmul.f32 0.5, %v6098_v37 }
 0xb32   : > { %v6100_v28 = vpop.f32.mrf.mxu0 }
 0xb33   : > { %7132 = verf.f32 %v6116_v8  ;;  %v6119_v42 = vmul.f32 0.70710677, %v6109_v49  ;;  %v6101_v45 = vadd.f32 %v6551_v13, %v6100_v28  ;;  %v6115_v23 = vmul.f32 0.5, %v6109_v49 }
 0xb34   : > { %7134 = verf.f32 %v6118_v47 }
 0xb35   : > { %7136 = verf.f32 %v6119_v42  ;;  %v6117_v14 = vmul.f32 0.70710677, %v6101_v45  ;;  %v6113_v36 = vmul.f32 0.5, %v6101_v45 }
 0xb37   : > { %7138 = verf.f32 %v6117_v14 }
 0xb40   : > { %v7133_v50 = vpop.eup %7132 }
 0xb41   : > { %v7135_v18 = vpop.eup %7134  ;;  %v6124_v9 = vadd.f32 1.0, %v7133_v50 }
 0xb42   : > { %v7137_v11 = vpop.eup %7136  ;;  %v6126_v31 = vadd.f32 1.0, %v7135_v18 }
 0xb43   : > { %v6127_v35 = vadd.f32 1.0, %v7137_v11  ;;  %v6128_v43 = vmul.f32 %v6124_v9, %v6112_v34 }
 0xb44   : > { %v7139_v60 = vpop.eup %7138  ;;  %v6130_v16 = vmul.f32 %v6126_v31, %v6114_v62 }
 0xb45   : > { %v6125_v52 = vadd.f32 1.0, %v7139_v60  ;;  %v6131_v56 = vmul.f32 %v6127_v35, %v6115_v23 }
 0xb47   : > { %v6129_v59 = vmul.f32 %v6125_v52, %v6113_v36  ;;  %v6133_v48 = vpack.c.bf16 %v6131_v56, %v6130_v16 }
 0xb49   : > { %v6132_v15 = vpack.c.bf16 %v6129_v59, %v6128_v43 }
 0xb4b   : > { %6868 = vmatprep.mubr.msk.bf16.mxu1 %vm4756_vm11, %v6132_v15 }
 0xb4c   : > { %6869 = vmatmul.mubr.msk.bf16.vlgmr.msra.gmra.mxu1 %vm4756_vm11, %v6133_v48 }
 0xc0c   : > { %v6870_v29 = vpop.f32.mrf.mxu1 }
 0xc0d   : > { %v6222_v38 = vadd.f32 %v6870_v29, %v6556_v24 }
 0xc0e   : > { %v6213_v57 = vpop.f32.mrf.mxu1 }
 0xc0f   : > { %v6230_v33 = vadd.f32 %v6222_v38, %v6026_v27  ;;  %v6214_v25 = vadd.f32 %v6556_v24, %v6213_v57 }
 0xc10   : > { %v6871_v17 = vpop.f32.mrf.mxu1 }
 0xc11   : > { %6234 = vst.msk [vmem:[%s7317_s10 + $0x10] sm:$0xff] %vm3640_vm3, %v6230_v33  ;;  %v6228_v55 = vadd.f32 %v6214_v25, %v8720_v3  ;;  %v6225_v10 = vadd.f32 %v6871_v17, %v6556_v24 }
 0xc12   : > { %v6216_v54 = vpop.f32.mrf.mxu1 }
 0xc13   : > { %6232 = vst.msk [vmem:[%s7317_s10] sm:$0xff] %vm3640_vm3, %v6228_v55  ;;  %v6231_v22 = vadd.f32 %v6225_v10, %v8729_v40  ;;  %v6217_v61 = vadd.f32 %v6556_v24, %v6216_v54 }
 0xc15   : > { %6235 = vst.msk [vmem:[%s7317_s10 + $0x18] sm:$0xff] %vm3640_vm3, %v6231_v22  ;;  %v6229_v0 = vadd.f32 %v6217_v61, %v8723_v41 }
 0xc17   : > { %6233 = vst.msk [vmem:[%s7317_s10 + $0x8] sm:$0xff] %vm3640_vm3, %v6229_v0 }
 0xc18 PF: > { %s8821_s26 = sld [smem:[#allocation7_spill]] }
 0xc19   : > { %s8822_s29 = sld [smem:[#allocation5_spill]] }
 0xc1a   : > { %s8823_s30 = sld [smem:[#allocation6_spill]] }
 0xc1b   : > { %s8824_s15 = sld [smem:[#allocation8_spill]] }
 0xc1c   : > { %s8825_s16 = sld [smem:[#allocation9_spill]] }
 0xc1e   : > { %s24_s17 = sadd.s32 1, %s8821_s26  }
 0xc1f   : > { %p21_p9 = scmp.ge.s32.totalorder %s24_s17, 6  }
 0xc21   :  { %23 = sbr.rel (!%p21_p9) target bundleno = 5 (0x5), region = 115 }

</bundles_post_ra>
